<compile_context>
chip_gen: v7x
topology: tpu7x:2x2x1
jax: 0.10.0
libtpu: 0.0.40
codegen_flags: <defaults>
</compile_context>

<pallas_src>
import functools

import jax
import jax.numpy as jnp
from jax import lax
from jax.experimental import pallas as pl
from jax.experimental.pallas import tpu as pltpu


def _round_up(x, m):
    return ((x + m - 1) // m) * m


def _pick_block(dim, target):
    """Largest multiple-of-128 divisor of `dim` that is <= target, else dim."""
    if dim <= 128:
        return dim
    b = (min(target, dim) // 128) * 128
    while b >= 128:
        if dim % b == 0:
            return b
        b -= 128
    return dim


def _vmem_limit_bytes():
    """~75% of physical VMEM: ~96 MiB on v5e/v6e, ~48 MiB on v7x."""
    cap = 128 * 1024 * 1024
    try:
        cap = int(pltpu.get_tpu_info().vmem_capacity_bytes)
    except Exception:
        pass
    return (cap * 3) // 4


def _make_tile_metadata(expert_offsets, num_experts, n_pad, bm):
    """Static-shape tile schedule for rows sorted by expert.

    Returns per-tile int32 arrays, each of length num_m_blocks + num_experts - 1:
      group_ids[t]   : expert owning tile t (drives the weight index_map)
      m_block_ids[t] : row-block index tile t computes (drives x / out index_maps)
      row_start/end  : [start, end) global row range owned by (expert, block)
    Padding tiles beyond the true (data-dependent) tile count repeat the last
    real tile's block indices and carry an empty row range; the index_maps pin
    their K index as well, so padding tiles issue no DMAs, run no matmul, and
    store nothing.
    """
    num_m_blocks = n_pad // bm
    max_tiles = num_m_blocks + num_experts - 1

    ends = expert_offsets.astype(jnp.int32)
    starts = jnp.concatenate([jnp.zeros((1,), jnp.int32), ends[:-1]])
    nonempty = ends > starts
    first_blk = starts // bm
    tiles_per_group = jnp.where(nonempty, (ends - 1) // bm - first_blk + 1, 0)
    tile_end = jnp.cumsum(tiles_per_group)          # [E] cumulative tile counts
    tile_start = tile_end - tiles_per_group
    num_tiles = tile_end[-1]

    t_idx = jnp.arange(max_tiles, dtype=jnp.int32)
    gid = jnp.sum((t_idx[:, None] >= tile_end[None, :]).astype(jnp.int32),
                  axis=1)
    gid = jnp.clip(gid, 0, num_experts - 1).astype(jnp.int32)
    mblk = jnp.clip(first_blk[gid] + (t_idx - tile_start[gid]),
                    0, num_m_blocks - 1).astype(jnp.int32)
    row_start = jnp.maximum(starts[gid], mblk * bm)
    row_end = jnp.minimum(ends[gid], (mblk + 1) * bm)

    last = jnp.maximum(num_tiles - 1, 0)
    valid = t_idx < num_tiles
    gid = jnp.where(valid, gid, gid[last])
    mblk = jnp.where(valid, mblk, mblk[last])
    row_start = jnp.where(valid, row_start, 0)
    row_end = jnp.where(valid, row_end, 0)
    return (gid, mblk, row_start.astype(jnp.int32), row_end.astype(jnp.int32))


def _grouped_gemm_kernel(group_ids_ref, m_blk_ref, row_start_ref, row_end_ref,
                         x_ref, w_ref, *refs, apply_gate):
    """Grid = (o_blocks, tiles, k_blocks); K (reduction) is innermost.

    Each tile is an (expert, row-block) work unit from the prefetched schedule;
    the BlockSpec index_maps pick the owning expert's weight slab, so no dense
    sweep over experts happens.  Rows of a block not owned by the tile's expert
    (boundary straddle) are masked out at the store; straddling tiles hit the
    same output block on consecutive grid steps at fixed j, so it stays
    resident in VMEM between the partial writes.  NOTE: this residency relies
    on the current (j, t, k) grid order — do not reorder / parallelize t.
    """
    del group_ids_ref  # consumed by the weight index_map only
    if apply_gate:
        g_ref, o_ref, acc_ref = refs
    else:
        o_ref, acc_ref = refs
        g_ref = None

    t = pl.program_id(1)
    k = pl.program_id(2)
    nk = pl.num_programs(2)
    bm = x_ref.shape[0]

    r0 = row_start_ref[t]
    r1 = row_end_ref[t]
    is_real = r1 > r0           # padding tiles: empty row range -> do nothing

    @pl.when((k == 0) & is_real)
    def _():
        acc_ref[...] = jnp.zeros_like(acc_ref)

    @pl.when(is_real)
    def _():
        acc_ref[...] += jnp.dot(x_ref[...], w_ref[...],
                                preferred_element_type=jnp.float32)

    @pl.when((k == nk - 1) & is_real)
    def _():
        blk0 = m_blk_ref[t] * bm
        acc = acc_ref[...]
        if apply_gate:
            acc = acc * g_ref[...]          # (bm,1) f32 gate, fused epilogue
        full = (r0 == blk0) & (r1 == blk0 + bm)

        @pl.when(full)
        def _():                             # fast path: tile owns whole block
            o_ref[...] = acc.astype(o_ref.dtype)

        @pl.when(jnp.logical_not(full))
        def _():                             # straddle: masked blend
            rows = blk0 + lax.broadcasted_iota(jnp.int32, (bm, 1), 0)
            mask = (rows >= r0) & (rows < r1)
            o_ref[...] = jnp.where(mask, acc.astype(o_ref.dtype), o_ref[...])


def grouped_gemm(xs, weight, expert_offsets, *, gate_slot=None,
                 bm=256, bk=None, bn=None):
    """xs: [N_pad, K] rows sorted by expert (N_pad multiple of bm).
    weight: [E, K, O].  expert_offsets: [E] int32 cumulative end offsets.
    gate_slot: optional [N_pad, 1] f32 per-row scale fused into the epilogue.
    Returns [N_pad, O]."""
    n_pad, k_dim = xs.shape
    num_experts, k_w, o_dim = weight.shape
    assert k_w == k_dim and n_pad % bm == 0

    bk = _pick_block(k_dim, 512) if bk is None else bk
    if bn is None:
        bn = _pick_block(o_dim, 1024)
        # v7x has 2 TensorCores; only "parallel" axes are sharded across them,
        # so make sure the O axis has at least 2 blocks when possible.
        if o_dim // bn < 2 and bn % 256 == 0:
            bn //= 2
    assert k_dim % bk == 0 and o_dim % bn == 0

    num_m_blocks = n_pad // bm
    max_tiles = num_m_blocks + num_experts - 1
    nk = k_dim // bk

    gid, mblk, row_start, row_end = _make_tile_metadata(
        expert_offsets, num_experts, n_pad, bm)

    apply_gate = gate_slot is not None

    # Padding tiles (row_end <= row_start) pin the K index to the last real
    # tile's final K block, so their block indices never change and the
    # pipeline skips their DMAs entirely.
    def x_map(j, t, k, g, m, s, e):
        return (m[t], jnp.where(e[t] > s[t], k, nk - 1))

    def w_map(j, t, k, g, m, s, e):
        return (g[t], jnp.where(e[t] > s[t], k, nk - 1), j)

    def o_map(j, t, k, g, m, s, e):
        return (m[t], j)

    def g_map(j, t, k, g, m, s, e):
        return (m[t], 0)

    in_specs = [pl.BlockSpec((bm, bk), x_map),
                pl.BlockSpec((None, bk, bn), w_map)]
    inputs = [gid, mblk, row_start, row_end, xs, weight]
    if apply_gate:
        in_specs.append(pl.BlockSpec((bm, 1), g_map))
        inputs.append(gate_slot)

    item = xs.dtype.itemsize
    flops = 2 * n_pad * k_dim * o_dim
    bytes_accessed = (n_pad * k_dim * item * (o_dim // bn)        # x re-reads
                      + num_m_blocks * k_dim * o_dim * weight.dtype.itemsize
                      + n_pad * o_dim * item)                      # output

    kernel = functools.partial(_grouped_gemm_kernel, apply_gate=apply_gate)

    out = pl.pallas_call(
        kernel,
        out_shape=jax.ShapeDtypeStruct((n_pad, o_dim), xs.dtype),
        grid_spec=pltpu.PrefetchScalarGridSpec(
            num_scalar_prefetch=4,
            grid=(o_dim // bn, max_tiles, nk),
            in_specs=in_specs,
            out_specs=pl.BlockSpec((bm, bn), o_map),
            scratch_shapes=[pltpu.VMEM((bm, bn), jnp.float32)],
        ),
        compiler_params=pltpu.CompilerParams(
            dimension_semantics=("parallel", "arbitrary", "arbitrary"),
            vmem_limit_bytes=_vmem_limit_bytes(),
        ),
        cost_estimate=pl.CostEstimate(flops=flops, transcendentals=0,
                                      bytes_accessed=int(bytes_accessed)),
    )(*inputs)
    return out


def scattered_experts(x, weight, fan_out, bin_ids, indices, padded_block_idxs,
                      expert_offsets, gates=None, grouped_in=False,
                      grouped_out=False, *, bm=None, bk=None, bn=None):
    # padded_block_idxs is triton block-scheduling metadata; the TPU kernel
    # derives its own schedule from expert_offsets. bin_ids (sorted expert ids)
    # are fully encoded by expert_offsets.
    del padded_block_idxs, bin_ids
    out_features = weight.shape[-1]
    n = indices.shape[0]
    indices = indices.astype(jnp.int32)

    if bm is None:
        # Primary tuning knob: biggest row tile (<=512) that does not massively
        # over-pad small slot counts.
        bm = max(128, min(512, _round_up(n, 128)))
    n_pad = _round_up(n, bm)

    if grouped_in:
        xs = x
        if xs.shape[0] != n_pad:
            xs = jnp.pad(xs, ((0, n_pad - xs.shape[0]), (0, 0)))
    else:
        # Gather rows into expert-sorted order. Pad the (tiny) index vector so
        # the gather itself produces block-aligned rows — avoids a second HBM
        # pass that pads the [N, K] activation matrix.
        gather_idx = indices // fan_out
        if n_pad != n:
            gather_idx = jnp.concatenate(
                [gather_idx, jnp.zeros((n_pad - n,), gather_idx.dtype)])
        xs = jnp.take(x, gather_idx, axis=0)

    fuse_gate = (gates is not None) and (not grouped_out)
    gate_slot = None
    if fuse_gate:
        g = gates.reshape(-1)[indices].astype(jnp.float32)
        if n_pad != n:
            g = jnp.concatenate([g, jnp.zeros((n_pad - n,), jnp.float32)])
        gate_slot = g[:, None]

    ys = grouped_gemm(xs, weight, expert_offsets, gate_slot=gate_slot,
                      bm=bm, bk=bk, bn=bn)[:n]

    if fuse_gate:
        # Gate scale was applied inside the kernel epilogue; finish with a
        # vectorized scatter + reshape + fan_out reduction (no duplicate-index
        # scatter-add, no [N, O] f32 product tensor).
        t_tok, k_top = gates.shape
        y_slot = jnp.zeros((n, out_features), ys.dtype).at[indices].set(ys)
        out = y_slot.reshape(t_tok, k_top, out_features).astype(
            jnp.float32).sum(axis=1)
        return out.astype(ys.dtype)

    out = ys if grouped_out else (
        jnp.zeros((n, out_features), ys.dtype).at[indices].set(ys))
    if gates is not None:
        # grouped_out + gates: matches the reference wrapper, which reshapes
        # the scatter2scatter output as (T, k, O) and bmm's with gates.
        t_tok, k_top = gates.shape
        out = jnp.einsum(
            "tk,tko->to", gates.astype(jnp.float32),
            out.reshape(t_tok, k_top, out_features).astype(jnp.float32),
        ).astype(ys.dtype)
    return out


class ScatteredExpertsJAX:
    """JAX/Pallas equivalent of the PyTorch ScatteredExperts module."""

    def __init__(self, in_features, out_features, num_experts, fan_out,
                 grouped_in=False, grouped_out=False, dtype=jnp.bfloat16,
                 key=None, block_m=None, block_k=None, block_n=None):
        key = jax.random.PRNGKey(0) if key is None else key
        # Deterministic synthetic init (the reference module leaves the
        # parameters uninitialized).
        self.weight = (0.02 * jax.random.normal(
            key, (num_experts, in_features, out_features), jnp.float32)
        ).astype(dtype)
        self.fan_out = fan_out
        self.grouped_in = grouped_in
        self.grouped_out = grouped_out
        self.block_m, self.block_k, self.block_n = block_m, block_k, block_n
        # TODO(synk): LoRA path (lora_A/lora_B adapters) not implemented; this
        # corresponds to lora_config=None in the reference module.

    def __call__(self, x, bin_ids, indices, padded_block_idxs, expert_offsets,
                 gates=None):
        return scattered_experts(
            x, self.weight, self.fan_out, bin_ids, indices, padded_block_idxs,
            expert_offsets, gates=gates, grouped_in=self.grouped_in,
            grouped_out=self.grouped_out, bm=self.block_m, bk=self.block_k,
            bn=self.block_n)


if __name__ == "__main__":
    in_features, out_features = 512, 512
    num_experts, fan_out = 4, 2
    num_tokens = 128            # -> 256 sorted rows = one 256-row block

    key = jax.random.PRNGKey(0)
    k_w, k_x, k_r, k_g = jax.random.split(key, 4)

    module = ScatteredExpertsJAX(in_features, out_features, num_experts,
                                 fan_out, key=k_w)

    x = jax.random.normal(k_x, (num_tokens, in_features),
                          jnp.float32).astype(jnp.bfloat16)

    # Routing metadata (normally produced by the MoE router + sort).
    n_slots = num_tokens * fan_out
    expert_ids = jax.random.randint(
        k_r, (n_slots,), 0, num_experts).astype(jnp.int32)
    order = jnp.argsort(expert_ids).astype(jnp.int32)
    bin_ids = expert_ids[order]                      # sorted expert ids
    indices = order                                  # sorted_scattered_idxs
    counts = jnp.bincount(expert_ids, length=num_experts)
    expert_offsets = jnp.cumsum(counts).astype(jnp.int32)
    padded_block_idxs = jnp.zeros((1,), jnp.int32)   # triton-only, unused here
    gates = jax.nn.softmax(
        jax.random.normal(k_g, (num_tokens, fan_out), jnp.float32), axis=-1
    ).astype(jnp.bfloat16)

    out = module(x, bin_ids, indices, padded_block_idxs, expert_offsets,
                 gates=gates)
    out = jax.block_until_ready(out)

    # --- Pure-JAX reference ---------------------------------------------------
    xs_ref = x[indices // fan_out].astype(jnp.float32)
    ys_ref = jnp.zeros((n_slots, out_features), jnp.float32)
    for e in range(num_experts):
        contrib = xs_ref @ module.weight[e].astype(jnp.float32)
        ys_ref = jnp.where((bin_ids == e)[:, None], contrib, ys_ref)
    ys_ref = ys_ref.astype(jnp.bfloat16)

    # Check 1: grouped (pre-scatter) expert GEMM output.
    ys_kernel = scattered_experts(
        x, module.weight, fan_out, bin_ids, indices, padded_block_idxs,
        expert_offsets, gates=None, grouped_in=False, grouped_out=True)
    ys_kernel = jax.block_until_ready(ys_kernel)
    assert jnp.allclose(ys_kernel.astype(jnp.float32),
                        ys_ref.astype(jnp.float32), atol=5e-2, rtol=5e-2)

    # Check 2: gated, scattered per-token output.
    scat = jnp.zeros((n_slots, out_features),
                     jnp.bfloat16).at[indices].set(ys_ref)
    ref = jnp.einsum(
        "tk,tko->to", gates.astype(jnp.float32),
        scat.reshape(num_tokens, fan_out, out_features).astype(jnp.float32)
    ).astype(jnp.bfloat16)

    assert out.shape == (num_tokens, out_features)
    assert jnp.allclose(out.astype(jnp.float32), ref.astype(jnp.float32),
                        atol=5e-2, rtol=5e-2)
    print("KERNEL_OK")
</pallas_src>

<mosaic_0001>
module attributes {stable_mosaic.version = 11 : i64} {
  func.func @_grouped_gemm_kernel(%arg0: i32, %arg1: i32, %arg2: i32, %arg3: memref<4xi32, #tpu.memory_space<smem>>, %arg4: memref<4xi32, #tpu.memory_space<smem>>, %arg5: memref<4xi32, #tpu.memory_space<smem>>, %arg6: memref<4xi32, #tpu.memory_space<smem>>, %arg7: memref<256x512xbf16, #tpu.memory_space<vmem>>, %arg8: memref<1x512x256xbf16, #tpu.memory_space<vmem>>, %arg9: memref<256x1xf32, #tpu.memory_space<vmem>>, %arg10: memref<256x256xbf16, #tpu.memory_space<vmem>>, %arg11: memref<256x256xf32, #tpu.memory_space<vmem>>) attributes {dimension_semantics = [#tpu.dimension_semantics<parallel>, #tpu.dimension_semantics<arbitrary>, #tpu.dimension_semantics<arbitrary>], iteration_bounds = array<i64: 2, 4, 1>, scalar_prefetch = 4 : i64, scratch_operands = 1 : i64, tpu.core_type = #tpu.core_type<tc>, window_params = [{transform_indices = @transform_0, window_bounds = array<i64: 256, 512>}, {transform_indices = @transform_1, window_bounds = array<i64: 1, 512, 256>}, {transform_indices = @transform_2, window_bounds = array<i64: 256, 1>}, {transform_indices = @transform_3, window_bounds = array<i64: 256, 256>}]} {
    %0 = arith.index_cast %arg1 : i32 to index
    %1 = memref.load %arg5[%0] : memref<4xi32, #tpu.memory_space<smem>>
    %2 = arith.index_cast %arg1 : i32 to index
    %3 = memref.load %arg6[%2] : memref<4xi32, #tpu.memory_space<smem>>
    %4 = arith.cmpi sgt, %3, %1 : i32
    %c0_i32 = arith.constant 0 : i32
    %5 = arith.cmpi eq, %arg2, %c0_i32 : i32
    %6 = arith.andi %5, %4 : i1
    %7 = arith.extui %6 : i1 to i32
    %c0_i32_0 = arith.constant 0 : i32
    %8 = arith.cmpi ne, %7, %c0_i32_0 : i32
    scf.if %8 {
      %cst = arith.constant 0.000000e+00 : f32
      %15 = vector.broadcast %cst : f32 to vector<256x256xf32>
      %c0 = arith.constant 0 : index
      %c0_4 = arith.constant 0 : index
      %16 = vector.load %arg11[%c0, %c0_4] : memref<256x256xf32, #tpu.memory_space<vmem>>, vector<256x256xf32>
      tpu.vector_store %arg11[%c0, %c0_4], %15 {strides = array<i32>} : memref<256x256xf32, #tpu.memory_space<vmem>>, vector<256x256xf32>,
    } else {
    }
    %9 = arith.extui %4 : i1 to i32
    %c0_i32_1 = arith.constant 0 : i32
    %10 = arith.cmpi ne, %9, %c0_i32_1 : i32
    scf.if %10 {
      %c0 = arith.constant 0 : index
      %c0_4 = arith.constant 0 : index
      %15 = vector.load %arg11[%c0, %c0_4] : memref<256x256xf32, #tpu.memory_space<vmem>>, vector<256x256xf32>
      %c0_5 = arith.constant 0 : index
      %c0_6 = arith.constant 0 : index
      %16 = vector.load %arg7[%c0_5, %c0_6] : memref<256x512xbf16, #tpu.memory_space<vmem>>, vector<256x512xbf16>
      %c0_7 = arith.constant 0 : index
      %c0_8 = arith.constant 0 : index
      %c0_9 = arith.constant 0 : index
      %17 = vector.load %arg8[%c0_7, %c0_8, %c0_9] : memref<1x512x256xbf16, #tpu.memory_space<vmem>>, vector<1x512x256xbf16>
      %18 = vector.shape_cast %17 : vector<1x512x256xbf16> to vector<512x256xbf16>
      %cst = arith.constant dense<0.000000e+00> : vector<256x256xf32>
      %19 = tpu.matmul %16, %18, %cst {dimension_numbers = #tpu.dot_dimension_numbers<[1], [0], [0], [1], [0, 0, 1, 1], [], []>} : vector<256x512xbf16>, vector<512x256xbf16>, vector<256x256xf32> -> vector<256x256xf32>
      %20 = arith.addf %15, %19 : vector<256x256xf32>
      %c0_10 = arith.constant 0 : index
      %c0_11 = arith.constant 0 : index
      %21 = vector.load %arg11[%c0_10, %c0_11] : memref<256x256xf32, #tpu.memory_space<vmem>>, vector<256x256xf32>
      tpu.vector_store %arg11[%c0_10, %c0_11], %20 {strides = array<i32>} : memref<256x256xf32, #tpu.memory_space<vmem>>, vector<256x256xf32>,
    } else {
    }
    %c0_i32_2 = arith.constant 0 : i32
    %11 = arith.cmpi eq, %arg2, %c0_i32_2 : i32
    %12 = arith.andi %11, %4 : i1
    %13 = arith.extui %12 : i1 to i32
    %c0_i32_3 = arith.constant 0 : i32
    %14 = arith.cmpi ne, %13, %c0_i32_3 : i32
    scf.if %14 {
      %15 = arith.index_cast %arg1 : i32 to index
      %16 = memref.load %arg4[%15] : memref<4xi32, #tpu.memory_space<smem>>
      %c256_i32 = arith.constant 256 : i32
      %17 = arith.muli %16, %c256_i32 : i32
      %c0 = arith.constant 0 : index
      %c0_4 = arith.constant 0 : index
      %18 = vector.load %arg11[%c0, %c0_4] : memref<256x256xf32, #tpu.memory_space<vmem>>, vector<256x256xf32>
      %c0_5 = arith.constant 0 : index
      %c0_6 = arith.constant 0 : index
      %19 = vector.load %arg9[%c0_5, %c0_6] : memref<256x1xf32, #tpu.memory_space<vmem>>, vector<256x1xf32>
      %20 = vector.broadcast %19 : vector<256x1xf32> to vector<256x256xf32>
      %21 = arith.mulf %18, %20 : vector<256x256xf32>
      %22 = arith.cmpi eq, %1, %17 : i32
      %c256_i32_7 = arith.constant 256 : i32
      %23 = arith.addi %17, %c256_i32_7 : i32
      %24 = arith.cmpi eq, %3, %23 : i32
      %25 = arith.andi %22, %24 : i1
      %26 = arith.extui %25 : i1 to i32
      %c0_i32_8 = arith.constant 0 : i32
      %27 = arith.cmpi ne, %26, %c0_i32_8 : i32
      scf.if %27 {
        %31 = arith.truncf %21 : vector<256x256xf32> to vector<256x256xbf16>
        %c0_10 = arith.constant 0 : index
        %c0_11 = arith.constant 0 : index
        %32 = vector.load %arg10[%c0_10, %c0_11] : memref<256x256xbf16, #tpu.memory_space<vmem>>, vector<256x256xbf16>
        tpu.vector_store %arg10[%c0_10, %c0_11], %31 {strides = array<i32>} : memref<256x256xbf16, #tpu.memory_space<vmem>>, vector<256x256xbf16>,
      } else {
      }
      %true = arith.constant true
      %28 = arith.xori %25, %true : i1
      %29 = arith.extui %28 : i1 to i32
      %c0_i32_9 = arith.constant 0 : i32
      %30 = arith.cmpi ne, %29, %c0_i32_9 : i32
      scf.if %30 {
        %31 = tpu.iota {dimensions = array<i32: 0>} : vector<256x1xi32>
        %32 = vector.broadcast %17 : i32 to vector<256x1xi32>
        %33 = arith.addi %32, %31 : vector<256x1xi32>
        %34 = vector.broadcast %1 : i32 to vector<256x1xi32>
        %35 = arith.cmpi sge, %33, %34 : vector<256x1xi32>
        %36 = vector.broadcast %3 : i32 to vector<256x1xi32>
        %37 = arith.cmpi slt, %33, %36 : vector<256x1xi32>
        %38 = arith.andi %35, %37 : vector<256x1xi1>
        %39 = arith.truncf %21 : vector<256x256xf32> to vector<256x256xbf16>
        %c0_10 = arith.constant 0 : index
        %c0_11 = arith.constant 0 : index
        %40 = vector.load %arg10[%c0_10, %c0_11] : memref<256x256xbf16, #tpu.memory_space<vmem>>, vector<256x256xbf16>
        %41 = vector.shape_cast %38 : vector<256x1xi1> to vector<256x1xi1>
        %42 = vector.broadcast %41 : vector<256x1xi1> to vector<256x256xi1>
        %43 = arith.select %42, %39, %40 : vector<256x256xi1>, vector<256x256xbf16>
        %c0_12 = arith.constant 0 : index
        %c0_13 = arith.constant 0 : index
        %44 = vector.load %arg10[%c0_12, %c0_13] : memref<256x256xbf16, #tpu.memory_space<vmem>>, vector<256x256xbf16>
        tpu.vector_store %arg10[%c0_12, %c0_13], %43 {strides = array<i32>} : memref<256x256xbf16, #tpu.memory_space<vmem>>, vector<256x256xbf16>,
      } else {
      }
    } else {
    }
    return
  }
  func.func @transform_0(%arg0: i32, %arg1: i32, %arg2: i32, %arg3: memref<4xi32, #tpu.memory_space<smem>>, %arg4: memref<4xi32, #tpu.memory_space<smem>>, %arg5: memref<4xi32, #tpu.memory_space<smem>>, %arg6: memref<4xi32, #tpu.memory_space<smem>>) -> (i32, i32) {
    %0 = arith.index_cast %arg1 : i32 to index
    %1 = memref.load %arg4[%0] : memref<4xi32, #tpu.memory_space<smem>>
    %2 = arith.index_cast %arg1 : i32 to index
    %3 = memref.load %arg6[%2] : memref<4xi32, #tpu.memory_space<smem>>
    %4 = arith.index_cast %arg1 : i32 to index
    %5 = memref.load %arg5[%4] : memref<4xi32, #tpu.memory_space<smem>>
    %6 = arith.cmpi sgt, %3, %5 : i32
    %c0_i32 = arith.constant 0 : i32
    %7 = arith.select %6, %arg2, %c0_i32 : i32
    %c0_i32_0 = arith.constant 0 : i32
    return %1, %7 : i32, i32
  }
  func.func @transform_1(%arg0: i32, %arg1: i32, %arg2: i32, %arg3: memref<4xi32, #tpu.memory_space<smem>>, %arg4: memref<4xi32, #tpu.memory_space<smem>>, %arg5: memref<4xi32, #tpu.memory_space<smem>>, %arg6: memref<4xi32, #tpu.memory_space<smem>>) -> (i32, i32, i32) {
    %0 = arith.index_cast %arg1 : i32 to index
    %1 = memref.load %arg3[%0] : memref<4xi32, #tpu.memory_space<smem>>
    %2 = arith.index_cast %arg1 : i32 to index
    %3 = memref.load %arg6[%2] : memref<4xi32, #tpu.memory_space<smem>>
    %4 = arith.index_cast %arg1 : i32 to index
    %5 = memref.load %arg5[%4] : memref<4xi32, #tpu.memory_space<smem>>
    %6 = arith.cmpi sgt, %3, %5 : i32
    %c0_i32 = arith.constant 0 : i32
    %7 = arith.select %6, %arg2, %c0_i32 : i32
    %c0_i32_0 = arith.constant 0 : i32
    return %1, %7, %arg0 : i32, i32, i32
  }
  func.func @transform_2(%arg0: i32, %arg1: i32, %arg2: i32, %arg3: memref<4xi32, #tpu.memory_space<smem>>, %arg4: memref<4xi32, #tpu.memory_space<smem>>, %arg5: memref<4xi32, #tpu.memory_space<smem>>, %arg6: memref<4xi32, #tpu.memory_space<smem>>) -> (i32, i32) {
    %0 = arith.index_cast %arg1 : i32 to index
    %1 = memref.load %arg4[%0] : memref<4xi32, #tpu.memory_space<smem>>
    %c0_i32 = arith.constant 0 : i32
    %c0_i32_0 = arith.constant 0 : i32
    return %1, %c0_i32 : i32, i32
  }
  func.func @transform_3(%arg0: i32, %arg1: i32, %arg2: i32, %arg3: memref<4xi32, #tpu.memory_space<smem>>, %arg4: memref<4xi32, #tpu.memory_space<smem>>, %arg5: memref<4xi32, #tpu.memory_space<smem>>, %arg6: memref<4xi32, #tpu.memory_space<smem>>) -> (i32, i32) {
    %0 = arith.index_cast %arg1 : i32 to index
    %1 = memref.load %arg4[%0] : memref<4xi32, #tpu.memory_space<smem>>
    %c0_i32 = arith.constant 0 : i32
    return %1, %arg0 : i32, i32
  }
}

</mosaic_0001>

<bundles_post_ra>
// kernel: tpu_custom_call.1
= control target key start
LH: loop header
LB: loop body
LE: loop exit
PB: predicated region body
PF: predicated region fallthrough
CT: control target
= control target key end

     0   :  { %s6134_s0 = inlined_call_operand.hbm [shape: s32[4], index: 0, kind: input, shape index: {}]   ;;  %s6135_s4 = inlined_call_operand.hbm [shape: bf16[256,512], index: 4, kind: input, shape index: {}]   ;;  %s6136_s5 = inlined_call_operand.hbm [shape: bf16[4,512,512], index: 5, kind: input, shape index: {}]   ;;  %s6137_s6 = inlined_call_operand.hbm [shape: f32[256,1], index: 6, kind: input, shape index: {}]   ;;  %s6138_s7 = inlined_call_operand.hbm [shape: bf16[256,512], index: 7, kind: output, shape index: {}]   ;;  %s6139_s1 = inlined_call_operand.hbm [shape: s32[4], index: 1, kind: input, shape index: {}]   ;;  %s6140_s2 = inlined_call_operand.hbm [shape: s32[4], index: 2, kind: input, shape index: {}]   ;;  %s6141_s3 = inlined_call_operand.hbm [shape: s32[4], index: 3, kind: input, shape index: {}]  }
   0x1   :  { %6178 = sst [smem:[#allocation66_spill]] %s6135_s4  ;;  %s4114_s26 = scalar_lea.hbm %s6134_s0, 16 }
   0x2   :  { %6179 = sst [smem:[#allocation67_spill]] %s6136_s5  ;;  %p4115_p0 = scmp.ne.s32.totalorder %s6134_s0, %s4114_s26 }
   0x3   :  { %6180 = sst [smem:[#allocation68_spill]] %s6138_s7  ;;  %p4118_p1 = scmp.lt.u32.totalorder %s4114_s26, %s6134_s0 }
   0x5   :  { %p4120_p2 = pnand %p4118_p1, %p4115_p0 }
   0x7   :  { %4123 = shalt.err (!%p4120_p2)  }
   0x8   :  { %s4426_s8 = smov [#allocation4]   ;;  %s4124_s13 = scalar_lea.hbm %s6139_s1, 16 }
   0x9   :  { %13 = dma.hbm_to_smem %s6134_s0, 16, %s4426_s8, [#allocation3] }
   0xa   :  { %p4125_p3 = scmp.ne.s32.totalorder %s6139_s1, %s4124_s13  ;;  %p4128_p4 = scmp.lt.u32.totalorder %s4124_s13, %s6139_s1 }
   0xc   :  { %p4130_p5 = pnand %p4128_p4, %p4125_p3 }
   0xe   :  { %4133 = shalt.err (!%p4130_p5)  }
   0xf   :  { %s4427_s18 = smov [#allocation5]   ;;  %s4134_s22 = scalar_lea.hbm %s6140_s2, 16 }
  0x10   :  { %15 = dma.hbm_to_smem %s6139_s1, 16, %s4427_s18, [#allocation3] }
  0x11   :  { %p4135_p6 = scmp.ne.s32.totalorder %s6140_s2, %s4134_s22  ;;  %p4138_p7 = scmp.lt.u32.totalorder %s4134_s22, %s6140_s2 }
  0x13   :  { %p4140_p8 = pnand %p4138_p7, %p4135_p6 }
  0x15   :  { %4143 = shalt.err (!%p4140_p8)  }
  0x16   :  { %s4428_s27 = smov [#allocation6]   ;;  %s4144_s8 = scalar_lea.hbm %s6141_s3, 16 }
  0x17   :  { %17 = dma.hbm_to_smem %s6140_s2, 16, %s4428_s27, [#allocation3] }
  0x18   :  { %p4145_p9 = scmp.ne.s32.totalorder %s6141_s3, %s4144_s8  ;;  %p4148_p10 = scmp.lt.u32.totalorder %s4144_s8, %s6141_s3 }
  0x1a   :  { %p4150_p11 = pnand %p4148_p10, %p4145_p9 }
  0x1c   :  { %4153 = shalt.err (!%p4150_p11)  }
  0x1d   :  { %s4429_s13 = smov [#allocation7]  }
  0x1e   :  { %19 = dma.hbm_to_smem %s6141_s3, 16, %s4429_s13, [#allocation3] }
  0x1f   :  { %4340 = dma.done.wait [#allocation3], 64 }
  0x20   :  { %4341 = vsyncadd [#allocation3], 4294967232 }
  0x21   :  { %21 = sfence }
  0x22   :  { %22 = vsyncpa [#allocation9], 0 }
  0x23   :  { %24 = vsyncpa [#allocation9 + $0x1], 0 }
  0x24   :  { %25 = vsyncpa [#allocation12], 0 }
  0x25   :  { %27 = vsyncpa [#allocation12 + $0x1], 0 }
  0x26   :  { %28 = vsyncpa [#allocation10], 0 }
  0x27   :  { %30 = vsyncpa [#allocation10 + $0x1], 0  ;;  %s4532_s2 = smov 0   ;;  %s4534_s16 = smov 0  }
  0x28   :  { %s4536_s17 = smov 0   ;;  %s4538_s18 = smov 0  }
  0x29   :  { %s4540_s19 = smov 0   ;;  %s4542_s3 = smov 0  }
  0x2a   :  { %s4544_s20 = smov 0   ;;  %s4546_s0 = smov 0  }
  0x2b   :  { %s4548_s21 = smov 0   ;;  %s4550_s22 = smov 0  }
  0x2c   :  { %s4552_s23 = smov 0   ;;  %s4554_s24 = smov 0  }
  0x2d   :  { %s4556_s25 = smov 0   ;;  %s4558_s26 = smov 0  }
  0x2e   :  { %s4560_s27 = smov 0   ;;  %s4562_s28 = smov 0  }
  0x2f   :  { %s4564_s29 = smov 0  }
  0x30 LB: > { %6181 = sst [smem:[#allocation27_spill]] %s4360_s2  ;;  %s4616_s1 = sadd.s32 4294967295, %s4424_s29   ;;  %s4424_s29 = sphi %s4564_s29, %s36_s29   ;;  %s4420_s28 = sphi %s4562_s28, %s6368_s28   ;;  %s4416_s27 = sphi %s4560_s27, %s6380_s27   ;;  %s4412_s26 = sphi %s4558_s26, %s6366_s26   ;;  %s4408_s25 = sphi %s4556_s25, %s6379_s25   ;;  %s4404_s24 = sphi %s4554_s24, %s6378_s24   ;;  %s4400_s23 = sphi %s4552_s23, %s6377_s23   ;;  %s4396_s22 = sphi %s4550_s22, %s6376_s22   ;;  %s4392_s21 = sphi %s4548_s21, %s6363_s21   ;;  %s4388_s0 = sphi %s4546_s0, %s6362_s0   ;;  %s4384_s20 = sphi %s4544_s20, %s6361_s20   ;;  %s4380_s3 = sphi %s4542_s3, %s6375_s3   ;;  %s4376_s19 = sphi %s4540_s19, %s6374_s19   ;;  %s4372_s18 = sphi %s4538_s18, %s6373_s18   ;;  %s4368_s17 = sphi %s4536_s17, %s6372_s17   ;;  %s4364_s16 = sphi %s4534_s16, %s6370_s16   ;;  %s4360_s2 = sphi %s4532_s2, %s6369_s2  }
  0x31   : > { %6182 = sst [smem:[#allocation28_spill]] %s4388_s0  ;;  %s3314_s30 = sadd.s32 4294967294, %s4424_s29  }
  0x32   : > { %6183 = sst [smem:[#allocation29_spill]] %s4392_s21  ;;  %s51_s8 = sadd.s32 1, %s4416_s27 }
  0x33   : > { %6184 = sst [smem:[#allocation30_spill]] %s4404_s24  ;;  %s55_s9 = sadd.s32 1, %s4420_s28 }
  0x34   : > { %6185 = sst [smem:[#allocation31_spill]] %s4408_s25  ;;  %p53_p12 = scmp.ge.s32.totalorder %s51_s8, 4 }
  0x35   : > { %6186 = sst [smem:[#allocation32_spill]] %s4412_s26  ;;  %p6153_p13 = scmp.eq.s32.totalorder %s4424_s29, 0 }
  0x36   : > { %6187 = sst [smem:[#allocation33_spill]] %s4420_s28  ;;  %p6152_p0 = scmp.eq.s32.totalorder %s4616_s1, 0 }
  0x37   : > { %s97_s10 = sld [smem:[#allocation4 + %s4416_s27]]  ;;  %s6382_s8 = smov (%p53_p12, %s51_s8), 0 }
  0x38   : > { %6188 = sst [smem:[#allocation34_spill]] %s6382_s8  ;;  %s6384_s9 = smov (!%p53_p12, %s55_s9), %s4420_s28 }
  0x39   : > { %s102_s11 = sld [smem:[#allocation4 + %s6382_s8]]  ;;  %s114_s12 = sadd.s32 1, %s4392_s21 }
  0x3a   : > { %p57_p1 = scmp.ge.s32.totalorder %s6384_s9, 2  ;;  %p121_p2 = scmp.ne.s32.totalorder %s4392_s21, %s4388_s0 }
  0x3b   : > { %p127_p3 = scmp.ne.s32.totalorder %s4388_s0, %s4384_s20  ;;  %s165_s13 = sld [smem:[#allocation5 + %s4416_s27]] }
  0x3c   : > { %s6386_s9 = smov (%p57_p1, %s6384_s9), 0  ;;  %p4637_p4 = por %p121_p2, %p6153_p13 }
  0x3d   : > { %6189 = sst [smem:[#allocation35_spill]] %s6386_s9  ;;  %p4643_p5 = por %p127_p3, %p6152_p0 }
  0x3e   : > { %s110_s7 = ssub.s32 %s4420_s28, %s6386_s9  ;;  %s166_s26 = sld [smem:[#allocation5 + %s6382_s8]] }
  0x3f   : > { %s6191_s15 = scalar_select %p4643_p5, 1, 0 }
  0x40   : > { %s107_s25 = ssub.s32 %s97_s10, %s102_s11  ;;  %s172_s20 = sadd.s32 1, %s4368_s17 }
  0x41   : > { %6192 = sst [smem:[#allocation36_spill]] %s6191_s15  ;;  %s111_s0 = sor.u32 %s110_s7, %s107_s25 }
  0x42   : > { %p182_p6 = scmp.ne.s32.totalorder %s4368_s17, %s4364_s16  ;;  %p112_p7 = scmp.eq.s32.totalorder %s111_s0, 0 }
  0x43   : > { %p183_p8 = scmp.eq.s32.totalorder %s4616_s1, 7  ;;  %p188_p9 = scmp.ne.s32.totalorder %s4364_s16, %s4360_s2 }
  0x44   : > { %p189_p10 = scmp.eq.s32.totalorder %s3314_s30, 7  ;;  %s167_s15 = ssub.s32 %s165_s13, %s166_s26 }
  0x45   : > { %s4657_s9 = scalar_select %p112_p7, %s4392_s21, %s114_s12  }
  0x46   : > { %p4659_p11 = por %p183_p8, %p182_p6  ;;  %s169_s25 = sor.u32 %s167_s15, %s110_s7 }
  0x47   : > { %6193 = sst [smem:[#allocation37_spill]] %s4657_s9  ;;  %p4663_p12 = por %p189_p10, %p188_p9 }
  0x48   : > { %s6194_s10 = scalar_select %p4659_p11, 1, 0 }
  0x49   : > { %s6195_s0 = scalar_select %p4663_p12, 1, 0 }
  0x4a   : > { %p170_p1 = scmp.eq.s32.totalorder %s169_s25, 0  ;;  %p6151_p2 = scmp.lt.s32.totalorder %s4424_s29, 8 }
  0x4b   : > { %s238_s11 = sand.u32 1, %s4424_s29   ;;  %s240_s12 = sand.u32 1, %s4392_s21  }
  0x4c   : > { %s4669_s30 = scalar_select %p170_p1, %s4368_s17, %s172_s20  }
  0x4d   : > { %s3321_s26 = sshll.u32 %s240_s12, 9  ;;  %s3322_s13 = sshll.u32 %s4420_s28, 1 }
  0x4e   : > { %6196 = sst [smem:[#allocation38_spill]] %s4669_s30  ;;  %s242_s7 = scalar_lea.vmem [#allocation11], %s3321_s26 }
  0x4f   : > { %s3687_s9 = scalar_select %p4637_p4, [#allocation4], [#allocation16] }
  0x50   : > { %s3688_s2 = scalar_select %p4637_p4, %s4416_s27, 0 }
  0x51   : > { %s6388_s9 = smov (!%p6151_p2, %s3687_s9), [#allocation20]  ;;  %s259_s15 = sshll.u32 %s242_s7, 4  ;;  %s4691_s15 = int_to_ptr.vmem [resolvable:$true] %s259_s15 }
  0x52   : > { %s6390_s2 = smov (!%p6151_p2, %s3688_s2), 0  ;;  %p4687_p3 = pnand %p6151_p2, %p4637_p4 }
  0x53   : > { %s243_s20 = sld [smem:[%s6388_s9 + %s6390_s2]]  ;;  %p3328_p6 = scmp.ge.s32.totalorder %s4424_s29, 1 }
  0x54   : > { %p289_p7 = scmp.lt.s32.totalorder %s4424_s29, 9  ;;  %s6199_s5 = sld [smem:[#allocation67_spill]] }
  0x55   : > { %s4704_s2 = scalar_lea.sflag [#allocation12], %s238_s11  ;;  %p4156_p9 = pneg %p4687_p3 }
  0x56   : > { %p4695_p8 = pnand %p3328_p6, %p289_p7 }
  0x58   : > { %s6198_s12 = scalar_select %p4695_p8, 1, 0 }
  0x59   : > { %s3323_s28 = sshll.u32 %s243_s20, 8 }
  0x5a   : > { %s256_s26 = sadd.s32 %s3323_s28, %s3322_s13  ;;  %s4159_s21 = scalar_lea.hbm %s6199_s5, 65536 }
  0x5b   : > { %s3324_s7 = sshll.u32 %s256_s26, 6 }
  0x5c   : > { %s4702_s30 = scalar_lea.hbm %s6199_s5, %s3324_s7 }
  0x5d   : > { %s4154_s9 = scalar_lea.hbm %s4702_s30, 8192  ;;  %p4160_p6 = scmp.lt.u32.totalorder %s4702_s30, %s6199_s5 }
  0x5e   : > { %p4155_p4 = scmp.ne.s32.totalorder %s4702_s30, %s4154_s9  ;;  %p4161_p7 = scmp.lt.u32.totalorder %s4159_s21, %s4154_s9 }
  0x5f   : > { %p4163_p0 = scmp.lt.u32.totalorder %s4154_s9, %s4702_s30 }
  0x60   : > { %p4157_p10 = pnand %p4156_p9, %p4155_p4  ;;  %p4162_p2 = por %p4161_p7, %p4160_p6 }
  0x62   : > { %p4158_p1 = pneg %p4157_p10  ;;  %p4164_p13 = por %p4163_p0, %p4162_p2 }
  0x64   : > { %p4165_p12 = pnand %p4164_p13, %p4158_p1 }
  0x66   : > { %4168 = shalt.err (!%p4165_p12)
}
  0x67   : > { %s4169_s11 = scalar_lea.vmem %s4691_s15, 8192  ;;  %s4430_s7 = smov [#allocation11]  }
  0x68   : > { %p4170_p4 = scmp.ne.s32.totalorder %s4691_s15, %s4169_s11  ;;  %s4174_s14 = sshll.u32 %s4430_s7, 4  ;;  %s4175_s14 = int_to_ptr.vmem [resolvable:$false] %s4174_s14 }
  0x69   : > { %s4176_s28 = scalar_lea.vmem %s4175_s14, 16384  ;;  %p4177_p5 = scmp.lt.s32.totalorder %s4691_s15, %s4175_s14 }
  0x6a   : > { %p4172_p10 = pnand %p4170_p4, %p4156_p9  ;;  %p4178_p6 = scmp.lt.s32.totalorder %s4176_s28, %s4169_s11 }
  0x6c   : > { %p4173_p11 = pneg %p4172_p10  ;;  %p4179_p7 = por %p4178_p6, %p4177_p5 }
  0x6e   : > { %p4180_p0 = pnand %p4179_p7, %p4173_p11 }
  0x70   : > { %4183 = shalt.err (!%p4180_p0)
}
  0x71   : > { %s6158_s9 = smov 256   ;;  %s6156_s13 = smov 128  }
  0x72   : > { %s6157_s21 = smov 8   ;;  %s59_s20 = sld [smem:[#allocation5 + %s4416_s27]] }
  0x73   : > { %3710 = dma.hbm_to_vmem [thread:$0]  (!%p4687_p3), %s4702_s30, 8192, %s4691_s15, %s4704_s2, %s6158_s9, %s6156_s13, %s6157_s21  }
  0x74   : > { %s64_s26 = sld [smem:[#allocation5 + %s6382_s8]]  ;;  %p81_p13 = scmp.ne.s32.totalorder %s4404_s24, %s4400_s23 }
  0x75   : > { %p87_p5 = scmp.ne.s32.totalorder %s4400_s23, %s4396_s22  ;;  %s209_s11 = sand.u32 1, %s4404_s24  }
  0x76   : > { %s74_s7 = sadd.s32 1, %s4404_s24  ;;  %p6200_p11 = scmp.eq.s32.totalorder %s4424_s29, 0 }
  0x77   : > { %p6201_p2 = scmp.eq.s32.totalorder %s4616_s1, 0  ;;  %s3317_s30 = sshll.u32 %s209_s11, 9 }
  0x78   : > { %p83_p12 = por %p6200_p11, %p81_p13  ;;  %p6203_p3 = scmp.lt.s32.totalorder %s4424_s29, 8 }
  0x79   : > { %p4747_p9 = por %p6201_p2, %p87_p5  ;;  %s213_s14 = scalar_lea.vmem [#allocation8], %s3317_s30 }
  0x7a   : > { %s69_s15 = ssub.s32 %s59_s20, %s64_s26  ;;  %p4753_p1 = pnand %p6203_p3, %p83_p12 }
  0x7b   : > { %s6202_s25 = scalar_select %p4747_p9, 1, 0 }
  0x7c   : > { %p72_p4 = scmp.eq.s32.totalorder %s69_s15, 0  ;;  %s228_s28 = sshll.u32 %s213_s14, 4  ;;  %s4765_s28 = int_to_ptr.vmem [resolvable:$true] %s228_s28 }
  0x7d   : > { %s3684_s13 = scalar_select %p83_p12, [#allocation5], [#allocation15] }
  0x7e   : > { %s4758_s21 = scalar_select %p72_p4, %s4404_s24, %s74_s7  }
  0x7f   : > { %s3685_s9 = scalar_select %p83_p12, %s4416_s27, 0 }
  0x80   : > { %6205 = sst [smem:[#allocation39_spill]] %s4758_s21  ;;  %p6206_p10 = pmov %p6203_p3 }
  0x81   : > { %p6207_p6 = pmov %p6203_p3  ;;  %s4768_s26 = sld [smem:[#allocation5 + %s4416_s27]] }
  0x82   : > { %s6392_s13 = smov (!%p6206_p10, %s3684_s13), [#allocation19]  ;;  %s4771_s5 = sld [smem:[#allocation5 + %s6382_s8]] }
  0x83   : > { %s6394_s9 = smov (!%p6207_p6, %s3685_s9), 0  ;;  %p149_p7 = scmp.ne.s32.totalorder %s4380_s3, %s4376_s19 }
  0x84   : > { %s214_s20 = sld [smem:[%s6392_s13 + %s6394_s9]]  ;;  %p6209_p13 = pmov %p6200_p11 }
  0x85   : > { %s6208_s4 = sld [smem:[#allocation66_spill]]  ;;  %s4789_s13 = scalar_lea.sflag [#allocation9], %s209_s11 }
  0x86   : > { %p4785_p5 = por %p149_p7, %p6209_p13  ;;  %p4186_p12 = pneg %p4753_p1 }
  0x8a   : > { %s3584_s30 = sshll.u32 %s214_s20, 13 }
  0x8b   : > { %s4781_s21 = scalar_lea.hbm %s6208_s4, %s3584_s30  ;;  %s4189_s7 = scalar_lea.hbm %s6208_s4, 8192 }
  0x8c   : > { %s4184_s8 = scalar_lea.hbm %s4781_s21, 8192  ;;  %p4190_p4 = scmp.lt.u32.totalorder %s4781_s21, %s6208_s4 }
  0x8d   : > { %p4185_p11 = scmp.ne.s32.totalorder %s4781_s21, %s4184_s8  ;;  %p4191_p10 = scmp.lt.u32.totalorder %s4189_s7, %s4184_s8 }
  0x8e   : > { %p4193_p7 = scmp.lt.u32.totalorder %s4184_s8, %s4781_s21 }
  0x8f   : > { %p4187_p2 = pnand %p4186_p12, %p4185_p11  ;;  %p4192_p6 = por %p4191_p10, %p4190_p4 }
  0x91   : > { %p4188_p3 = pneg %p4187_p2  ;;  %p4194_p13 = por %p4193_p7, %p4192_p6 }
  0x93   : > { %p4195_p0 = pnand %p4194_p13, %p4188_p3 }
  0x95   : > { %4198 = shalt.err (!%p4195_p0)
}
  0x96   : > { %s4199_s11 = scalar_lea.vmem %s4765_s28, 8192  ;;  %s4434_s20 = smov [#allocation8]  }
  0x97   : > { %p4200_p11 = scmp.ne.s32.totalorder %s4765_s28, %s4199_s11  ;;  %s4204_s30 = sshll.u32 %s4434_s20, 4  ;;  %s4205_s30 = int_to_ptr.vmem [resolvable:$false] %s4204_s30 }
  0x98   : > { %s4206_s15 = scalar_lea.vmem %s4205_s30, 16384  ;;  %p4207_p8 = scmp.lt.s32.totalorder %s4765_s28, %s4205_s30 }
  0x99   : > { %p4202_p2 = pnand %p4200_p11, %p4186_p12  ;;  %p4208_p4 = scmp.lt.s32.totalorder %s4206_s15, %s4199_s11 }
  0x9b   : > { %p4203_p9 = pneg %p4202_p2  ;;  %p4209_p10 = por %p4208_p4, %p4207_p8 }
  0x9d   : > { %p4210_p6 = pnand %p4209_p10, %p4203_p9 }
  0x9f   : > { %4213 = shalt.err (!%p4210_p6)
}
  0xa0   : > { %s4435_s8 = smov 16   ;;  %s6211_s7 = smov 256  }
  0xa1   : > { %3705 = dma.hbm_to_vmem [thread:$0]  (!%p4753_p1), %s4781_s21, 8192, %s4765_s28, %s4789_s13, %s6211_s7, %s6211_s7, %s4435_s8  }
  0xa2   : > { %p6212_p8 = scmp.eq.s32.totalorder %s4616_s1, 0  ;;  %p6213_p9 = scmp.ne.s32.totalorder %s4376_s19, %s4372_s18 }
  0xa3   : > { %s139_s14 = ssub.s32 %s4768_s26, %s4771_s5  ;;  %s142_s11 = sadd.s32 1, %s4380_s3 }
  0xa4   : > { %p4824_p0 = por %p6213_p9, %p6212_p8  ;;  %p140_p12 = scmp.eq.s32.totalorder %s139_s14, 0 }
  0xa5   : > { %s6215_s20 = sand.u32 1, %s4380_s3   ;;  %p6216_p3 = scmp.lt.s32.totalorder %s4424_s29, 8 }
  0xa6   : > { %s3325_s30 = sshll.u32 %s6215_s20, 8 }
  0xa7   : > { %s3690_s15 = scalar_select %p4785_p5, [#allocation5], [#allocation17] }
  0xa8   : > { %s4836_s4 = scalar_select %p140_p12, %s4380_s3, %s142_s11  }
  0xa9   : > { %s3691_s24 = scalar_select %p4785_p5, %s4416_s27, 0 }
  0xaa   : > { %s6396_s15 = smov (!%p6216_p3, %s3690_s15), [#allocation21]  ;;  %p6217_p1 = pmov %p6216_p3 }
  0xab   : > { %s273_s21 = scalar_lea.vmem [#allocation13], %s3325_s30  ;;  %s4219_s11 = scalar_lea.hbm %s6137_s6, 4096 }
  0xac   : > { %s6398_s24 = smov (!%p6217_p1, %s3691_s24), 0  ;;  %p6218_p7 = pmov %p6217_p1 }
  0xad   : > { %s274_s5 = sld [smem:[%s6396_s15 + %s6398_s24]]  ;;  %s281_s28 = sshll.u32 %s273_s21, 4  ;;  %s4853_s28 = int_to_ptr.vmem [resolvable:$true] %s281_s28 }
  0xae   : > { %p4849_p13 = pnand %p6218_p7, %p4785_p5 }
  0xb0   : > { %p4216_p11 = pneg %p4849_p13 }
  0xb3   : > { %s3585_s26 = sshll.u32 %s274_s5, 12 }
  0xb4   : > { %s4858_s7 = scalar_lea.hbm %s6137_s6, %s3585_s26 }
  0xb5   : > { %s4214_s9 = scalar_lea.hbm %s4858_s7, 4096  ;;  %p4220_p10 = scmp.lt.u32.totalorder %s4858_s7, %s6137_s6 }
  0xb6   : > { %p4215_p5 = scmp.ne.s32.totalorder %s4858_s7, %s4214_s9  ;;  %p4221_p6 = scmp.lt.u32.totalorder %s4219_s11, %s4214_s9 }
  0xb7   : > { %p4223_p9 = scmp.lt.u32.totalorder %s4214_s9, %s4858_s7 }
  0xb8   : > { %p4217_p2 = pnand %p4216_p11, %p4215_p5  ;;  %p4222_p8 = por %p4221_p6, %p4220_p10 }
  0xba   : > { %p4218_p4 = pneg %p4217_p2  ;;  %p4224_p12 = por %p4223_p9, %p4222_p8 }
  0xbc   : > { %p4225_p3 = pnand %p4224_p12, %p4218_p4 }
  0xbe   : > { %4228 = shalt.err (!%p4225_p3)
}
  0xbf   : > { %s4229_s15 = scalar_lea.vmem %s4853_s28, 4096  ;;  %s4436_s5 = smov [#allocation13]  }
  0xc0   : > { %p4230_p1 = scmp.ne.s32.totalorder %s4853_s28, %s4229_s15  ;;  %s4234_s21 = sshll.u32 %s4436_s5, 4  ;;  %s4235_s21 = int_to_ptr.vmem [resolvable:$false] %s4234_s21 }
  0xc1   : > { %s4236_s26 = scalar_lea.vmem %s4235_s21, 8192  ;;  %p4237_p2 = scmp.lt.s32.totalorder %s4853_s28, %s4235_s21 }
  0xc2   : > { %p4232_p7 = pnand %p4230_p1, %p4216_p11  ;;  %p4238_p10 = scmp.lt.s32.totalorder %s4236_s26, %s4229_s15 }
  0xc4   : > { %p4233_p5 = pneg %p4232_p7  ;;  %p4239_p6 = por %p4238_p10, %p4237_p2 }
  0xc6   : > { %p4240_p8 = pnand %p4239_p6, %p4233_p5 }
  0xc8   : > { %4243 = shalt.err (!%p4240_p8)
}
  0xc9   : > { %s6220_s13 = smov 8   ;;  %s6221_s8 = smov 128  }
  0xca   : > { %3715 = dma.hbm_to_vmem [thread:$0]  (!%p4849_p13), %s4858_s7, 4096, %s4853_s28, %s4704_s2, %s6221_s8, %s6221_s8, %s6220_s13  }
  0xcb   : > { %p6222_p11 = scmp.ne.s32.totalorder %s6198_s12, 0 }
  0xcc   : > { %s295_s9 = sand.u32 (!%p6222_p11), 1, %s4400_s23   ;;  %p6223_p4 = scmp.ne.s32.totalorder (!%p6222_p11), %s6202_s25, 0 }
  0xcd   : > { %293 = sbr.rel (%p6222_p11) target bundleno = 1017 (0x3f9), region = 32  ;;  %s3329_s24 = sshll.u32 (!%p6222_p11), %s295_s9, 9 }
  0xce   : > { %s296_s14 = scalar_lea.sflag (!%p6222_p11), [#allocation9], %s295_s9  ;;  %s4892_s11 = scalar_lea.vmem (!%p6222_p11), [#allocation8], %s3329_s24 }
  0xd4   : > { %4343 = dma.done.wait (%p6223_p4), %s296_s14, 8192  }
  0xd5   : > { %4345 = vsyncadd (%p6223_p4), %s296_s14, 4294959104  ;;  %s6224_s18 = sld [smem:[#allocation28_spill]]  ;;  %s6225_s20 = sld [smem:[#allocation36_spill]] }
  0xd6   : > { %s304_s30 = sand.u32 1, %s4616_s1  }
  0xd7   : > { %s305_s12 = scalar_lea.sflag [#allocation12], %s304_s30 }
  0xdb   : > { %s306_s2 = sand.u32 1, %s6224_s18   ;;  %p6226_p13 = scmp.ne.s32.totalorder %s6225_s20, 0 }
  0xdc   : > { %s3330_s28 = sshll.u32 %s306_s2, 9 }
  0xdd   : > { %s4900_s7 = scalar_lea.vmem [#allocation11], %s3330_s28 }
  0xde   : > { %4347 = dma.done.wait (%p6226_p13), %s305_s12, 8192  }
  0xdf   : > { %4349 = vsyncadd (%p6226_p13), %s305_s12, 4294959104  ;;  %s315_s15 = sand.u32 1, %s4376_s19  }
  0xe0   : > { %s3331_s5 = sshll.u32 %s315_s15, 8 }
  0xe1   : > { %s4907_s25 = scalar_lea.vmem [#allocation13], %s3331_s5 }
  0xe2   : > { %4351 = dma.done.wait (%p4824_p0), %s305_s12, 4096  }
  0xe3   : > { %4353 = vsyncadd (%p4824_p0), %s305_s12, 4294963200  ;;  %s6227_s1 = sld [smem:[#allocation31_spill]]  ;;  %s347_s21 = sand.u32 1, %s4364_s16  }
  0xe4   : > { %s3332_s8 = sshll.u32 %s347_s21, 8 }
  0xe5   : > { %s4924_s9 = scalar_lea.vmem [#allocation14], %s3332_s8 }
  0xe9   : > { %s4915_s26 = sld [smem:[#allocation6 + %s6227_s1]] }
  0xea   : > { %s4918_s13 = sld [smem:[#allocation7 + %s6227_s1]] }
  0xf0   : > { %p373_p9 = scmp.gt.s32.totalorder %s4918_s13, %s4915_s26 }
  0xf1   : > { %v4437_v0 = vmov (%p373_p9), 0.0  }
  0xf2   : > { %378 = sbr.rel (!%p373_p9) target bundleno = 274 (0x112), region = 48  ;;  %379 = vst [vmem:[#allocation2] sm:$0xff] (%p373_p9), %v4437_v0  ;;  %380 = vst [vmem:[#allocation2 + $0x8] sm:$0xff] (%p373_p9), %v4437_v0 }
  0xf3   : > { %381 = vst [vmem:[#allocation2 + $0x10] sm:$0xff] (%p373_p9), %v4437_v0  ;;  %382 = vst [vmem:[#allocation2 + $0x18] sm:$0xff] (%p373_p9), %v4437_v0 }
  0xf4   : > { %383 = vst [vmem:[#allocation2 + $0x20] sm:$0xff] (%p373_p9), %v4437_v0  ;;  %384 = vst [vmem:[#allocation2 + $0x28] sm:$0xff] (%p373_p9), %v4437_v0 }
  0xf5   : > { %385 = vst [vmem:[#allocation2 + $0x30] sm:$0xff] (%p373_p9), %v4437_v0  ;;  %386 = vst [vmem:[#allocation2 + $0x38] sm:$0xff] (%p373_p9), %v4437_v0 }
  0xf6   : > { %387 = vst [vmem:[#allocation2 + $0x40] sm:$0xff] (%p373_p9), %v4437_v0  ;;  %388 = vst [vmem:[#allocation2 + $0x48] sm:$0xff] (%p373_p9), %v4437_v0 }
  0xf7   : > { %389 = vst [vmem:[#allocation2 + $0x50] sm:$0xff] (%p373_p9), %v4437_v0  ;;  %390 = vst [vmem:[#allocation2 + $0x58] sm:$0xff] (%p373_p9), %v4437_v0 }
  0xf8   : > { %391 = vst [vmem:[#allocation2 + $0x60] sm:$0xff] (%p373_p9), %v4437_v0  ;;  %392 = vst [vmem:[#allocation2 + $0x68] sm:$0xff] (%p373_p9), %v4437_v0 }
  0xf9   : > { %393 = vst [vmem:[#allocation2 + $0x70] sm:$0xff] %v4437_v0  ;;  %394 = vst [vmem:[#allocation2 + $0x78] sm:$0xff] %v4437_v0 }
  0xfa   : > { %395 = vst [vmem:[#allocation2 + $0x80] sm:$0xff] %v4437_v0  ;;  %396 = vst [vmem:[#allocation2 + $0x88] sm:$0xff] %v4437_v0 }
  0xfb   : > { %397 = vst [vmem:[#allocation2 + $0x90] sm:$0xff] %v4437_v0  ;;  %398 = vst [vmem:[#allocation2 + $0x98] sm:$0xff] %v4437_v0 }
  0xfc   : > { %399 = vst [vmem:[#allocation2 + $0xa0] sm:$0xff] %v4437_v0  ;;  %400 = vst [vmem:[#allocation2 + $0xa8] sm:$0xff] %v4437_v0 }
  0xfd   : > { %401 = vst [vmem:[#allocation2 + $0xb0] sm:$0xff] %v4437_v0  ;;  %402 = vst [vmem:[#allocation2 + $0xb8] sm:$0xff] %v4437_v0 }
  0xfe   : > { %403 = vst [vmem:[#allocation2 + $0xc0] sm:$0xff] %v4437_v0  ;;  %404 = vst [vmem:[#allocation2 + $0xc8] sm:$0xff] %v4437_v0 }
  0xff   : > { %405 = vst [vmem:[#allocation2 + $0xd0] sm:$0xff] %v4437_v0  ;;  %406 = vst [vmem:[#allocation2 + $0xd8] sm:$0xff] %v4437_v0 }
 0x100   : > { %407 = vst [vmem:[#allocation2 + $0xe0] sm:$0xff] %v4437_v0  ;;  %408 = vst [vmem:[#allocation2 + $0xe8] sm:$0xff] %v4437_v0 }
 0x101   : > { %409 = vst [vmem:[#allocation2 + $0xf0] sm:$0xff] %v4437_v0  ;;  %410 = vst [vmem:[#allocation2 + $0xf8] sm:$0xff] %v4437_v0 }
 0x102   : > { %411 = vst [vmem:[#allocation2 + $0x100] sm:$0xff] %v4437_v0  ;;  %412 = vst [vmem:[#allocation2 + $0x108] sm:$0xff] %v4437_v0 }
 0x103   : > { %413 = vst [vmem:[#allocation2 + $0x110] sm:$0xff] %v4437_v0  ;;  %414 = vst [vmem:[#allocation2 + $0x118] sm:$0xff] %v4437_v0 }
 0x104   : > { %415 = vst [vmem:[#allocation2 + $0x120] sm:$0xff] %v4437_v0  ;;  %416 = vst [vmem:[#allocation2 + $0x128] sm:$0xff] %v4437_v0 }
 0x105   : > { %417 = vst [vmem:[#allocation2 + $0x130] sm:$0xff] %v4437_v0  ;;  %418 = vst [vmem:[#allocation2 + $0x138] sm:$0xff] %v4437_v0 }
 0x106   : > { %419 = vst [vmem:[#allocation2 + $0x140] sm:$0xff] %v4437_v0  ;;  %420 = vst [vmem:[#allocation2 + $0x148] sm:$0xff] %v4437_v0 }
 0x107   : > { %421 = vst [vmem:[#allocation2 + $0x150] sm:$0xff] %v4437_v0  ;;  %422 = vst [vmem:[#allocation2 + $0x158] sm:$0xff] %v4437_v0 }
 0x108   : > { %423 = vst [vmem:[#allocation2 + $0x160] sm:$0xff] %v4437_v0  ;;  %424 = vst [vmem:[#allocation2 + $0x168] sm:$0xff] %v4437_v0 }
 0x109   : > { %425 = vst [vmem:[#allocation2 + $0x170] sm:$0xff] %v4437_v0  ;;  %426 = vst [vmem:[#allocation2 + $0x178] sm:$0xff] %v4437_v0 }
 0x10a   : > { %427 = vst [vmem:[#allocation2 + $0x180] sm:$0xff] %v4437_v0  ;;  %428 = vst [vmem:[#allocation2 + $0x188] sm:$0xff] %v4437_v0 }
 0x10b   : > { %429 = vst [vmem:[#allocation2 + $0x190] sm:$0xff] %v4437_v0  ;;  %430 = vst [vmem:[#allocation2 + $0x198] sm:$0xff] %v4437_v0 }
 0x10c   : > { %431 = vst [vmem:[#allocation2 + $0x1a0] sm:$0xff] %v4437_v0  ;;  %432 = vst [vmem:[#allocation2 + $0x1a8] sm:$0xff] %v4437_v0 }
 0x10d   : > { %433 = vst [vmem:[#allocation2 + $0x1b0] sm:$0xff] %v4437_v0  ;;  %434 = vst [vmem:[#allocation2 + $0x1b8] sm:$0xff] %v4437_v0 }
 0x10e   : > { %435 = vst [vmem:[#allocation2 + $0x1c0] sm:$0xff] %v4437_v0  ;;  %436 = vst [vmem:[#allocation2 + $0x1c8] sm:$0xff] %v4437_v0 }
 0x10f   : > { %437 = vst [vmem:[#allocation2 + $0x1d0] sm:$0xff] %v4437_v0  ;;  %438 = vst [vmem:[#allocation2 + $0x1d8] sm:$0xff] %v4437_v0 }
 0x110   : > { %439 = vst [vmem:[#allocation2 + $0x1e0] sm:$0xff] %v4437_v0  ;;  %440 = vst [vmem:[#allocation2 + $0x1e8] sm:$0xff] %v4437_v0 }
 0x111   : > { %441 = vst [vmem:[#allocation2 + $0x1f0] sm:$0xff] %v4437_v0  ;;  %442 = vst [vmem:[#allocation2 + $0x1f8] sm:$0xff] %v4437_v0 }
 0x112 PF: > { %p3334_p0 = scmp.le.s32.totalorder %s4918_s13, %s4915_s26 }
 0x113   : > { %v3872_v1 = vld [vmem:[%s4900_s7 + $0x4] ss:$8 sps:$4 sm:$0xff] (!%p3334_p0)   ;;  %v3876_v3 = vld [vmem:[%s4900_s7] ss:$8 sps:$4 sm:$0xff] (!%p3334_p0)   ;;  %v3878_v5 = vld [vmem:[%s4900_s7 + $0x14] ss:$8 sps:$4 sm:$0xff] (!%p3334_p0)  }
 0x114   : > { %445 = sbr.rel (%p3334_p0) target bundleno = 681 (0x2a9), region = 52  ;;  %v3874_v2 = vld [vmem:[%s4900_s7 + $0x104] ss:$8 sps:$4 sm:$0xff] (!%p3334_p0)   ;;  %1278 = vmatprep.subr.bf16.mxu1 (!%p3334_p0), %v3872_v1  ;;  %v3877_v4 = vld [vmem:[%s4900_s7 + $0x100] ss:$8 sps:$4 sm:$0xff] (!%p3334_p0)  }
 0x115   : > { %1471 = vmatprep.subr.bf16.mxu0 (!%p3334_p0), %v3874_v2  ;;  %1279 = vmatpush1.bf16.msra.mxu1 (!%p3334_p0), %v3876_v3  ;;  %v3880_v6 = vld [vmem:[%s4900_s7 + $0x114] ss:$8 sps:$4 sm:$0xff] (!%p3334_p0)   ;;  %v3882_v7 = vld [vmem:[%s4900_s7 + $0x10] ss:$8 sps:$4 sm:$0xff] (!%p3334_p0)   ;;  %v3884_v9 = vld [vmem:[%s4900_s7 + $0x24] ss:$8 sps:$4 sm:$0xff] (!%p3334_p0)  }
 0x116   : > { %1472 = vmatpush1.bf16.msra.mxu0 (!%p3334_p0), %v3877_v4  ;;  %1280 = vmatprep.subr.bf16.mxu1 (!%p3334_p0), %v3878_v5  ;;  %v3883_v8 = vld [vmem:[%s4900_s7 + $0x110] ss:$8 sps:$4 sm:$0xff] (!%p3334_p0)   ;;  %v3886_v10 = vld [vmem:[%s4900_s7 + $0x124] ss:$8 sps:$4 sm:$0xff] (!%p3334_p0)   ;;  %v3888_v11 = vld [vmem:[%s4900_s7 + $0x20] ss:$8 sps:$4 sm:$0xff] (!%p3334_p0)  }
 0x117   : > { %1473 = vmatprep.subr.bf16.mxu0 (!%p3334_p0), %v3880_v6  ;;  %v3889_v12 = vld [vmem:[%s4900_s7 + $0x120] ss:$8 sps:$4 sm:$0xff] (!%p3334_p0)   ;;  %v3890_v13 = vld [vmem:[%s4900_s7 + $0x34] ss:$8 sps:$4 sm:$0xff] (!%p3334_p0)   ;;  %v3894_v15 = vld [vmem:[%s4900_s7 + $0x30] ss:$8 sps:$4 sm:$0xff] (!%p3334_p0)  }
 0x118   : > { %v3892_v14 = vld [vmem:[%s4900_s7 + $0x134] ss:$8 sps:$4 sm:$0xff] (!%p3334_p0)   ;;  %v3895_v16 = vld [vmem:[%s4900_s7 + $0x130] ss:$8 sps:$4 sm:$0xff] (!%p3334_p0)   ;;  %v3896_v17 = vld [vmem:[%s4900_s7 + $0x44] ss:$8 sps:$4 sm:$0xff] (!%p3334_p0)  }
 0x119   : > { %1281 = vmatpush1.bf16.msra.mxu1 (!%p3334_p0), %v3882_v7  ;;  %v3898_v18 = vld [vmem:[%s4900_s7 + $0x144] ss:$8 sps:$4 sm:$0xff] (!%p3334_p0)   ;;  %v3900_v19 = vld [vmem:[%s4900_s7 + $0x40] ss:$8 sps:$4 sm:$0xff] (!%p3334_p0)   ;;  %v3902_v21 = vld [vmem:[%s4900_s7 + $0x54] ss:$8 sps:$4 sm:$0xff] (!%p3334_p0)  }
 0x11a   : > { %1474 = vmatpush1.bf16.msra.mxu0 (!%p3334_p0), %v3883_v8  ;;  %1282 = vmatprep.subr.bf16.mxu1 (!%p3334_p0), %v3884_v9  ;;  %v3901_v20 = vld [vmem:[%s4900_s7 + $0x140] ss:$8 sps:$4 sm:$0xff] (!%p3334_p0)   ;;  %v3904_v22 = vld [vmem:[%s4900_s7 + $0x154] ss:$8 sps:$4 sm:$0xff] (!%p3334_p0)   ;;  %v3906_v23 = vld [vmem:[%s4900_s7 + $0x50] ss:$8 sps:$4 sm:$0xff] (!%p3334_p0)  }
 0x11b   : > { %1475 = vmatprep.subr.bf16.mxu0 %v3886_v10  ;;  %v3907_v24 = vld [vmem:[%s4900_s7 + $0x150] ss:$8 sps:$4 sm:$0xff]   ;;  %v3908_v25 = vld [vmem:[%s4900_s7 + $0x64] ss:$8 sps:$4 sm:$0xff]   ;;  %v3912_v27 = vld [vmem:[%s4900_s7 + $0x60] ss:$8 sps:$4 sm:$0xff]  }
 0x11c   : > { %v3910_v26 = vld [vmem:[%s4900_s7 + $0x164] ss:$8 sps:$4 sm:$0xff]   ;;  %v3913_v28 = vld [vmem:[%s4900_s7 + $0x160] ss:$8 sps:$4 sm:$0xff]   ;;  %v3914_v29 = vld [vmem:[%s4900_s7 + $0x74] ss:$8 sps:$4 sm:$0xff]  }
 0x11d   : > { %1283 = vmatpush1.bf16.msra.mxu1 %v3888_v11  ;;  %v3916_v30 = vld [vmem:[%s4900_s7 + $0x174] ss:$8 sps:$4 sm:$0xff]   ;;  %v3918_v31 = vld [vmem:[%s4900_s7 + $0x70] ss:$8 sps:$4 sm:$0xff]   ;;  %v3920_v33 = vld [vmem:[%s4900_s7 + $0x84] ss:$8 sps:$4 sm:$0xff]  }
 0x11e   : > { %1476 = vmatpush1.bf16.msra.mxu0 %v3889_v12  ;;  %1284 = vmatprep.subr.bf16.mxu1 %v3890_v13  ;;  %v3919_v32 = vld [vmem:[%s4900_s7 + $0x170] ss:$8 sps:$4 sm:$0xff]   ;;  %v3922_v34 = vld [vmem:[%s4900_s7 + $0x184] ss:$8 sps:$4 sm:$0xff]   ;;  %v3924_v35 = vld [vmem:[%s4900_s7 + $0x80] ss:$8 sps:$4 sm:$0xff]  }
 0x11f   : > { %1477 = vmatprep.subr.bf16.mxu0 %v3892_v14  ;;  %v3925_v36 = vld [vmem:[%s4900_s7 + $0x180] ss:$8 sps:$4 sm:$0xff]   ;;  %v3926_v37 = vld [vmem:[%s4900_s7 + $0x94] ss:$8 sps:$4 sm:$0xff]   ;;  %v3930_v39 = vld [vmem:[%s4900_s7 + $0x90] ss:$8 sps:$4 sm:$0xff]  }
 0x120   : > { %v3928_v38 = vld [vmem:[%s4900_s7 + $0x194] ss:$8 sps:$4 sm:$0xff]   ;;  %v3931_v40 = vld [vmem:[%s4900_s7 + $0x190] ss:$8 sps:$4 sm:$0xff]   ;;  %v3932_v41 = vld [vmem:[%s4900_s7 + $0xa4] ss:$8 sps:$4 sm:$0xff]  }
 0x121   : > { %1285 = vmatpush1.bf16.msra.mxu1 %v3894_v15  ;;  %v3934_v42 = vld [vmem:[%s4900_s7 + $0x1a4] ss:$8 sps:$4 sm:$0xff]   ;;  %v3936_v43 = vld [vmem:[%s4900_s7 + $0xa0] ss:$8 sps:$4 sm:$0xff]   ;;  %v3938_v45 = vld [vmem:[%s4900_s7 + $0xb4] ss:$8 sps:$4 sm:$0xff]  }
 0x122   : > { %1478 = vmatpush1.bf16.msra.mxu0 %v3895_v16  ;;  %1286 = vmatprep.subr.bf16.mxu1 %v3896_v17  ;;  %v3937_v44 = vld [vmem:[%s4900_s7 + $0x1a0] ss:$8 sps:$4 sm:$0xff]   ;;  %v3940_v46 = vld [vmem:[%s4900_s7 + $0x1b4] ss:$8 sps:$4 sm:$0xff]   ;;  %v3942_v47 = vld [vmem:[%s4900_s7 + $0xb0] ss:$8 sps:$4 sm:$0xff]  }
 0x123   : > { %1479 = vmatprep.subr.bf16.mxu0 %v3898_v18  ;;  %v3943_v48 = vld [vmem:[%s4900_s7 + $0x1b0] ss:$8 sps:$4 sm:$0xff]   ;;  %v3944_v49 = vld [vmem:[%s4900_s7 + $0xc4] ss:$8 sps:$4 sm:$0xff]   ;;  %v3948_v53 = vld [vmem:[%s4900_s7 + $0xc0] ss:$8 sps:$4 sm:$0xff]  }
 0x124   : > { %v3970_v50 = vld [vmem:[%s4892_s11 + $0x4] ss:$16 sps:$4 sm:$0xff]   ;;  %v3973_v52 = vld [vmem:[%s4892_s11 + $0xc] ss:$16 sps:$4 sm:$0xff]   ;;  %v3949_v54 = vld [vmem:[%s4900_s7 + $0x1c0] ss:$8 sps:$4 sm:$0xff]  }
 0x125   : > { %1287 = vmatpush1.bf16.msra.mxu1 %v3900_v19  ;;  %v3946_v51 = vld [vmem:[%s4900_s7 + $0x1c4] ss:$8 sps:$4 sm:$0xff]   ;;  %1310 = vmatprep.mubr.bf16.mxu1 %v3970_v50  ;;  %v3950_v55 = vld [vmem:[%s4900_s7 + $0xd4] ss:$8 sps:$4 sm:$0xff]   ;;  %v3954_v57 = vld [vmem:[%s4900_s7 + $0xd0] ss:$8 sps:$4 sm:$0xff]  }
 0x126   : > { %1480 = vmatpush1.bf16.msra.mxu0 %v3901_v20  ;;  %1288 = vmatprep.subr.bf16.mxu1 %v3902_v21  ;;  %v3952_v56 = vld [vmem:[%s4900_s7 + $0x1d4] ss:$8 sps:$4 sm:$0xff]   ;;  %v3955_v58 = vld [vmem:[%s4900_s7 + $0x1d0] ss:$8 sps:$4 sm:$0xff]   ;;  %v3956_v59 = vld [vmem:[%s4900_s7 + $0xe4] ss:$8 sps:$4 sm:$0xff]  }
 0x127   : > { %1481 = vmatprep.subr.bf16.mxu0 %v3904_v22  ;;  %1503 = vmatprep.mubr.bf16.mxu0 %v3973_v52  ;;  %v3958_v60 = vld [vmem:[%s4900_s7 + $0x1e4] ss:$8 sps:$4 sm:$0xff]   ;;  %v3960_v61 = vld [vmem:[%s4900_s7 + $0xe0] ss:$8 sps:$4 sm:$0xff]   ;;  %v3962_v63 = vld [vmem:[%s4900_s7 + $0xf4] ss:$8 sps:$4 sm:$0xff]  }
 0x128   : > { %v3961_v62 = vld [vmem:[%s4900_s7 + $0x1e0] ss:$8 sps:$4 sm:$0xff]   ;;  %v3964_v0 = vld [vmem:[%s4900_s7 + $0x1f4] ss:$8 sps:$4 sm:$0xff]   ;;  %v3966_v1 = vld [vmem:[%s4900_s7 + $0xf0] ss:$8 sps:$4 sm:$0xff]  }
 0x129   : > { %1289 = vmatpush1.bf16.msra.mxu1 %v3906_v23  ;;  %v3967_v2 = vld [vmem:[%s4900_s7 + $0x1f0] ss:$8 sps:$4 sm:$0xff]   ;;  %v3974_v5 = vld [vmem:[%s4892_s11 + $0x24] ss:$16 sps:$4 sm:$0xff]   ;;  %v3976_v6 = vld [vmem:[%s4892_s11 + $0x2c] ss:$16 sps:$4 sm:$0xff]  }
 0x12a   : > { %1482 = vmatpush1.bf16.msra.mxu0 %v3907_v24  ;;  %1290 = vmatprep.subr.bf16.mxu1 %v3908_v25  ;;  %v3968_v3 = vld [vmem:[%s4892_s11] ss:$16 sps:$4 sm:$0xff]   ;;  %v3971_v4 = vld [vmem:[%s4892_s11 + $0x8] ss:$16 sps:$4 sm:$0xff]   ;;  %v3980_v9 = vld [vmem:[%s4892_s11 + $0x44] ss:$16 sps:$4 sm:$0xff]  }
 0x12b   : > { %1483 = vmatprep.subr.bf16.mxu0 %v3910_v26  ;;  %v3978_v7 = vld [vmem:[%s4892_s11 + $0x20] ss:$16 sps:$4 sm:$0xff]   ;;  %v3979_v8 = vld [vmem:[%s4892_s11 + $0x28] ss:$16 sps:$4 sm:$0xff]   ;;  %v3982_v10 = vld [vmem:[%s4892_s11 + $0x4c] ss:$16 sps:$4 sm:$0xff]  }
 0x12c   : > { %v3984_v11 = vld [vmem:[%s4892_s11 + $0x40] ss:$16 sps:$4 sm:$0xff]   ;;  %v3985_v12 = vld [vmem:[%s4892_s11 + $0x48] ss:$16 sps:$4 sm:$0xff]   ;;  %v3986_v13 = vld [vmem:[%s4892_s11 + $0x64] ss:$16 sps:$4 sm:$0xff]  }
 0x12d   : > { %1291 = vmatpush1.bf16.msra.mxu1 %v3912_v27  ;;  %v3988_v14 = vld [vmem:[%s4892_s11 + $0x6c] ss:$16 sps:$4 sm:$0xff]   ;;  %v3990_v15 = vld [vmem:[%s4892_s11 + $0x60] ss:$16 sps:$4 sm:$0xff]   ;;  %v3991_v16 = vld [vmem:[%s4892_s11 + $0x68] ss:$16 sps:$4 sm:$0xff]  }
 0x12e   : > { %1484 = vmatpush1.bf16.msra.mxu0 %v3913_v28  ;;  %1292 = vmatprep.subr.bf16.mxu1 %v3914_v29  ;;  %v3992_v17 = vld [vmem:[%s4892_s11 + $0x84] ss:$16 sps:$4 sm:$0xff]   ;;  %v3994_v18 = vld [vmem:[%s4892_s11 + $0x8c] ss:$16 sps:$4 sm:$0xff]   ;;  %v3996_v19 = vld [vmem:[%s4892_s11 + $0x80] ss:$16 sps:$4 sm:$0xff]  }
 0x12f   : > { %1485 = vmatprep.subr.bf16.mxu0 %v3916_v30  ;;  %v3997_v20 = vld [vmem:[%s4892_s11 + $0x88] ss:$16 sps:$4 sm:$0xff]   ;;  %v3998_v21 = vld [vmem:[%s4892_s11 + $0xa4] ss:$16 sps:$4 sm:$0xff]   ;;  %v4000_v22 = vld [vmem:[%s4892_s11 + $0xac] ss:$16 sps:$4 sm:$0xff]  }
 0x130   : > { %v4002_v23 = vld [vmem:[%s4892_s11 + $0xa0] ss:$16 sps:$4 sm:$0xff]   ;;  %v4003_v24 = vld [vmem:[%s4892_s11 + $0xa8] ss:$16 sps:$4 sm:$0xff]   ;;  %v4004_v25 = vld [vmem:[%s4892_s11 + $0xc4] ss:$16 sps:$4 sm:$0xff]  }
 0x131   : > { %1293 = vmatpush1.bf16.msra.mxu1 %v3918_v31  ;;  %v4006_v26 = vld [vmem:[%s4892_s11 + $0xcc] ss:$16 sps:$4 sm:$0xff]   ;;  %v4008_v27 = vld [vmem:[%s4892_s11 + $0xc0] ss:$16 sps:$4 sm:$0xff]   ;;  %v4009_v28 = vld [vmem:[%s4892_s11 + $0xc8] ss:$16 sps:$4 sm:$0xff]  }
 0x132   : > { %1486 = vmatpush1.bf16.msra.mxu0 %v3919_v32  ;;  %1294 = vmatprep.subr.bf16.mxu1 %v3920_v33  ;;  %v4010_v29 = vld [vmem:[%s4892_s11 + $0xe4] ss:$16 sps:$4 sm:$0xff]   ;;  %v4012_v30 = vld [vmem:[%s4892_s11 + $0xec] ss:$16 sps:$4 sm:$0xff]   ;;  %v4014_v31 = vld [vmem:[%s4892_s11 + $0xe0] ss:$16 sps:$4 sm:$0xff]  }
 0x133   : > { %1487 = vmatprep.subr.bf16.mxu0 %v3922_v34  ;;  %v4015_v32 = vld [vmem:[%s4892_s11 + $0xe8] ss:$16 sps:$4 sm:$0xff]   ;;  %v4016_v33 = vld [vmem:[%s4892_s11 + $0x104] ss:$16 sps:$4 sm:$0xff]   ;;  %v4018_v34 = vld [vmem:[%s4892_s11 + $0x10c] ss:$16 sps:$4 sm:$0xff]  }
 0x134   : > { %v4042_v50 = vld [vmem:[%s4892_s11 + $0x18c] ss:$16 sps:$4 sm:$0xff]   ;;  %v4045_v52 = vld [vmem:[%s4892_s11 + $0x188] ss:$16 sps:$4 sm:$0xff]  }
 0x135   : > { %1295 = vmatpush1.bf16.msra.mxu1 %v3924_v35  ;;  %v4020_v35 = vld [vmem:[%s4892_s11 + $0x100] ss:$16 sps:$4 sm:$0xff]  }
 0x136   : > { %1488 = vmatpush1.bf16.msra.mxu0 %v3925_v36  ;;  %1296 = vmatprep.subr.bf16.mxu1 %v3926_v37  ;;  %v4021_v36 = vld [vmem:[%s4892_s11 + $0x108] ss:$16 sps:$4 sm:$0xff]   ;;  %v4022_v37 = vld [vmem:[%s4892_s11 + $0x124] ss:$16 sps:$4 sm:$0xff]  }
 0x137   : > { %1489 = vmatprep.subr.bf16.mxu0 %v3928_v38  ;;  %v4024_v38 = vld [vmem:[%s4892_s11 + $0x12c] ss:$16 sps:$4 sm:$0xff]  }
 0x139   : > { %1297 = vmatpush1.bf16.msra.mxu1 %v3930_v39  ;;  %v4026_v39 = vld [vmem:[%s4892_s11 + $0x120] ss:$16 sps:$4 sm:$0xff]  }
 0x13a   : > { %1490 = vmatpush1.bf16.msra.mxu0 %v3931_v40  ;;  %1298 = vmatprep.subr.bf16.mxu1 %v3932_v41  ;;  %v4027_v40 = vld [vmem:[%s4892_s11 + $0x128] ss:$16 sps:$4 sm:$0xff]   ;;  %v4028_v41 = vld [vmem:[%s4892_s11 + $0x144] ss:$16 sps:$4 sm:$0xff]  }
 0x13b   : > { %1491 = vmatprep.subr.bf16.mxu0 %v3934_v42  ;;  %v4030_v42 = vld [vmem:[%s4892_s11 + $0x14c] ss:$16 sps:$4 sm:$0xff]  }
 0x13d   : > { %1299 = vmatpush1.bf16.msra.mxu1 %v3936_v43  ;;  %v4032_v43 = vld [vmem:[%s4892_s11 + $0x140] ss:$16 sps:$4 sm:$0xff]  }
 0x13e   : > { %1492 = vmatpush1.bf16.msra.mxu0 %v3937_v44  ;;  %1300 = vmatprep.subr.bf16.mxu1 %v3938_v45  ;;  %v4033_v44 = vld [vmem:[%s4892_s11 + $0x148] ss:$16 sps:$4 sm:$0xff]   ;;  %v4034_v45 = vld [vmem:[%s4892_s11 + $0x164] ss:$16 sps:$4 sm:$0xff]  }
 0x13f   : > { %1493 = vmatprep.subr.bf16.mxu0 %v3940_v46  ;;  %v4036_v46 = vld [vmem:[%s4892_s11 + $0x16c] ss:$16 sps:$4 sm:$0xff]  }
 0x141   : > { %1301 = vmatpush1.bf16.msra.mxu1 %v3942_v47  ;;  %v4038_v47 = vld [vmem:[%s4892_s11 + $0x160] ss:$16 sps:$4 sm:$0xff]  }
 0x142   : > { %1494 = vmatpush1.bf16.msra.mxu0 %v3943_v48  ;;  %1302 = vmatprep.subr.bf16.mxu1 %v3944_v49  ;;  %v4039_v48 = vld [vmem:[%s4892_s11 + $0x168] ss:$16 sps:$4 sm:$0xff]   ;;  %v4040_v49 = vld [vmem:[%s4892_s11 + $0x184] ss:$16 sps:$4 sm:$0xff]  }
 0x143   : > { %1495 = vmatprep.subr.bf16.mxu0 %v3946_v51  ;;  %v4044_v51 = vld [vmem:[%s4892_s11 + $0x180] ss:$16 sps:$4 sm:$0xff]  }
 0x145   : > { %1303 = vmatpush1.bf16.msra.mxu1 %v3948_v53  ;;  %v4046_v53 = vld [vmem:[%s4892_s11 + $0x1a4] ss:$16 sps:$4 sm:$0xff]  }
 0x146   : > { %1496 = vmatpush1.bf16.msra.mxu0 %v3949_v54  ;;  %1304 = vmatprep.subr.bf16.mxu1 %v3950_v55  ;;  %v4048_v54 = vld [vmem:[%s4892_s11 + $0x1ac] ss:$16 sps:$4 sm:$0xff]   ;;  %v4050_v55 = vld [vmem:[%s4892_s11 + $0x1a0] ss:$16 sps:$4 sm:$0xff]  }
 0x147   : > { %1497 = vmatprep.subr.bf16.mxu0 %v3952_v56  ;;  %v4051_v56 = vld [vmem:[%s4892_s11 + $0x1a8] ss:$16 sps:$4 sm:$0xff]  }
 0x149   : > { %1305 = vmatpush1.bf16.msra.mxu1 %v3954_v57  ;;  %v4052_v57 = vld [vmem:[%s4892_s11 + $0x1c4] ss:$16 sps:$4 sm:$0xff]  }
 0x14a   : > { %1498 = vmatpush1.bf16.msra.mxu0 %v3955_v58  ;;  %1306 = vmatprep.subr.bf16.mxu1 %v3956_v59  ;;  %v4054_v58 = vld [vmem:[%s4892_s11 + $0x1cc] ss:$16 sps:$4 sm:$0xff]   ;;  %v4056_v59 = vld [vmem:[%s4892_s11 + $0x1c0] ss:$16 sps:$4 sm:$0xff]  }
 0x14b   : > { %1499 = vmatprep.subr.bf16.mxu0 %v3958_v60  ;;  %v4057_v60 = vld [vmem:[%s4892_s11 + $0x1c8] ss:$16 sps:$4 sm:$0xff]  }
 0x14d   : > { %1307 = vmatpush1.bf16.msra.mxu1 %v3960_v61  ;;  %v4058_v61 = vld [vmem:[%s4892_s11 + $0x1e4] ss:$16 sps:$4 sm:$0xff]  }
 0x14e   : > { %1500 = vmatpush1.bf16.msra.mxu0 %v3961_v62  ;;  %1308 = vmatprep.subr.bf16.mxu1 %v3962_v63  ;;  %v4060_v62 = vld [vmem:[%s4892_s11 + $0x1ec] ss:$16 sps:$4 sm:$0xff]   ;;  %v4062_v63 = vld [vmem:[%s4892_s11 + $0x1e0] ss:$16 sps:$4 sm:$0xff]  }
 0x14f   : > { %1501 = vmatprep.subr.bf16.mxu0 %v3964_v0  ;;  %v4063_v0 = vld [vmem:[%s4892_s11 + $0x1e8] ss:$16 sps:$4 sm:$0xff]  }
 0x151   : > { %1309 = vmatpush1.bf16.msra.mxu1 %v3966_v1 }
 0x152   : > { %1502 = vmatpush1.bf16.msra.mxu0 %v3967_v2  ;;  %v446_v2 = vld [vmem:[#allocation2] sm:$0xff] }
 0x154   : > { %1311 = vmatmul.mubr.bf16.vlgmr.msra.gmra.mrb[0].mxu1 %v3968_v3 }
 0x155   : > { %1504 = vmatmul.mubr.bf16.vlgmr.msra.gmra.mrb[0].mxu0 %v3971_v4  ;;  %1320 = vmatprep.mubr.bf16.mxu1 %v3974_v5 }
 0x156   : > { %1513 = vmatprep.mubr.bf16.mxu0 %v3976_v6  ;;  %v447_v6 = vld [vmem:[#allocation2 + $0x8] sm:$0xff] }
 0x15c   : > { %1321 = vmatmul.mubr.bf16.gmra.mrb[4].mxu1 %v3978_v7 }
 0x15d   : > { %1514 = vmatmul.mubr.bf16.gmra.mrb[4].mxu0 %v3979_v8  ;;  %1330 = vmatprep.mubr.bf16.mxu1 %v3980_v9 }
 0x15e   : > { %1523 = vmatprep.mubr.bf16.mxu0 %v3982_v10  ;;  %v448_v10 = vld [vmem:[#allocation2 + $0x10] sm:$0xff] }
 0x164   : > { %1331 = vmatmul.mubr.bf16.gmra.mrb[8].mxu1 %v3984_v11 }
 0x165   : > { %1524 = vmatmul.mubr.bf16.gmra.mrb[8].mxu0 %v3985_v12  ;;  %1340 = vmatprep.mubr.bf16.mxu1 %v3986_v13 }
 0x166   : > { %1533 = vmatprep.mubr.bf16.mxu0 %v3988_v14 }
 0x16c   : > { %1341 = vmatmul.mubr.bf16.gmra.mrb[12].mxu1 %v3990_v15  ;;  %v449_v15 = vld [vmem:[#allocation2 + $0x18] sm:$0xff] }
 0x16d   : > { %1534 = vmatmul.mubr.bf16.gmra.mrb[12].mxu0 %v3991_v16  ;;  %1350 = vmatprep.mubr.bf16.mxu1 %v3992_v17 }
 0x16e   : > { %1543 = vmatprep.mubr.bf16.mxu0 %v3994_v18 }
 0x174   : > { %1351 = vmatmul.mubr.bf16.gmra.mrb[16].mxu1 %v3996_v19 }
 0x175   : > { %1544 = vmatmul.mubr.bf16.gmra.mrb[16].mxu0 %v3997_v20  ;;  %1360 = vmatprep.mubr.bf16.mxu1 %v3998_v21 }
 0x176   : > { %1553 = vmatprep.mubr.bf16.mxu0 %v4000_v22  ;;  %v450_v22 = vld [vmem:[#allocation2 + $0x20] sm:$0xff] }
 0x17c   : > { %1361 = vmatmul.mubr.bf16.gmra.mrb[20].mxu1 %v4002_v23 }
 0x17d   : > { %1554 = vmatmul.mubr.bf16.gmra.mrb[20].mxu0 %v4003_v24  ;;  %1370 = vmatprep.mubr.bf16.mxu1 %v4004_v25 }
 0x17e   : > { %1563 = vmatprep.mubr.bf16.mxu0 %v4006_v26  ;;  %v451_v26 = vld [vmem:[#allocation2 + $0x28] sm:$0xff] }
 0x184   : > { %1371 = vmatmul.mubr.bf16.gmra.mrb[24].mxu1 %v4008_v27 }
 0x185   : > { %1564 = vmatmul.mubr.bf16.gmra.mrb[24].mxu0 %v4009_v28  ;;  %1380 = vmatprep.mubr.bf16.mxu1 %v4010_v29 }
 0x186   : > { %1573 = vmatprep.mubr.bf16.mxu0 %v4012_v30  ;;  %v452_v30 = vld [vmem:[#allocation2 + $0x30] sm:$0xff] }
 0x18c   : > { %1381 = vmatmul.mubr.bf16.gmra.mrb[28].mxu1 %v4014_v31 }
 0x18d   : > { %1574 = vmatmul.mubr.bf16.gmra.mrb[28].mxu0 %v4015_v32  ;;  %1390 = vmatprep.mubr.bf16.mxu1 %v4016_v33 }
 0x18e   : > { %1583 = vmatprep.mubr.bf16.mxu0 %v4018_v34 }
 0x194   : > { %1391 = vmatmul.mubr.bf16.gmra.mrb[32].mxu1 %v4020_v35  ;;  %v453_v35 = vld [vmem:[#allocation2 + $0x38] sm:$0xff] }
 0x195   : > { %1584 = vmatmul.mubr.bf16.gmra.mrb[32].mxu0 %v4021_v36  ;;  %1400 = vmatprep.mubr.bf16.mxu1 %v4022_v37 }
 0x196   : > { %1593 = vmatprep.mubr.bf16.mxu0 %v4024_v38 }
 0x19c   : > { %1401 = vmatmul.mubr.bf16.gmra.mrb[36].mxu1 %v4026_v39 }
 0x19d   : > { %1594 = vmatmul.mubr.bf16.gmra.mrb[36].mxu0 %v4027_v40  ;;  %1410 = vmatprep.mubr.bf16.mxu1 %v4028_v41 }
 0x19e   : > { %1603 = vmatprep.mubr.bf16.mxu0 %v4030_v42  ;;  %v454_v42 = vld [vmem:[#allocation2 + $0x40] sm:$0xff] }
 0x1a4   : > { %1411 = vmatmul.mubr.bf16.gmra.mrb[40].mxu1 %v4032_v43 }
 0x1a5   : > { %1604 = vmatmul.mubr.bf16.gmra.mrb[40].mxu0 %v4033_v44  ;;  %1420 = vmatprep.mubr.bf16.mxu1 %v4034_v45 }
 0x1a6   : > { %1613 = vmatprep.mubr.bf16.mxu0 %v4036_v46  ;;  %v455_v46 = vld [vmem:[#allocation2 + $0x48] sm:$0xff] }
 0x1ac   : > { %1421 = vmatmul.mubr.bf16.gmra.mrb[44].mxu1 %v4038_v47 }
 0x1ad   : > { %1614 = vmatmul.mubr.bf16.gmra.mrb[44].mxu0 %v4039_v48  ;;  %1430 = vmatprep.mubr.bf16.mxu1 %v4040_v49 }
 0x1ae   : > { %1623 = vmatprep.mubr.bf16.mxu0 %v4042_v50  ;;  %v456_v50 = vld [vmem:[#allocation2 + $0x50] sm:$0xff] }
 0x1b4   : > { %1431 = vmatmul.mubr.bf16.gmra.mrb[48].mxu1 %v4044_v51 }
 0x1b5   : > { %1624 = vmatmul.mubr.bf16.gmra.mrb[48].mxu0 %v4045_v52  ;;  %1440 = vmatprep.mubr.bf16.mxu1 %v4046_v53 }
 0x1b6   : > { %1633 = vmatprep.mubr.bf16.mxu0 %v4048_v54 }
 0x1bc   : > { %1441 = vmatmul.mubr.bf16.gmra.mrb[52].mxu1 %v4050_v55  ;;  %v457_v55 = vld [vmem:[#allocation2 + $0x58] sm:$0xff] }
 0x1bd   : > { %1634 = vmatmul.mubr.bf16.gmra.mrb[52].mxu0 %v4051_v56  ;;  %1450 = vmatprep.mubr.bf16.mxu1 %v4052_v57 }
 0x1be   : > { %1643 = vmatprep.mubr.bf16.mxu0 %v4054_v58 }
 0x1c4   : > { %1451 = vmatmul.mubr.bf16.gmra.mrb[56].mxu1 %v4056_v59 }
 0x1c5   : > { %1644 = vmatmul.mubr.bf16.gmra.mrb[56].mxu0 %v4057_v60  ;;  %1460 = vmatprep.mubr.bf16.mxu1 %v4058_v61 }
 0x1c6   : > { %1653 = vmatprep.mubr.bf16.mxu0 %v4060_v62  ;;  %v458_v62 = vld [vmem:[#allocation2 + $0x60] sm:$0xff] }
 0x1cc   : > { %1461 = vmatmul.mubr.bf16.gmra.mrb[60].mxu1 %v4062_v63 }
 0x1cd   : > { %1654 = vmatmul.mubr.bf16.gmra.mrb[60].mxu0 %v4063_v0 }
 0x227   : > { %v1312_v1 = vpop.f32.mrb[0].mxu1 }
 0x228   : > { %v1505_v3 = vpop.f32.mrb[0].mxu0  ;;  %v1314_v5 = vpop.f32.mrb[1].mxu1 }
 0x229   : > { %v1506_v4 = vadd.f32 %v1505_v3, %v1312_v1  ;;  %v1507_v7 = vpop.f32.mrb[1].mxu0  ;;  %v1316_v9 = vpop.f32.mrb[2].mxu1 }
 0x22a   : > { %v1508_v8 = vadd.f32 %v1507_v7, %v1314_v5  ;;  %v1509_v11 = vpop.f32.mrb[2].mxu0  ;;  %v1318_v14 = vpop.f32.mrb[3].mxu1 }
 0x22b   : > { %v1664_v12 = vadd.f32 %v1506_v4, %v446_v2  ;;  %v1510_v13 = vadd.f32 %v1509_v11, %v1316_v9  ;;  %v1511_v16 = vpop.f32.mrb[3].mxu0  ;;  %v459_v2 = vld [vmem:[#allocation2 + $0x68] sm:$0xff]  ;;  %v461_v11 = vld [vmem:[#allocation2 + $0x78] sm:$0xff] }
 0x22c   : > { %v1665_v17 = vadd.f32 %v1508_v8, %v447_v6  ;;  %v1512_v18 = vadd.f32 %v1511_v16, %v1318_v14  ;;  %v460_v6 = vld [vmem:[#allocation2 + $0x70] sm:$0xff] }
 0x22d   : > { %1728 = vst [vmem:[#allocation2] sm:$0xff] %v1664_v12  ;;  %v1666_v19 = vadd.f32 %v1510_v13, %v448_v10 }
 0x22e   : > { %1729 = vst [vmem:[#allocation2 + $0x8] sm:$0xff] %v1665_v17  ;;  %v1667_v20 = vadd.f32 %v1512_v18, %v449_v15  ;;  %v462_v18 = vld [vmem:[#allocation2 + $0x80] sm:$0xff] }
 0x22f   : > { %1730 = vst [vmem:[#allocation2 + $0x10] sm:$0xff] %v1666_v19  ;;  %v1322_v21 = vpop.f32.mrb[4].mxu1 }
 0x230   : > { %1731 = vst [vmem:[#allocation2 + $0x18] sm:$0xff] %v1667_v20  ;;  %v1515_v23 = vpop.f32.mrb[4].mxu0  ;;  %v1324_v25 = vpop.f32.mrb[5].mxu1 }
 0x231   : > { %v1516_v24 = vadd.f32 %v1515_v23, %v1322_v21  ;;  %v1517_v27 = vpop.f32.mrb[5].mxu0  ;;  %v1326_v29 = vpop.f32.mrb[6].mxu1 }
 0x232   : > { %v1518_v28 = vadd.f32 %v1517_v27, %v1324_v25  ;;  %v1519_v31 = vpop.f32.mrb[6].mxu0  ;;  %v1328_v34 = vpop.f32.mrb[7].mxu1 }
 0x233   : > { %v1668_v32 = vadd.f32 %v1516_v24, %v450_v22  ;;  %v1520_v33 = vadd.f32 %v1519_v31, %v1326_v29  ;;  %v1521_v36 = vpop.f32.mrb[7].mxu0  ;;  %v463_v22 = vld [vmem:[#allocation2 + $0x88] sm:$0xff]  ;;  %v465_v31 = vld [vmem:[#allocation2 + $0x98] sm:$0xff] }
 0x234   : > { %v1669_v37 = vadd.f32 %v1518_v28, %v451_v26  ;;  %v1522_v38 = vadd.f32 %v1521_v36, %v1328_v34  ;;  %v464_v26 = vld [vmem:[#allocation2 + $0x90] sm:$0xff] }
 0x235   : > { %1732 = vst [vmem:[#allocation2 + $0x20] sm:$0xff] %v1668_v32  ;;  %v1670_v39 = vadd.f32 %v1520_v33, %v452_v30 }
 0x236   : > { %1733 = vst [vmem:[#allocation2 + $0x28] sm:$0xff] %v1669_v37  ;;  %v1671_v40 = vadd.f32 %v1522_v38, %v453_v35  ;;  %v466_v38 = vld [vmem:[#allocation2 + $0xa0] sm:$0xff] }
 0x237   : > { %1734 = vst [vmem:[#allocation2 + $0x30] sm:$0xff] %v1670_v39  ;;  %v1332_v41 = vpop.f32.mrb[8].mxu1 }
 0x238   : > { %1735 = vst [vmem:[#allocation2 + $0x38] sm:$0xff] %v1671_v40  ;;  %v1525_v43 = vpop.f32.mrb[8].mxu0  ;;  %v1334_v45 = vpop.f32.mrb[9].mxu1 }
 0x239   : > { %v1526_v44 = vadd.f32 %v1525_v43, %v1332_v41  ;;  %v1527_v47 = vpop.f32.mrb[9].mxu0  ;;  %v1336_v49 = vpop.f32.mrb[10].mxu1 }
 0x23a   : > { %v1528_v48 = vadd.f32 %v1527_v47, %v1334_v45  ;;  %v1529_v51 = vpop.f32.mrb[10].mxu0  ;;  %v1338_v54 = vpop.f32.mrb[11].mxu1 }
 0x23b   : > { %v1672_v52 = vadd.f32 %v1526_v44, %v454_v42  ;;  %v1530_v53 = vadd.f32 %v1529_v51, %v1336_v49  ;;  %v1531_v56 = vpop.f32.mrb[11].mxu0  ;;  %v467_v42 = vld [vmem:[#allocation2 + $0xa8] sm:$0xff]  ;;  %v469_v51 = vld [vmem:[#allocation2 + $0xb8] sm:$0xff] }
 0x23c   : > { %v1673_v57 = vadd.f32 %v1528_v48, %v455_v46  ;;  %v1532_v58 = vadd.f32 %v1531_v56, %v1338_v54  ;;  %v468_v46 = vld [vmem:[#allocation2 + $0xb0] sm:$0xff] }
 0x23d   : > { %1736 = vst [vmem:[#allocation2 + $0x40] sm:$0xff] %v1672_v52  ;;  %v1674_v59 = vadd.f32 %v1530_v53, %v456_v50 }
 0x23e   : > { %1737 = vst [vmem:[#allocation2 + $0x48] sm:$0xff] %v1673_v57  ;;  %v1675_v60 = vadd.f32 %v1532_v58, %v457_v55  ;;  %v470_v58 = vld [vmem:[#allocation2 + $0xc0] sm:$0xff] }
 0x23f   : > { %1738 = vst [vmem:[#allocation2 + $0x50] sm:$0xff] %v1674_v59  ;;  %v1342_v61 = vpop.f32.mrb[12].mxu1 }
 0x240   : > { %1739 = vst [vmem:[#allocation2 + $0x58] sm:$0xff] %v1675_v60  ;;  %v1535_v63 = vpop.f32.mrb[12].mxu0  ;;  %v1344_v1 = vpop.f32.mrb[13].mxu1 }
 0x241   : > { %v1536_v0 = vadd.f32 %v1535_v63, %v1342_v61  ;;  %v1537_v3 = vpop.f32.mrb[13].mxu0  ;;  %v1346_v5 = vpop.f32.mrb[14].mxu1 }
 0x242   : > { %v1538_v4 = vadd.f32 %v1537_v3, %v1344_v1  ;;  %v1539_v7 = vpop.f32.mrb[14].mxu0  ;;  %v1348_v10 = vpop.f32.mrb[15].mxu1 }
 0x243   : > { %v1676_v8 = vadd.f32 %v1536_v0, %v458_v62  ;;  %v1540_v9 = vadd.f32 %v1539_v7, %v1346_v5  ;;  %v1541_v12 = vpop.f32.mrb[15].mxu0  ;;  %v471_v62 = vld [vmem:[#allocation2 + $0xc8] sm:$0xff]  ;;  %v473_v7 = vld [vmem:[#allocation2 + $0xd8] sm:$0xff] }
 0x244   : > { %v1677_v13 = vadd.f32 %v1538_v4, %v459_v2  ;;  %v1542_v14 = vadd.f32 %v1541_v12, %v1348_v10  ;;  %v472_v2 = vld [vmem:[#allocation2 + $0xd0] sm:$0xff] }
 0x245   : > { %1740 = vst [vmem:[#allocation2 + $0x60] sm:$0xff] %v1676_v8  ;;  %v1678_v15 = vadd.f32 %v1540_v9, %v460_v6 }
 0x246   : > { %1741 = vst [vmem:[#allocation2 + $0x68] sm:$0xff] %v1677_v13  ;;  %v1679_v16 = vadd.f32 %v1542_v14, %v461_v11  ;;  %v474_v14 = vld [vmem:[#allocation2 + $0xe0] sm:$0xff] }
 0x247   : > { %1742 = vst [vmem:[#allocation2 + $0x70] sm:$0xff] %v1678_v15  ;;  %v1352_v17 = vpop.f32.mrb[16].mxu1 }
 0x248   : > { %1743 = vst [vmem:[#allocation2 + $0x78] sm:$0xff] %v1679_v16  ;;  %v1545_v19 = vpop.f32.mrb[16].mxu0  ;;  %v1354_v21 = vpop.f32.mrb[17].mxu1 }
 0x249   : > { %v1546_v20 = vadd.f32 %v1545_v19, %v1352_v17  ;;  %v1547_v23 = vpop.f32.mrb[17].mxu0  ;;  %v1356_v25 = vpop.f32.mrb[18].mxu1 }
 0x24a   : > { %v1548_v24 = vadd.f32 %v1547_v23, %v1354_v21  ;;  %v1549_v27 = vpop.f32.mrb[18].mxu0  ;;  %v1358_v30 = vpop.f32.mrb[19].mxu1 }
 0x24b   : > { %v1680_v28 = vadd.f32 %v1546_v20, %v462_v18  ;;  %v1550_v29 = vadd.f32 %v1549_v27, %v1356_v25  ;;  %v1551_v32 = vpop.f32.mrb[19].mxu0  ;;  %v475_v18 = vld [vmem:[#allocation2 + $0xe8] sm:$0xff]  ;;  %v477_v27 = vld [vmem:[#allocation2 + $0xf8] sm:$0xff] }
 0x24c   : > { %v1681_v33 = vadd.f32 %v1548_v24, %v463_v22  ;;  %v1552_v34 = vadd.f32 %v1551_v32, %v1358_v30  ;;  %v476_v22 = vld [vmem:[#allocation2 + $0xf0] sm:$0xff] }
 0x24d   : > { %1744 = vst [vmem:[#allocation2 + $0x80] sm:$0xff] %v1680_v28  ;;  %v1682_v35 = vadd.f32 %v1550_v29, %v464_v26 }
 0x24e   : > { %1745 = vst [vmem:[#allocation2 + $0x88] sm:$0xff] %v1681_v33  ;;  %v1683_v36 = vadd.f32 %v1552_v34, %v465_v31  ;;  %v478_v34 = vld [vmem:[#allocation2 + $0x100] sm:$0xff] }
 0x24f   : > { %1746 = vst [vmem:[#allocation2 + $0x90] sm:$0xff] %v1682_v35  ;;  %v1362_v37 = vpop.f32.mrb[20].mxu1 }
 0x250   : > { %1747 = vst [vmem:[#allocation2 + $0x98] sm:$0xff] %v1683_v36  ;;  %v1555_v39 = vpop.f32.mrb[20].mxu0  ;;  %v1364_v41 = vpop.f32.mrb[21].mxu1 }
 0x251   : > { %v1556_v40 = vadd.f32 %v1555_v39, %v1362_v37  ;;  %v1557_v43 = vpop.f32.mrb[21].mxu0  ;;  %v1366_v45 = vpop.f32.mrb[22].mxu1 }
 0x252   : > { %v1558_v44 = vadd.f32 %v1557_v43, %v1364_v41  ;;  %v1559_v47 = vpop.f32.mrb[22].mxu0  ;;  %v1368_v50 = vpop.f32.mrb[23].mxu1 }
 0x253   : > { %v1684_v48 = vadd.f32 %v1556_v40, %v466_v38  ;;  %v1560_v49 = vadd.f32 %v1559_v47, %v1366_v45  ;;  %v1561_v52 = vpop.f32.mrb[23].mxu0  ;;  %v479_v38 = vld [vmem:[#allocation2 + $0x108] sm:$0xff]  ;;  %v481_v47 = vld [vmem:[#allocation2 + $0x118] sm:$0xff] }
 0x254   : > { %v1685_v53 = vadd.f32 %v1558_v44, %v467_v42  ;;  %v1562_v54 = vadd.f32 %v1561_v52, %v1368_v50  ;;  %v480_v42 = vld [vmem:[#allocation2 + $0x110] sm:$0xff] }
 0x255   : > { %1748 = vst [vmem:[#allocation2 + $0xa0] sm:$0xff] %v1684_v48  ;;  %v1686_v55 = vadd.f32 %v1560_v49, %v468_v46 }
 0x256   : > { %1749 = vst [vmem:[#allocation2 + $0xa8] sm:$0xff] %v1685_v53  ;;  %v1687_v56 = vadd.f32 %v1562_v54, %v469_v51  ;;  %v482_v54 = vld [vmem:[#allocation2 + $0x120] sm:$0xff] }
 0x257   : > { %1750 = vst [vmem:[#allocation2 + $0xb0] sm:$0xff] %v1686_v55  ;;  %v1372_v57 = vpop.f32.mrb[24].mxu1 }
 0x258   : > { %1751 = vst [vmem:[#allocation2 + $0xb8] sm:$0xff] %v1687_v56  ;;  %v1565_v59 = vpop.f32.mrb[24].mxu0  ;;  %v1374_v61 = vpop.f32.mrb[25].mxu1 }
 0x259   : > { %v1566_v60 = vadd.f32 %v1565_v59, %v1372_v57  ;;  %v1567_v63 = vpop.f32.mrb[25].mxu0  ;;  %v1376_v1 = vpop.f32.mrb[26].mxu1 }
 0x25a   : > { %v1568_v0 = vadd.f32 %v1567_v63, %v1374_v61  ;;  %v1569_v3 = vpop.f32.mrb[26].mxu0  ;;  %v1378_v6 = vpop.f32.mrb[27].mxu1 }
 0x25b   : > { %v1688_v4 = vadd.f32 %v1566_v60, %v470_v58  ;;  %v1570_v5 = vadd.f32 %v1569_v3, %v1376_v1  ;;  %v1571_v8 = vpop.f32.mrb[27].mxu0  ;;  %v483_v58 = vld [vmem:[#allocation2 + $0x128] sm:$0xff]  ;;  %v485_v3 = vld [vmem:[#allocation2 + $0x138] sm:$0xff] }
 0x25c   : > { %v1689_v9 = vadd.f32 %v1568_v0, %v471_v62  ;;  %v1572_v10 = vadd.f32 %v1571_v8, %v1378_v6  ;;  %v484_v62 = vld [vmem:[#allocation2 + $0x130] sm:$0xff] }
 0x25d   : > { %1752 = vst [vmem:[#allocation2 + $0xc0] sm:$0xff] %v1688_v4  ;;  %v1690_v11 = vadd.f32 %v1570_v5, %v472_v2 }
 0x25e   : > { %1753 = vst [vmem:[#allocation2 + $0xc8] sm:$0xff] %v1689_v9  ;;  %v1691_v12 = vadd.f32 %v1572_v10, %v473_v7  ;;  %v486_v10 = vld [vmem:[#allocation2 + $0x140] sm:$0xff] }
 0x25f   : > { %1754 = vst [vmem:[#allocation2 + $0xd0] sm:$0xff] %v1690_v11  ;;  %v1382_v13 = vpop.f32.mrb[28].mxu1 }
 0x260   : > { %1755 = vst [vmem:[#allocation2 + $0xd8] sm:$0xff] %v1691_v12  ;;  %v1575_v15 = vpop.f32.mrb[28].mxu0  ;;  %v1384_v17 = vpop.f32.mrb[29].mxu1 }
 0x261   : > { %v1576_v16 = vadd.f32 %v1575_v15, %v1382_v13  ;;  %v1577_v19 = vpop.f32.mrb[29].mxu0  ;;  %v1386_v21 = vpop.f32.mrb[30].mxu1 }
 0x262   : > { %v1578_v20 = vadd.f32 %v1577_v19, %v1384_v17  ;;  %v1579_v23 = vpop.f32.mrb[30].mxu0  ;;  %v1388_v26 = vpop.f32.mrb[31].mxu1 }
 0x263   : > { %v1692_v24 = vadd.f32 %v1576_v16, %v474_v14  ;;  %v1580_v25 = vadd.f32 %v1579_v23, %v1386_v21  ;;  %v1581_v28 = vpop.f32.mrb[31].mxu0  ;;  %v487_v14 = vld [vmem:[#allocation2 + $0x148] sm:$0xff]  ;;  %v489_v23 = vld [vmem:[#allocation2 + $0x158] sm:$0xff] }
 0x264   : > { %v1693_v29 = vadd.f32 %v1578_v20, %v475_v18  ;;  %v1582_v30 = vadd.f32 %v1581_v28, %v1388_v26  ;;  %v488_v18 = vld [vmem:[#allocation2 + $0x150] sm:$0xff] }
 0x265   : > { %1756 = vst [vmem:[#allocation2 + $0xe0] sm:$0xff] %v1692_v24  ;;  %v1694_v31 = vadd.f32 %v1580_v25, %v476_v22 }
 0x266   : > { %1757 = vst [vmem:[#allocation2 + $0xe8] sm:$0xff] %v1693_v29  ;;  %v1695_v32 = vadd.f32 %v1582_v30, %v477_v27  ;;  %v490_v30 = vld [vmem:[#allocation2 + $0x160] sm:$0xff] }
 0x267   : > { %1758 = vst [vmem:[#allocation2 + $0xf0] sm:$0xff] %v1694_v31  ;;  %v1392_v33 = vpop.f32.mrb[32].mxu1 }
 0x268   : > { %1759 = vst [vmem:[#allocation2 + $0xf8] sm:$0xff] %v1695_v32  ;;  %v1585_v35 = vpop.f32.mrb[32].mxu0  ;;  %v1394_v37 = vpop.f32.mrb[33].mxu1 }
 0x269   : > { %v1586_v36 = vadd.f32 %v1585_v35, %v1392_v33  ;;  %v1587_v39 = vpop.f32.mrb[33].mxu0  ;;  %v1396_v41 = vpop.f32.mrb[34].mxu1 }
 0x26a   : > { %v1588_v40 = vadd.f32 %v1587_v39, %v1394_v37  ;;  %v1589_v43 = vpop.f32.mrb[34].mxu0  ;;  %v1398_v46 = vpop.f32.mrb[35].mxu1 }
 0x26b   : > { %v1696_v44 = vadd.f32 %v1586_v36, %v478_v34  ;;  %v1590_v45 = vadd.f32 %v1589_v43, %v1396_v41  ;;  %v1591_v48 = vpop.f32.mrb[35].mxu0  ;;  %v491_v34 = vld [vmem:[#allocation2 + $0x168] sm:$0xff]  ;;  %v493_v43 = vld [vmem:[#allocation2 + $0x178] sm:$0xff] }
 0x26c   : > { %v1697_v49 = vadd.f32 %v1588_v40, %v479_v38  ;;  %v1592_v50 = vadd.f32 %v1591_v48, %v1398_v46  ;;  %v492_v38 = vld [vmem:[#allocation2 + $0x170] sm:$0xff] }
 0x26d   : > { %1760 = vst [vmem:[#allocation2 + $0x100] sm:$0xff] %v1696_v44  ;;  %v1698_v51 = vadd.f32 %v1590_v45, %v480_v42 }
 0x26e   : > { %1761 = vst [vmem:[#allocation2 + $0x108] sm:$0xff] %v1697_v49  ;;  %v1699_v52 = vadd.f32 %v1592_v50, %v481_v47  ;;  %v494_v50 = vld [vmem:[#allocation2 + $0x180] sm:$0xff] }
 0x26f   : > { %1762 = vst [vmem:[#allocation2 + $0x110] sm:$0xff] %v1698_v51  ;;  %v1402_v53 = vpop.f32.mrb[36].mxu1 }
 0x270   : > { %1763 = vst [vmem:[#allocation2 + $0x118] sm:$0xff] %v1699_v52  ;;  %v1595_v55 = vpop.f32.mrb[36].mxu0  ;;  %v1404_v57 = vpop.f32.mrb[37].mxu1 }
 0x271   : > { %v1596_v56 = vadd.f32 %v1595_v55, %v1402_v53  ;;  %v1597_v59 = vpop.f32.mrb[37].mxu0  ;;  %v1406_v61 = vpop.f32.mrb[38].mxu1 }
 0x272   : > { %v1598_v60 = vadd.f32 %v1597_v59, %v1404_v57  ;;  %v1599_v63 = vpop.f32.mrb[38].mxu0  ;;  %v1408_v2 = vpop.f32.mrb[39].mxu1 }
 0x273   : > { %v1700_v0 = vadd.f32 %v1596_v56, %v482_v54  ;;  %v1600_v1 = vadd.f32 %v1599_v63, %v1406_v61  ;;  %v1601_v4 = vpop.f32.mrb[39].mxu0  ;;  %v495_v54 = vld [vmem:[#allocation2 + $0x188] sm:$0xff]  ;;  %v497_v63 = vld [vmem:[#allocation2 + $0x198] sm:$0xff] }
 0x274   : > { %v1701_v5 = vadd.f32 %v1598_v60, %v483_v58  ;;  %v1602_v6 = vadd.f32 %v1601_v4, %v1408_v2  ;;  %v496_v58 = vld [vmem:[#allocation2 + $0x190] sm:$0xff] }
 0x275   : > { %1764 = vst [vmem:[#allocation2 + $0x120] sm:$0xff] %v1700_v0  ;;  %v1702_v7 = vadd.f32 %v1600_v1, %v484_v62 }
 0x276   : > { %1765 = vst [vmem:[#allocation2 + $0x128] sm:$0xff] %v1701_v5  ;;  %v1703_v8 = vadd.f32 %v1602_v6, %v485_v3  ;;  %v498_v6 = vld [vmem:[#allocation2 + $0x1a0] sm:$0xff] }
 0x277   : > { %1766 = vst [vmem:[#allocation2 + $0x130] sm:$0xff] %v1702_v7  ;;  %v1412_v9 = vpop.f32.mrb[40].mxu1 }
 0x278   : > { %1767 = vst [vmem:[#allocation2 + $0x138] sm:$0xff] %v1703_v8  ;;  %v1605_v11 = vpop.f32.mrb[40].mxu0  ;;  %v1414_v13 = vpop.f32.mrb[41].mxu1 }
 0x279   : > { %v1606_v12 = vadd.f32 %v1605_v11, %v1412_v9  ;;  %v1607_v15 = vpop.f32.mrb[41].mxu0  ;;  %v1416_v17 = vpop.f32.mrb[42].mxu1 }
 0x27a   : > { %v1608_v16 = vadd.f32 %v1607_v15, %v1414_v13  ;;  %v1609_v19 = vpop.f32.mrb[42].mxu0  ;;  %v1418_v22 = vpop.f32.mrb[43].mxu1 }
 0x27b   : > { %v1704_v20 = vadd.f32 %v1606_v12, %v486_v10  ;;  %v1610_v21 = vadd.f32 %v1609_v19, %v1416_v17  ;;  %v1611_v24 = vpop.f32.mrb[43].mxu0  ;;  %v499_v10 = vld [vmem:[#allocation2 + $0x1a8] sm:$0xff]  ;;  %v501_v19 = vld [vmem:[#allocation2 + $0x1b8] sm:$0xff] }
 0x27c   : > { %v1705_v25 = vadd.f32 %v1608_v16, %v487_v14  ;;  %v1612_v26 = vadd.f32 %v1611_v24, %v1418_v22  ;;  %v500_v14 = vld [vmem:[#allocation2 + $0x1b0] sm:$0xff] }
 0x27d   : > { %1768 = vst [vmem:[#allocation2 + $0x140] sm:$0xff] %v1704_v20  ;;  %v1706_v27 = vadd.f32 %v1610_v21, %v488_v18 }
 0x27e   : > { %1769 = vst [vmem:[#allocation2 + $0x148] sm:$0xff] %v1705_v25  ;;  %v1707_v28 = vadd.f32 %v1612_v26, %v489_v23  ;;  %v502_v26 = vld [vmem:[#allocation2 + $0x1c0] sm:$0xff] }
 0x27f   : > { %1770 = vst [vmem:[#allocation2 + $0x150] sm:$0xff] %v1706_v27  ;;  %v1422_v29 = vpop.f32.mrb[44].mxu1 }
 0x280   : > { %1771 = vst [vmem:[#allocation2 + $0x158] sm:$0xff] %v1707_v28  ;;  %v1615_v31 = vpop.f32.mrb[44].mxu0  ;;  %v1424_v33 = vpop.f32.mrb[45].mxu1 }
 0x281   : > { %v1616_v32 = vadd.f32 %v1615_v31, %v1422_v29  ;;  %v1617_v35 = vpop.f32.mrb[45].mxu0  ;;  %v1426_v37 = vpop.f32.mrb[46].mxu1 }
 0x282   : > { %v1618_v36 = vadd.f32 %v1617_v35, %v1424_v33  ;;  %v1619_v39 = vpop.f32.mrb[46].mxu0  ;;  %v1428_v42 = vpop.f32.mrb[47].mxu1 }
 0x283   : > { %v1708_v40 = vadd.f32 %v1616_v32, %v490_v30  ;;  %v1620_v41 = vadd.f32 %v1619_v39, %v1426_v37  ;;  %v1621_v44 = vpop.f32.mrb[47].mxu0  ;;  %v503_v30 = vld [vmem:[#allocation2 + $0x1c8] sm:$0xff]  ;;  %v505_v39 = vld [vmem:[#allocation2 + $0x1d8] sm:$0xff] }
 0x284   : > { %v1709_v45 = vadd.f32 %v1618_v36, %v491_v34  ;;  %v1622_v46 = vadd.f32 %v1621_v44, %v1428_v42  ;;  %v504_v34 = vld [vmem:[#allocation2 + $0x1d0] sm:$0xff] }
 0x285   : > { %1772 = vst [vmem:[#allocation2 + $0x160] sm:$0xff] %v1708_v40  ;;  %v1710_v47 = vadd.f32 %v1620_v41, %v492_v38 }
 0x286   : > { %1773 = vst [vmem:[#allocation2 + $0x168] sm:$0xff] %v1709_v45  ;;  %v1711_v48 = vadd.f32 %v1622_v46, %v493_v43  ;;  %v506_v46 = vld [vmem:[#allocation2 + $0x1e0] sm:$0xff] }
 0x287   : > { %1774 = vst [vmem:[#allocation2 + $0x170] sm:$0xff] %v1710_v47  ;;  %v1432_v49 = vpop.f32.mrb[48].mxu1 }
 0x288   : > { %1775 = vst [vmem:[#allocation2 + $0x178] sm:$0xff] %v1711_v48  ;;  %v1625_v51 = vpop.f32.mrb[48].mxu0  ;;  %v1434_v53 = vpop.f32.mrb[49].mxu1 }
 0x289   : > { %v1626_v52 = vadd.f32 %v1625_v51, %v1432_v49  ;;  %v1627_v55 = vpop.f32.mrb[49].mxu0  ;;  %v1436_v57 = vpop.f32.mrb[50].mxu1 }
 0x28a   : > { %v1628_v56 = vadd.f32 %v1627_v55, %v1434_v53  ;;  %v1629_v59 = vpop.f32.mrb[50].mxu0  ;;  %v1438_v62 = vpop.f32.mrb[51].mxu1 }
 0x28b   : > { %v1712_v60 = vadd.f32 %v1626_v52, %v494_v50  ;;  %v1630_v61 = vadd.f32 %v1629_v59, %v1436_v57  ;;  %v1631_v0 = vpop.f32.mrb[51].mxu0  ;;  %v507_v50 = vld [vmem:[#allocation2 + $0x1e8] sm:$0xff]  ;;  %v509_v59 = vld [vmem:[#allocation2 + $0x1f8] sm:$0xff] }
 0x28c   : > { %v1713_v1 = vadd.f32 %v1628_v56, %v495_v54  ;;  %v1632_v2 = vadd.f32 %v1631_v0, %v1438_v62  ;;  %v508_v54 = vld [vmem:[#allocation2 + $0x1f0] sm:$0xff] }
 0x28d   : > { %1776 = vst [vmem:[#allocation2 + $0x180] sm:$0xff] %v1712_v60  ;;  %v1714_v3 = vadd.f32 %v1630_v61, %v496_v58 }
 0x28e   : > { %1777 = vst [vmem:[#allocation2 + $0x188] sm:$0xff] %v1713_v1  ;;  %v1715_v4 = vadd.f32 %v1632_v2, %v497_v63 }
 0x28f   : > { %1778 = vst [vmem:[#allocation2 + $0x190] sm:$0xff] %v1714_v3  ;;  %v1442_v5 = vpop.f32.mrb[52].mxu1 }
 0x290   : > { %1779 = vst [vmem:[#allocation2 + $0x198] sm:$0xff] %v1715_v4  ;;  %v1635_v7 = vpop.f32.mrb[52].mxu0  ;;  %v1444_v9 = vpop.f32.mrb[53].mxu1 }
 0x291   : > { %v1636_v8 = vadd.f32 %v1635_v7, %v1442_v5  ;;  %v1637_v11 = vpop.f32.mrb[53].mxu0  ;;  %v1446_v13 = vpop.f32.mrb[54].mxu1 }
 0x292   : > { %v1638_v12 = vadd.f32 %v1637_v11, %v1444_v9  ;;  %v1639_v15 = vpop.f32.mrb[54].mxu0  ;;  %v1448_v18 = vpop.f32.mrb[55].mxu1 }
 0x293   : > { %v1716_v16 = vadd.f32 %v1636_v8, %v498_v6  ;;  %v1640_v17 = vadd.f32 %v1639_v15, %v1446_v13  ;;  %v1641_v20 = vpop.f32.mrb[55].mxu0 }
 0x294   : > { %v1717_v21 = vadd.f32 %v1638_v12, %v499_v10  ;;  %v1642_v22 = vadd.f32 %v1641_v20, %v1448_v18 }
 0x295   : > { %1780 = vst [vmem:[#allocation2 + $0x1a0] sm:$0xff] %v1716_v16  ;;  %v1718_v23 = vadd.f32 %v1640_v17, %v500_v14 }
 0x296   : > { %1781 = vst [vmem:[#allocation2 + $0x1a8] sm:$0xff] %v1717_v21  ;;  %v1719_v24 = vadd.f32 %v1642_v22, %v501_v19 }
 0x297   : > { %1782 = vst [vmem:[#allocation2 + $0x1b0] sm:$0xff] %v1718_v23  ;;  %v1452_v25 = vpop.f32.mrb[56].mxu1 }
 0x298   : > { %1783 = vst [vmem:[#allocation2 + $0x1b8] sm:$0xff] %v1719_v24  ;;  %v1645_v27 = vpop.f32.mrb[56].mxu0  ;;  %v1454_v29 = vpop.f32.mrb[57].mxu1 }
 0x299   : > { %v1646_v28 = vadd.f32 %v1645_v27, %v1452_v25  ;;  %v1647_v31 = vpop.f32.mrb[57].mxu0  ;;  %v1456_v33 = vpop.f32.mrb[58].mxu1 }
 0x29a   : > { %v1648_v32 = vadd.f32 %v1647_v31, %v1454_v29  ;;  %v1649_v35 = vpop.f32.mrb[58].mxu0  ;;  %v1458_v38 = vpop.f32.mrb[59].mxu1 }
 0x29b   : > { %v1720_v36 = vadd.f32 %v1646_v28, %v502_v26  ;;  %v1650_v37 = vadd.f32 %v1649_v35, %v1456_v33  ;;  %v1651_v40 = vpop.f32.mrb[59].mxu0 }
 0x29c   : > { %v1721_v41 = vadd.f32 %v1648_v32, %v503_v30  ;;  %v1652_v42 = vadd.f32 %v1651_v40, %v1458_v38 }
 0x29d   : > { %1784 = vst [vmem:[#allocation2 + $0x1c0] sm:$0xff] %v1720_v36  ;;  %v1722_v43 = vadd.f32 %v1650_v37, %v504_v34 }
 0x29e   : > { %1785 = vst [vmem:[#allocation2 + $0x1c8] sm:$0xff] %v1721_v41  ;;  %v1723_v44 = vadd.f32 %v1652_v42, %v505_v39 }
 0x29f   : > { %1786 = vst [vmem:[#allocation2 + $0x1d0] sm:$0xff] %v1722_v43  ;;  %v1462_v45 = vpop.f32.mrb[60].mxu1 }
 0x2a0   : > { %1787 = vst [vmem:[#allocation2 + $0x1d8] sm:$0xff] %v1723_v44  ;;  %v1655_v47 = vpop.f32.mrb[60].mxu0  ;;  %v1464_v49 = vpop.f32.mrb[61].mxu1 }
 0x2a1   : > { %v1656_v48 = vadd.f32 %v1655_v47, %v1462_v45  ;;  %v1657_v51 = vpop.f32.mrb[61].mxu0  ;;  %v1466_v53 = vpop.f32.mrb[62].mxu1 }
 0x2a2   : > { %v1658_v52 = vadd.f32 %v1657_v51, %v1464_v49  ;;  %v1659_v55 = vpop.f32.mrb[62].mxu0  ;;  %v1468_v58 = vpop.f32.mrb[63].mxu1 }
 0x2a3   : > { %v1724_v56 = vadd.f32 %v1656_v48, %v506_v46  ;;  %v1660_v57 = vadd.f32 %v1659_v55, %v1466_v53  ;;  %v1661_v60 = vpop.f32.mrb[63].mxu0 }
 0x2a4   : > { %v1725_v61 = vadd.f32 %v1658_v52, %v507_v50  ;;  %v1662_v62 = vadd.f32 %v1661_v60, %v1468_v58 }
 0x2a5   : > { %1788 = vst [vmem:[#allocation2 + $0x1e0] sm:$0xff] %v1724_v56  ;;  %v1726_v63 = vadd.f32 %v1660_v57, %v508_v54 }
 0x2a6   : > { %1789 = vst [vmem:[#allocation2 + $0x1e8] sm:$0xff] %v1725_v61  ;;  %v1727_v0 = vadd.f32 %v1662_v62, %v509_v59 }
 0x2a7   : > { %1790 = vst [vmem:[#allocation2 + $0x1f0] sm:$0xff] %v1726_v63 }
 0x2a8   : > { %1791 = vst [vmem:[#allocation2 + $0x1f8] sm:$0xff] %v1727_v0 }
 0x2a9 PF: > { %1793 = sbr.rel (!%p373_p9) target bundleno = 985 (0x3d9), region = 56 }
 0x2b0   : > { %v1862_v1 = vld [vmem:[%s4907_s25 + $0x10] sm:$0xff]  ;;  %v1860_v2 = vld [vmem:[%s4907_s25] sm:$0xff]  ;;  %v4438_v3 = vmov 0   ;;  %v1863_v4 = vld [vmem:[%s4907_s25 + $0x18] sm:$0xff]  ;;  %s6228_s22 = sld [smem:[#allocation31_spill]] }
 0x2b1   : > { %4065 = vset.pattern.permute.xlu1 %v4438_v3  ;;  %4064 = vset.pattern.permute.xlu0 %v4438_v3  ;;  %v1861_v5 = vld [vmem:[%s4907_s25 + $0x8] sm:$0xff]  ;;  %v1864_v7 = vld [vmem:[%s4907_s25 + $0x20] sm:$0xff]  ;;  %v1867_v8 = vld [vmem:[%s4907_s25 + $0x38] sm:$0xff] }
 0x2b2   : > { %1904 = vperm.xlu1 %4065, %v1862_v1   ;;  %1894 = vperm.xlu0 %4064, %v1860_v2   ;;  %v1865_v6 = vld [vmem:[%s4907_s25 + $0x28] sm:$0xff]  ;;  %v1866_v9 = vld [vmem:[%s4907_s25 + $0x30] sm:$0xff]  ;;  %v1868_v11 = vld [vmem:[%s4907_s25 + $0x40] sm:$0xff] }
 0x2b3   : > { %v1869_v10 = vld [vmem:[%s4907_s25 + $0x48] sm:$0xff]  ;;  %v1871_v12 = vld [vmem:[%s4907_s25 + $0x58] sm:$0xff]  ;;  %v1870_v13 = vld [vmem:[%s4907_s25 + $0x50] sm:$0xff] }
 0x2b4   : > { %v1873_v14 = vld [vmem:[%s4907_s25 + $0x68] sm:$0xff]  ;;  %v1872_v15 = vld [vmem:[%s4907_s25 + $0x60] sm:$0xff]  ;;  %v1875_v16 = vld [vmem:[%s4907_s25 + $0x78] sm:$0xff] }
 0x2b5   : > { %v1874_v17 = vld [vmem:[%s4907_s25 + $0x70] sm:$0xff]  ;;  %v1877_v18 = vld [vmem:[%s4907_s25 + $0x88] sm:$0xff]  ;;  %v1876_v19 = vld [vmem:[%s4907_s25 + $0x80] sm:$0xff] }
 0x2b6   : > { %1909 = vperm.xlu1 %4065, %v1863_v4   ;;  %1899 = vperm.xlu0 %4064, %v1861_v5   ;;  %v1879_v20 = vld [vmem:[%s4907_s25 + $0x98] sm:$0xff]  ;;  %v1878_v21 = vld [vmem:[%s4907_s25 + $0x90] sm:$0xff]  ;;  %v1881_v22 = vld [vmem:[%s4907_s25 + $0xa8] sm:$0xff]  ;;  %s1794_s24 = sld [smem:[#allocation5 + %s6228_s22]] }
 0x2b7   : > { %v1880_v23 = vld [vmem:[%s4907_s25 + $0xa0] sm:$0xff]  ;;  %v1883_v24 = vld [vmem:[%s4907_s25 + $0xb8] sm:$0xff]  ;;  %v1882_v25 = vld [vmem:[%s4907_s25 + $0xb0] sm:$0xff] }
 0x2b8   : > { %v1885_v26 = vld [vmem:[%s4907_s25 + $0xc8] sm:$0xff]  ;;  %v1884_v27 = vld [vmem:[%s4907_s25 + $0xc0] sm:$0xff]  ;;  %v1887_v28 = vld [vmem:[%s4907_s25 + $0xd8] sm:$0xff] }
 0x2b9   : > { %v1886_v29 = vld [vmem:[%s4907_s25 + $0xd0] sm:$0xff]  ;;  %v1889_v30 = vld [vmem:[%s4907_s25 + $0xe8] sm:$0xff]  ;;  %v1888_v31 = vld [vmem:[%s4907_s25 + $0xe0] sm:$0xff] }
 0x2ba   : > { %1919 = vperm.xlu1 %4065, %v1865_v6   ;;  %1914 = vperm.xlu0 %4064, %v1864_v7   ;;  %v1891_v32 = vld [vmem:[%s4907_s25 + $0xf8] sm:$0xff]  ;;  %v1890_v33 = vld [vmem:[%s4907_s25 + $0xf0] sm:$0xff]  ;;  %v1800_v34 = vld [vmem:[#allocation2 + $0x20] sm:$0xff] }
 0x2bb   : > { %v1801_v35 = vld [vmem:[#allocation2 + $0x28] sm:$0xff]  ;;  %v1796_v36 = vld [vmem:[#allocation2] sm:$0xff]  ;;  %v1802_v44 = vld [vmem:[#allocation2 + $0x30] sm:$0xff] }
 0x2bc   : > { %s5157_s14 = sshll.u32 %s1794_s24, 8  ;;  %v1797_v37 = vld [vmem:[#allocation2 + $0x8] sm:$0xff]  ;;  %v1803_v45 = vld [vmem:[#allocation2 + $0x38] sm:$0xff]  ;;  %v1798_v46 = vld [vmem:[#allocation2 + $0x10] sm:$0xff] }
 0x2bd   : > { %s2117_s11 = sadd.s32 256, %s5157_s14  ;;  %p2116_p12 = scmp.eq.s32.totalorder %s4915_s26, %s5157_s14  ;;  %v1799_v47 = vld [vmem:[#allocation2 + $0x18] sm:$0xff]  ;;  %v1806_v54 = vld [vmem:[#allocation2 + $0x50] sm:$0xff]  ;;  %v1804_v56 = vld [vmem:[#allocation2 + $0x40] sm:$0xff] }
 0x2be   : > { %1929 = vperm.xlu1 %4065, %v1867_v8   ;;  %1924 = vperm.xlu0 %4064, %v1866_v9   ;;  %p2118_p3 = scmp.eq.s32.totalorder %s4918_s13, %s2117_s11  ;;  %v1807_v55 = vld [vmem:[#allocation2 + $0x58] sm:$0xff]  ;;  %v1805_v57 = vld [vmem:[#allocation2 + $0x48] sm:$0xff]  ;;  %v1810_v0 = vld [vmem:[#allocation2 + $0x70] sm:$0xff] }
 0x2bf   : > { %v1811_v1 = vld [vmem:[#allocation2 + $0x78] sm:$0xff]  ;;  %v1808_v2 = vld [vmem:[#allocation2 + $0x60] sm:$0xff]  ;;  %v1809_v3 = vld [vmem:[#allocation2 + $0x68] sm:$0xff] }
 0x2c0   : > { %p5165_p1 = pnand %p2118_p3, %p2116_p12 }
 0x2c2   : > { %1939 = vperm.xlu1 %4065, %v1869_v10   ;;  %1934 = vperm.xlu0 %4064, %v1868_v11   ;;  %v1814_v10 = vld [vmem:[#allocation2 + $0x90] sm:$0xff]  ;;  %v1815_v11 = vld [vmem:[#allocation2 + $0x98] sm:$0xff] }
 0x2c6   : > { %1949 = vperm.xlu1 %4065, %v1871_v12   ;;  %1944 = vperm.xlu0 %4064, %v1870_v13   ;;  %v1812_v12 = vld [vmem:[#allocation2 + $0x80] sm:$0xff]  ;;  %v1813_v13 = vld [vmem:[#allocation2 + $0x88] sm:$0xff] }
 0x2ca   : > { %1959 = vperm.xlu1 %4065, %v1873_v14   ;;  %1954 = vperm.xlu0 %4064, %v1872_v15  }
 0x2ce   : > { %1969 = vperm.xlu1 %4065, %v1875_v16   ;;  %1964 = vperm.xlu0 %4064, %v1874_v17  }
 0x2d2   : > { %1979 = vperm.xlu1 %4065, %v1877_v18   ;;  %1974 = vperm.xlu0 %4064, %v1876_v19  }
 0x2d6   : > { %1989 = vperm.xlu1 %4065, %v1879_v20   ;;  %1984 = vperm.xlu0 %4064, %v1878_v21   ;;  %v1818_v20 = vld [vmem:[#allocation2 + $0xb0] sm:$0xff]  ;;  %v1819_v21 = vld [vmem:[#allocation2 + $0xb8] sm:$0xff] }
 0x2da   : > { %1999 = vperm.xlu1 %4065, %v1881_v22   ;;  %1994 = vperm.xlu0 %4064, %v1880_v23   ;;  %v1816_v22 = vld [vmem:[#allocation2 + $0xa0] sm:$0xff]  ;;  %v1817_v23 = vld [vmem:[#allocation2 + $0xa8] sm:$0xff] }
 0x2de   : > { %2009 = vperm.xlu1 %4065, %v1883_v24   ;;  %2004 = vperm.xlu0 %4064, %v1882_v25  }
 0x2e2   : > { %2019 = vperm.xlu1 %4065, %v1885_v26   ;;  %2014 = vperm.xlu0 %4064, %v1884_v27  }
 0x2e6   : > { %2029 = vperm.xlu1 %4065, %v1887_v28   ;;  %2024 = vperm.xlu0 %4064, %v1886_v29  }
 0x2ea   : > { %2039 = vperm.xlu1 %4065, %v1889_v30   ;;  %2034 = vperm.xlu0 %4064, %v1888_v31   ;;  %v1822_v30 = vld [vmem:[#allocation2 + $0xd0] sm:$0xff]  ;;  %v1823_v31 = vld [vmem:[#allocation2 + $0xd8] sm:$0xff] }
 0x2ee   : > { %2049 = vperm.xlu1 %4065, %v1891_v32   ;;  %2044 = vperm.xlu0 %4064, %v1890_v33   ;;  %v1820_v32 = vld [vmem:[#allocation2 + $0xc0] sm:$0xff]  ;;  %v1821_v33 = vld [vmem:[#allocation2 + $0xc8] sm:$0xff] }
 0x331   : > { %v1905_v38 = vpop.permute.xlu1 %1904  ;;  %v1895_v39 = vpop.permute.xlu0 %1894 }
 0x332   : > { %v5169_v40 = vmul.f32 %v1905_v38, %v1800_v34  ;;  %v5171_v41 = vmul.f32 %v1905_v38, %v1801_v35  ;;  %v5173_v42 = vmul.f32 %v1895_v39, %v1796_v36  ;;  %v5175_v43 = vmul.f32 %v1895_v39, %v1797_v37 }
 0x335   : > { %v1910_v48 = vpop.permute.xlu1 %1909  ;;  %v1900_v49 = vpop.permute.xlu0 %1899 }
 0x336   : > { %v5177_v50 = vmul.f32 %v1910_v48, %v1802_v44  ;;  %v5179_v51 = vmul.f32 %v1910_v48, %v1803_v45  ;;  %v5181_v52 = vmul.f32 %v1900_v49, %v1798_v46  ;;  %v5183_v53 = vmul.f32 %v1900_v49, %v1799_v47  ;;  %v1826_v44 = vld [vmem:[#allocation2 + $0xf0] sm:$0xff]  ;;  %v1827_v45 = vld [vmem:[#allocation2 + $0xf8] sm:$0xff]  ;;  %v1824_v46 = vld [vmem:[#allocation2 + $0xe0] sm:$0xff] }
 0x337   : > { %v1825_v47 = vld [vmem:[#allocation2 + $0xe8] sm:$0xff] }
 0x339   : > { %v1920_v58 = vpop.permute.xlu1 %1919  ;;  %v1915_v59 = vpop.permute.xlu0 %1914 }
 0x33a   : > { %v5185_v60 = vmul.f32 %v1920_v58, %v1806_v54  ;;  %v5187_v61 = vmul.f32 %v1920_v58, %v1807_v55  ;;  %v5189_v62 = vmul.f32 %v1915_v59, %v1804_v56  ;;  %v5191_v63 = vmul.f32 %v1915_v59, %v1805_v57  ;;  %v1830_v58 = vld [vmem:[#allocation2 + $0x110] sm:$0xff]  ;;  %v1831_v59 = vld [vmem:[#allocation2 + $0x118] sm:$0xff] }
 0x33d   : > { %v1930_v4 = vpop.permute.xlu1 %1929  ;;  %v1925_v5 = vpop.permute.xlu0 %1924 }
 0x33e   : > { %v5193_v6 = vmul.f32 %v1930_v4, %v1810_v0  ;;  %v5195_v7 = vmul.f32 %v1930_v4, %v1811_v1  ;;  %v5197_v8 = vmul.f32 %v1925_v5, %v1808_v2  ;;  %v5199_v9 = vmul.f32 %v1925_v5, %v1809_v3  ;;  %v1828_v0 = vld [vmem:[#allocation2 + $0x100] sm:$0xff]  ;;  %v1829_v1 = vld [vmem:[#allocation2 + $0x108] sm:$0xff] }
 0x340   : > { %6230 = vst [vmem:[#allocation40_spill] sm:$0xff] %v5195_v7 }
 0x341   : > { %v1940_v14 = vpop.permute.xlu1 %1939  ;;  %v1935_v15 = vpop.permute.xlu0 %1934 }
 0x342   : > { %v5201_v16 = vmul.f32 %v1940_v14, %v1814_v10  ;;  %v5203_v17 = vmul.f32 %v1940_v14, %v1815_v11  ;;  %v5205_v18 = vmul.f32 %v1935_v15, %v1812_v12  ;;  %v5207_v19 = vmul.f32 %v1935_v15, %v1813_v13  ;;  %v1834_v12 = vld [vmem:[#allocation2 + $0x130] sm:$0xff]  ;;  %v1835_v13 = vld [vmem:[#allocation2 + $0x138] sm:$0xff]  ;;  %v1832_v14 = vld [vmem:[#allocation2 + $0x120] sm:$0xff] }
 0x343   : > { %v1833_v15 = vld [vmem:[#allocation2 + $0x128] sm:$0xff] }
 0x345   : > { %v1950_v24 = vpop.permute.xlu1 %1949  ;;  %v1945_v25 = vpop.permute.xlu0 %1944 }
 0x346   : > { %v5209_v26 = vmul.f32 %v1950_v24, %v1818_v20  ;;  %v5211_v27 = vmul.f32 %v1950_v24, %v1819_v21  ;;  %v5213_v28 = vmul.f32 %v1945_v25, %v1816_v22  ;;  %v5215_v29 = vmul.f32 %v1945_v25, %v1817_v23 }
 0x349   : > { %v1960_v34 = vpop.permute.xlu1 %1959  ;;  %v1955_v35 = vpop.permute.xlu0 %1954 }
 0x34a   : > { %v5217_v36 = vmul.f32 %v1960_v34, %v1822_v30  ;;  %v5219_v37 = vmul.f32 %v1960_v34, %v1823_v31  ;;  %v5221_v38 = vmul.f32 %v1955_v35, %v1820_v32  ;;  %v5223_v39 = vmul.f32 %v1955_v35, %v1821_v33  ;;  %v1838_v30 = vld [vmem:[#allocation2 + $0x150] sm:$0xff]  ;;  %v1839_v31 = vld [vmem:[#allocation2 + $0x158] sm:$0xff]  ;;  %v1836_v32 = vld [vmem:[#allocation2 + $0x140] sm:$0xff] }
 0x34b   : > { %v1837_v33 = vld [vmem:[#allocation2 + $0x148] sm:$0xff] }
 0x34d   : > { %v1970_v48 = vpop.permute.xlu1 %1969  ;;  %v1965_v49 = vpop.permute.xlu0 %1964 }
 0x34e   : > { %v5225_v54 = vmul.f32 %v1970_v48, %v1826_v44  ;;  %v5227_v55 = vmul.f32 %v1970_v48, %v1827_v45  ;;  %v5229_v56 = vmul.f32 %v1965_v49, %v1824_v46  ;;  %v5231_v57 = vmul.f32 %v1965_v49, %v1825_v47  ;;  %v1842_v48 = vld [vmem:[#allocation2 + $0x170] sm:$0xff]  ;;  %v1843_v49 = vld [vmem:[#allocation2 + $0x178] sm:$0xff] }
 0x351   : > { %v1980_v2 = vpop.permute.xlu1 %1979  ;;  %v1975_v3 = vpop.permute.xlu0 %1974 }
 0x352   : > { %v5233_v4 = vmul.f32 %v1980_v2, %v1830_v58  ;;  %v5235_v5 = vmul.f32 %v1980_v2, %v1831_v59  ;;  %v5237_v10 = vmul.f32 %v1975_v3, %v1828_v0  ;;  %v5239_v11 = vmul.f32 %v1975_v3, %v1829_v1  ;;  %v1840_v58 = vld [vmem:[#allocation2 + $0x160] sm:$0xff]  ;;  %v1841_v59 = vld [vmem:[#allocation2 + $0x168] sm:$0xff] }
 0x355   : > { %v1990_v20 = vpop.permute.xlu1 %1989  ;;  %v1985_v21 = vpop.permute.xlu0 %1984 }
 0x356   : > { %v5241_v22 = vmul.f32 %v1990_v20, %v1834_v12  ;;  %v5243_v23 = vmul.f32 %v1990_v20, %v1835_v13  ;;  %v5245_v24 = vmul.f32 %v1985_v21, %v1832_v14  ;;  %v5247_v25 = vmul.f32 %v1985_v21, %v1833_v15  ;;  %v1846_v14 = vld [vmem:[#allocation2 + $0x190] sm:$0xff]  ;;  %v1847_v15 = vld [vmem:[#allocation2 + $0x198] sm:$0xff]  ;;  %v1844_v20 = vld [vmem:[#allocation2 + $0x180] sm:$0xff] }
 0x357   : > { %v1845_v21 = vld [vmem:[#allocation2 + $0x188] sm:$0xff] }
 0x358   : > { %6231 = vst [vmem:[#allocation41_spill] sm:$0xff] %v5243_v23  ;;  %6232 = vst [vmem:[#allocation42_spill] sm:$0xff] %v5245_v24 }
 0x359   : > { %6233 = vst [vmem:[#allocation43_spill] sm:$0xff] %v5247_v25  ;;  %v2000_v34 = vpop.permute.xlu1 %1999  ;;  %v1995_v35 = vpop.permute.xlu0 %1994 }
 0x35a   : > { %v5249_v44 = vmul.f32 %v2000_v34, %v1838_v30  ;;  %v5251_v45 = vmul.f32 %v2000_v34, %v1839_v31  ;;  %v5253_v46 = vmul.f32 %v1995_v35, %v1836_v32  ;;  %v5255_v47 = vmul.f32 %v1995_v35, %v1837_v33 }
 0x35c   : > { %6234 = vst [vmem:[#allocation44_spill] sm:$0xff] %v5249_v44  ;;  %6235 = vst [vmem:[#allocation45_spill] sm:$0xff] %v5251_v45 }
 0x35d   : > { %6236 = vst [vmem:[#allocation46_spill] sm:$0xff] %v5255_v47  ;;  %v2010_v0 = vpop.permute.xlu1 %2009  ;;  %v2005_v1 = vpop.permute.xlu0 %2004 }
 0x35e   : > { %v5257_v2 = vmul.f32 %v2010_v0, %v1842_v48  ;;  %v5259_v3 = vmul.f32 %v2010_v0, %v1843_v49  ;;  %v5261_v12 = vmul.f32 %v2005_v1, %v1840_v58  ;;  %v5263_v13 = vmul.f32 %v2005_v1, %v1841_v59  ;;  %v1850_v48 = vld [vmem:[#allocation2 + $0x1b0] sm:$0xff]  ;;  %v1851_v49 = vld [vmem:[#allocation2 + $0x1b8] sm:$0xff]  ;;  %v1848_v58 = vld [vmem:[#allocation2 + $0x1a0] sm:$0xff] }
 0x35f   : > { %v1849_v0 = vld [vmem:[#allocation2 + $0x1a8] sm:$0xff] }
 0x360   : > { %6237 = vst [vmem:[#allocation47_spill] sm:$0xff] %v5257_v2  ;;  %6238 = vst [vmem:[#allocation48_spill] sm:$0xff] %v5259_v3 }
 0x361   : > { %6239 = vst [vmem:[#allocation49_spill] sm:$0xff] %v5261_v12  ;;  %6240 = vst [vmem:[#allocation50_spill] sm:$0xff] %v5263_v13  ;;  %v2020_v30 = vpop.permute.xlu1 %2019  ;;  %v2015_v31 = vpop.permute.xlu0 %2014 }
 0x362   : > { %v5265_v32 = vmul.f32 %v2020_v30, %v1846_v14  ;;  %v5267_v33 = vmul.f32 %v2020_v30, %v1847_v15  ;;  %v5269_v34 = vmul.f32 %v2015_v31, %v1844_v20  ;;  %v5271_v35 = vmul.f32 %v2015_v31, %v1845_v21  ;;  %v1854_v15 = vld [vmem:[#allocation2 + $0x1d0] sm:$0xff]  ;;  %v1855_v30 = vld [vmem:[#allocation2 + $0x1d8] sm:$0xff]  ;;  %v1852_v20 = vld [vmem:[#allocation2 + $0x1c0] sm:$0xff] }
 0x364   : > { %6241 = vst [vmem:[#allocation51_spill] sm:$0xff] %v5265_v32  ;;  %6242 = vst [vmem:[#allocation52_spill] sm:$0xff] %v5267_v33  ;;  %v1853_v33 = vld [vmem:[#allocation2 + $0x1c8] sm:$0xff] }
 0x365   : > { %6243 = vst [vmem:[#allocation53_spill] sm:$0xff] %v5269_v34  ;;  %6244 = vst [vmem:[#allocation54_spill] sm:$0xff] %v5271_v35  ;;  %v2030_v59 = vpop.permute.xlu1 %2029  ;;  %v2025_v1 = vpop.permute.xlu0 %2024 }
 0x366   : > { %v5273_v3 = vmul.f32 %v2030_v59, %v1850_v48  ;;  %v5275_v2 = vmul.f32 %v2030_v59, %v1851_v49  ;;  %v5277_v13 = vmul.f32 %v2025_v1, %v1848_v58  ;;  %v5279_v14 = vmul.f32 %v2025_v1, %v1849_v0  ;;  %v1858_v49 = vld [vmem:[#allocation2 + $0x1f0] sm:$0xff]  ;;  %v1859_v59 = vld [vmem:[#allocation2 + $0x1f8] sm:$0xff]  ;;  %v1856_v58 = vld [vmem:[#allocation2 + $0x1e0] sm:$0xff] }
 0x368   : > { %6245 = vst [vmem:[#allocation55_spill] sm:$0xff] %v5273_v3  ;;  %6246 = vst [vmem:[#allocation56_spill] sm:$0xff] %v5275_v2  ;;  %v1857_v2 = vld [vmem:[#allocation2 + $0x1e8] sm:$0xff] }
 0x369   : > { %6247 = vst [vmem:[#allocation57_spill] sm:$0xff] %v5277_v13  ;;  %6248 = vst [vmem:[#allocation58_spill] sm:$0xff] %v5279_v14  ;;  %v2040_v21 = vpop.permute.xlu1 %2039  ;;  %v2035_v31 = vpop.permute.xlu0 %2034 }
 0x36a   : > { %v5281_v32 = vmul.f32 %v2040_v21, %v1854_v15  ;;  %v5283_v35 = vmul.f32 %v2040_v21, %v1855_v30  ;;  %v5285_v34 = vmul.f32 %v2035_v31, %v1852_v20  ;;  %v5287_v48 = vmul.f32 %v2035_v31, %v1853_v33 }
 0x36b   : > { %2122 = sbr.rel (%p5165_p1) target bundleno = 897 (0x381), region = 60  ;;  %v3587_v33 = vpack.c.bf16 (!%p5165_p1), %v5175_v43, %v5173_v42  ;;  %v3588_v30 = vpack.c.bf16 (!%p5165_p1), %v5183_v53, %v5181_v52  ;;  %v3589_v20 = vpack.c.bf16 (!%p5165_p1), %v5171_v41, %v5169_v40  ;;  %v3591_v21 = vpack.c.bf16 (!%p5165_p1), %v5191_v63, %v5189_v62 }
 0x36c   : > { %6249 = vst [vmem:[#allocation59_spill] sm:$0xff] %v5281_v32  ;;  %6250 = vst [vmem:[#allocation60_spill] sm:$0xff] %v5283_v35  ;;  %v3592_v31 = vpack.c.bf16 (!%p5165_p1), %v5187_v61, %v5185_v60 }
 0x36d   : > { %6251 = vst [vmem:[#allocation61_spill] sm:$0xff] %v5287_v48  ;;  %v2050_v0 = vpop.permute.xlu1 %2049  ;;  %v2045_v1 = vpop.permute.xlu0 %2044  ;;  %2315 = vst [vmem:[%s4924_s9] sm:$0xff] (!%p5165_p1), %v3587_v33  ;;  %v3599_v33 = vpack.c.bf16 (!%p5165_p1), %v5223_v39, %v5221_v38 }
 0x36e   : > { %v5289_v3 = vmul.f32 %v2050_v0, %v1858_v49  ;;  %v5291_v14 = vmul.f32 %v2050_v0, %v1859_v59  ;;  %v5293_v13 = vmul.f32 %v2045_v1, %v1856_v58  ;;  %v5295_v15 = vmul.f32 %v2045_v1, %v1857_v2  ;;  %2316 = vst [vmem:[%s4924_s9 + $0x8] sm:$0xff] (!%p5165_p1), %v3588_v30 }
 0x36f   : > { %v3590_v2 = vpack.c.bf16 (!%p5165_p1), %v5179_v51, %v5177_v50  ;;  %v3593_v49 = vpack.c.bf16 (!%p5165_p1), %v5199_v9, %v5197_v8  ;;  %v3594_v59 = vpack.c.bf16 (!%p5165_p1), %v5195_v7, %v5193_v6  ;;  %2317 = vst [vmem:[%s4924_s9 + $0x10] sm:$0xff] (!%p5165_p1), %v3589_v20  ;;  %v3595_v58 = vpack.c.bf16 (!%p5165_p1), %v5207_v19, %v5205_v18 }
 0x370   : > { %6252 = vst [vmem:[#allocation62_spill] sm:$0xff] %v5289_v3  ;;  %6253 = vst [vmem:[#allocation63_spill] sm:$0xff] %v5291_v14  ;;  %v3596_v0 = vpack.c.bf16 (!%p5165_p1), %v5203_v17, %v5201_v16  ;;  %v3597_v1 = vpack.c.bf16 (!%p5165_p1), %v5215_v29, %v5213_v28  ;;  %v3598_v7 = vpack.c.bf16 (!%p5165_p1), %v5211_v27, %v5209_v26 }
 0x371   : > { %6254 = vst [vmem:[#allocation64_spill] sm:$0xff] %v5293_v13  ;;  %6255 = vst [vmem:[#allocation65_spill] sm:$0xff] %v5295_v15  ;;  %v3600_v30 = vpack.c.bf16 (!%p5165_p1), %v5219_v37, %v5217_v36  ;;  %v3601_v20 = vpack.c.bf16 (!%p5165_p1), %v5231_v57, %v5229_v56 }
 0x372   : > { %2318 = vst [vmem:[%s4924_s9 + $0x18] sm:$0xff] %v3590_v2  ;;  %2319 = vst [vmem:[%s4924_s9 + $0x20] sm:$0xff] %v3591_v21  ;;  %v3602_v2 = vpack.c.bf16 %v5227_v55, %v5225_v54  ;;  %v3603_v21 = vpack.c.bf16 %v5239_v11, %v5237_v10 }
 0x373   : > { %2320 = vst [vmem:[%s4924_s9 + $0x28] sm:$0xff] %v3592_v31  ;;  %2321 = vst [vmem:[%s4924_s9 + $0x30] sm:$0xff] %v3593_v49  ;;  %v3604_v31 = vpack.c.bf16 %v5235_v5, %v5233_v4  ;;  %v3605_v49 = vpack.c.bf16 %v5247_v25, %v5245_v24  ;;  %v6257_v25 = vld [vmem:[#allocation47_spill] sm:$0xff]  ;;  %v6258_v24 = vld [vmem:[#allocation48_spill] sm:$0xff] }
 0x374   : > { %2322 = vst [vmem:[%s4924_s9 + $0x38] sm:$0xff] %v3594_v59  ;;  %2323 = vst [vmem:[%s4924_s9 + $0x40] sm:$0xff] %v3595_v58  ;;  %v3606_v59 = vpack.c.bf16 %v5243_v23, %v5241_v22  ;;  %v3608_v58 = vpack.c.bf16 %v5251_v45, %v5249_v44  ;;  %v3610_v23 = vpack.c.bf16 %v6258_v24, %v6257_v25  ;;  %v6263_v44 = vld [vmem:[#allocation57_spill] sm:$0xff]  ;;  %v6265_v24 = vld [vmem:[#allocation55_spill] sm:$0xff] }
 0x375   : > { %2324 = vst [vmem:[%s4924_s9 + $0x48] sm:$0xff] %v3596_v0  ;;  %2325 = vst [vmem:[%s4924_s9 + $0x50] sm:$0xff] %v3597_v1  ;;  %v6256_v0 = vld [vmem:[#allocation50_spill] sm:$0xff]  ;;  %v6266_v25 = vld [vmem:[#allocation56_spill] sm:$0xff] }
 0x376   : > { %2326 = vst [vmem:[%s4924_s9 + $0x58] sm:$0xff] %v3598_v7  ;;  %2327 = vst [vmem:[%s4924_s9 + $0x60] sm:$0xff] %v3599_v33  ;;  %v3607_v7 = vpack.c.bf16 %v5255_v47, %v5253_v46  ;;  %v3609_v1 = vpack.c.bf16 %v6256_v0, %v5261_v12  ;;  %v6259_v33 = vld [vmem:[#allocation53_spill] sm:$0xff]  ;;  %v6262_v47 = vld [vmem:[#allocation52_spill] sm:$0xff] }
 0x377   : > { %2328 = vst [vmem:[%s4924_s9 + $0x68] sm:$0xff] %v3600_v30  ;;  %2329 = vst [vmem:[%s4924_s9 + $0x70] sm:$0xff] %v3601_v20  ;;  %v6260_v30 = vld [vmem:[#allocation54_spill] sm:$0xff] }
 0x378   : > { %2330 = vst [vmem:[%s4924_s9 + $0x78] sm:$0xff] %v3602_v2  ;;  %2331 = vst [vmem:[%s4924_s9 + $0x80] sm:$0xff] %v3603_v21  ;;  %v3611_v20 = vpack.c.bf16 %v6260_v30, %v6259_v33  ;;  %v6261_v2 = vld [vmem:[#allocation51_spill] sm:$0xff]  ;;  %v6264_v0 = vld [vmem:[#allocation58_spill] sm:$0xff]  ;;  %v3614_v21 = vpack.c.bf16 %v6266_v25, %v6265_v24 }
 0x379   : > { %2332 = vst [vmem:[%s4924_s9 + $0x88] sm:$0xff] %v3604_v31  ;;  %2333 = vst [vmem:[%s4924_s9 + $0x90] sm:$0xff] %v3605_v49  ;;  %v3612_v45 = vpack.c.bf16 %v6262_v47, %v6261_v2  ;;  %v3613_v12 = vpack.c.bf16 %v6264_v0, %v6263_v44  ;;  %v3615_v31 = vpack.c.bf16 %v5287_v48, %v5285_v34 }
 0x37a   : > { %2334 = vst [vmem:[%s4924_s9 + $0x98] sm:$0xff] %v3606_v59  ;;  %2335 = vst [vmem:[%s4924_s9 + $0xa0] sm:$0xff] %v3607_v7  ;;  %v3616_v49 = vpack.c.bf16 %v5283_v35, %v5281_v32  ;;  %v3617_v47 = vpack.c.bf16 %v5295_v15, %v5293_v13  ;;  %v3618_v44 = vpack.c.bf16 %v5291_v14, %v5289_v3 }
 0x37b   : > { %2336 = vst [vmem:[%s4924_s9 + $0xa8] sm:$0xff] %v3608_v58  ;;  %2337 = vst [vmem:[%s4924_s9 + $0xb0] sm:$0xff] %v3609_v1 }
 0x37c   : > { %2338 = vst [vmem:[%s4924_s9 + $0xb8] sm:$0xff] %v3610_v23  ;;  %2339 = vst [vmem:[%s4924_s9 + $0xc0] sm:$0xff] %v3611_v20 }
 0x37d   : > { %2340 = vst [vmem:[%s4924_s9 + $0xc8] sm:$0xff] %v3612_v45  ;;  %2341 = vst [vmem:[%s4924_s9 + $0xd0] sm:$0xff] %v3613_v12 }
 0x37e   : > { %2342 = vst [vmem:[%s4924_s9 + $0xd8] sm:$0xff] %v3614_v21  ;;  %2343 = vst [vmem:[%s4924_s9 + $0xe0] sm:$0xff] %v3615_v31 }
 0x37f   : > { %2344 = vst [vmem:[%s4924_s9 + $0xe8] sm:$0xff] %v3616_v49  ;;  %2345 = vst [vmem:[%s4924_s9 + $0xf0] sm:$0xff] %v3617_v47 }
 0x380   : > { %2346 = vst [vmem:[%s4924_s9 + $0xf8] sm:$0xff] %v3618_v44 }
 0x381 PF: > { %2349 = sbr.rel (!%p5165_p1) target bundleno = 985 (0x3d9), region = 64  ;;  %v2350_v23 = vlaneseq (%p5165_p1)  ;;  %v5398_v59 = vstv (%p5165_p1), %s5157_s14  ;;  %v5401_v7 = vstv (%p5165_p1), %s4915_s26  ;;  %v5404_v58 = vstv (%p5165_p1), %s4918_s13  ;;  %v6267_v24 = vld [vmem:[#allocation40_spill] sm:$0xff] (%p5165_p1) }
 0x383   : > { %v5410_v1 = vshrl.u32 (%p5165_p1), %v2350_v23, 7 }
 0x385   : > { %v2352_v21 = vadd.s32 (%p5165_p1), 8, %v5410_v1  ;;  %v2384_v31 = vadd.s32 (%p5165_p1), %v5398_v59, %v5410_v1  ;;  %v2353_v49 = vadd.s32 (%p5165_p1), 16, %v5410_v1  ;;  %v2354_v47 = vadd.s32 (%p5165_p1), 24, %v5410_v1 }
 0x386   : > { %v2355_v44 = vadd.s32 (%p5165_p1), 32, %v5410_v1  ;;  %v2356_v23 = vadd.s32 (%p5165_p1), 40, %v5410_v1  ;;  %v2357_v2 = vadd.s32 (%p5165_p1), 48, %v5410_v1  ;;  %v2358_v0 = vadd.s32 (%p5165_p1), 56, %v5410_v1 }
 0x387   : > { %v2385_v20 = vadd.s32 (%p5165_p1), %v5398_v59, %v2352_v21  ;;  %vm2417_vm0 = vcmp.ge.s32.totalorder (%p5165_p1), %v2384_v31, %v5401_v7  ;;  %vm2450_vm1 = vcmp.lt.s32.totalorder (%p5165_p1), %v2384_v31, %v5404_v58  ;;  %v2386_v25 = vadd.s32 (%p5165_p1), %v5398_v59, %v2353_v49  ;;  %v4066_v49 = vld [vmem:[%s4924_s9] ss:$8 sps:$4 sm:$0xff] (%p5165_p1)  }
 0x388   : > { %vm2482_vm2 = vmand %vm2417_vm0, %vm2450_vm1  ;;  %v2387_v30 = vadd.s32 %v5398_v59, %v2354_v47  ;;  %v2388_v33 = vadd.s32 %v5398_v59, %v2355_v44  ;;  %v2389_v12 = vadd.s32 %v5398_v59, %v2356_v23  ;;  %v5441_v45 = vadd.s32 %v5398_v59, %v2357_v2  ;;  %v4068_v47 = vld [vmem:[%s4924_s9 + $0x4] ss:$8 sps:$4 sm:$0xff]   ;;  %v4069_v3 = vld [vmem:[%s4924_s9 + $0x10] ss:$8 sps:$4 sm:$0xff]  }
 0x389   : > { %vm2418_vm3 = vcmp.ge.s32.totalorder %v2385_v20, %v5401_v7  ;;  %vm2451_vm4 = vcmp.lt.s32.totalorder %v2385_v20, %v5404_v58  ;;  %vm2642_vm5 = vmpackc.low %vm2482_vm2, %vm2482_vm2  ;;  %vm2419_vm6 = vcmp.ge.s32.totalorder %v2386_v25, %v5401_v7  ;;  %vm2452_vm7 = vcmp.lt.s32.totalorder %v2386_v25, %v5404_v58  ;;  %v4071_v13 = vld [vmem:[%s4924_s9 + $0x14] ss:$8 sps:$4 sm:$0xff]  }
 0x38a   : > { %vm2483_vm8 = vmand %vm2418_vm3, %vm2451_vm4  ;;  %v4439_v21 = vmov 0   ;;  %vm2420_vm9 = vcmp.ge.s32.totalorder %v2387_v30, %v5401_v7  ;;  %vm2453_vm10 = vcmp.lt.s32.totalorder %v2387_v30, %v5404_v58  ;;  %vm2421_vm12 = vcmp.ge.s32.totalorder %v2388_v33, %v5401_v7 }
 0x38b   : > { %v2674_v31 = vsel %vm2642_vm5, 65537, %v4439_v21  ;;  %vm2643_vm11 = vmpackc.low %vm2483_vm8, %vm2483_vm8  ;;  %vm2422_vm13 = vcmp.ge.s32.totalorder %v2389_v12, %v5401_v7  ;;  %v2391_v20 = vadd.s32 %v5398_v59, %v2358_v0  ;;  %vm2454_vm15 = vcmp.lt.s32.totalorder %v2388_v33, %v5404_v58 }
 0x38c   : > { %v2675_v23 = vsel %vm2643_vm11, 65537, %v4439_v21  ;;  %vm5464_vm14 = vmand %vm2419_vm6, %vm2452_vm7  ;;  %vm2455_vm0 = vcmp.lt.s32.totalorder %v2389_v12, %v5404_v58  ;;  %v2359_v0 = vadd.s32 64, %v5410_v1  ;;  %vm2423_vm2 = vcmp.ge.s32.totalorder %v5441_v45, %v5401_v7 }
 0x38d   : > { %v3496_v14 = vcombine.low %v2674_v31, %v2675_v23  ;;  %vm5475_vm1 = vmand %vm2420_vm9, %vm2453_vm10  ;;  %vm2456_vm3 = vcmp.lt.s32.totalorder %v5441_v45, %v5404_v58  ;;  %v2360_v25 = vadd.s32 72, %v5410_v1  ;;  %vm2424_vm5 = vcmp.ge.s32.totalorder %v2391_v20, %v5401_v7 }
 0x38e   : > { %vm2644_vm4 = vmpackc.low %vm5464_vm14, %vm5464_vm14  ;;  %v2392_v30 = vadd.s32 %v5398_v59, %v2359_v0  ;;  %v2361_v31 = vadd.s32 80, %v5410_v1  ;;  %v2362_v23 = vadd.s32 88, %v5410_v1  ;;  %vm2457_vm8 = vcmp.lt.s32.totalorder %v2391_v20, %v5404_v58  ;;  %v4075_v20 = vld [vmem:[%s4924_s9 + $0x30] ss:$8 sps:$4 sm:$0xff]  }
 0x38f   : > { %vm2754_vm6 = vcmp.ne.s16.totalorder %v3496_v14, 0  ;;  %vm2645_vm7 = vmpackc.low %vm5475_vm1, %vm5475_vm1  ;;  %v2676_v15 = vsel %vm2644_vm4, 65537, %v4439_v21  ;;  %v2393_v2 = vadd.s32 %v5398_v59, %v2360_v25  ;;  %v6272_v0 = vpack.c.bf16 %v5181_v52, %v5173_v42 }
 0x390   : > { %v6273_v14 = vpack.c.bf16 %v5183_v53, %v5175_v43  ;;  %v2677_v48 = vsel %vm2645_vm7, 65537, %v4439_v21  ;;  %vm5510_vm9 = vmand %vm2421_vm12, %vm2454_vm15  ;;  %v2524_v42 = vpack.c.bf16 %v5209_v26, %v5213_v28  ;;  %v2525_v53 = vpack.c.bf16 %v5211_v27, %v5215_v29 }
 0x391   : > { %v2930_v35 = vsel %vm2754_vm6, %v6272_v0, %v4066_v49  ;;  %v3497_v25 = vcombine.low %v2676_v15, %v2677_v48  ;;  %vm5520_vm10 = vmand %vm2422_vm13, %vm2455_vm0  ;;  %vm2425_vm12 = vcmp.ge.s32.totalorder %v2392_v30, %v5401_v7  ;;  %vm2426_vm14 = vcmp.ge.s32.totalorder %v2393_v2, %v5401_v7  ;;  %v4072_v15 = vld [vmem:[%s4924_s9 + $0x20] ss:$8 sps:$4 sm:$0xff]  }
 0x392   : > { %v2931_v44 = vsel %vm2754_vm6, %v6273_v14, %v4068_v47  ;;  %vm2646_vm11 = vmpackc.low %vm5510_vm9, %vm5510_vm9  ;;  %v5533_v48 = vadd.s32 %v5398_v59, %v2362_v23  ;;  %v2363_v12 = vadd.s32 96, %v5410_v1  ;;  %v2364_v33 = vadd.s32 104, %v5410_v1 }
 0x393   : > { %v3544_v52 = vcombine.low %v2930_v35, %v2931_v44  ;;  %v3545_v49 = vcombine.high %v2930_v35, %v2931_v44  ;;  %v2394_v35 = vadd.s32 %v5398_v59, %v2361_v31  ;;  %vm2755_vm13 = vcmp.ne.s16.totalorder %v3497_v25, 0  ;;  %vm2647_vm15 = vmpackc.low %vm5520_vm10, %vm5520_vm10  ;;  %v4074_v44 = vld [vmem:[%s4924_s9 + $0x24] ss:$8 sps:$4 sm:$0xff]  }
 0x394   : > { %v2678_v32 = vsel %vm2646_vm11, 65537, %v4439_v21  ;;  %v6278_v47 = vpack.c.bf16 %v5177_v50, %v5169_v40  ;;  %v6279_v23 = vpack.c.bf16 %v5179_v51, %v5171_v41  ;;  %v2679_v14 = vsel %vm2647_vm15, 65537, %v4439_v21  ;;  %vm5558_vm0 = vmand %vm2423_vm2, %vm2456_vm3 }
 0x395   : > { %3122 = vst [vmem:[%s4924_s9] sm:$0xff] %v3544_v52  ;;  %3123 = vst [vmem:[%s4924_s9 + $0x8] sm:$0xff] %v3545_v49  ;;  %vm2458_vm1 = vcmp.lt.s32.totalorder %v2392_v30, %v5404_v58  ;;  %v3498_v50 = vcombine.low %v2678_v32, %v2679_v14  ;;  %vm2459_vm6 = vcmp.lt.s32.totalorder %v2393_v2, %v5404_v58  ;;  %v2366_v2 = vadd.s32 120, %v5410_v1 }
 0x396   : > { %v2932_v31 = vsel %vm2755_vm13, %v6278_v47, %v4069_v3  ;;  %v2933_v0 = vsel %vm2755_vm13, %v6279_v23, %v4071_v13  ;;  %vm5567_vm4 = vmand %vm2424_vm5, %vm2457_vm8  ;;  %vm2427_vm3 = vcmp.ge.s32.totalorder %v2394_v35, %v5401_v7  ;;  %vm2428_vm7 = vcmp.ge.s32.totalorder %v5533_v48, %v5401_v7 }
 0x397   : > { %v3546_v40 = vcombine.low %v2932_v31, %v2933_v0  ;;  %v3547_v41 = vcombine.high %v2932_v31, %v2933_v0  ;;  %vm2648_vm2 = vmpackc.low %vm5558_vm0, %vm5558_vm0  ;;  %v2396_v3 = vadd.s32 %v5398_v59, %v2363_v12  ;;  %v5580_v13 = vadd.s32 %v5398_v59, %v2364_v33  ;;  %v4077_v33 = vld [vmem:[%s4924_s9 + $0x34] ss:$8 sps:$4 sm:$0xff]   ;;  %v4078_v0 = vld [vmem:[%s4924_s9 + $0x40] ss:$8 sps:$4 sm:$0xff]  }
 0x398   : > { %vm2756_vm5 = vcmp.ne.s16.totalorder %v3498_v50, 0  ;;  %vm2649_vm8 = vmpackc.low %vm5567_vm4, %vm5567_vm4  ;;  %v2680_v45 = vsel %vm2648_vm2, 65537, %v4439_v21  ;;  %vm2460_vm9 = vcmp.lt.s32.totalorder %v2394_v35, %v5404_v58  ;;  %vm2461_vm10 = vcmp.lt.s32.totalorder %v5533_v48, %v5404_v58  ;;  %v4080_v50 = vld [vmem:[%s4924_s9 + $0x44] ss:$8 sps:$4 sm:$0xff]  }
 0x399   : > { %3124 = vst [vmem:[%s4924_s9 + $0x10] sm:$0xff] %v3546_v40  ;;  %3125 = vst [vmem:[%s4924_s9 + $0x18] sm:$0xff] %v3547_v41  ;;  %v6284_v49 = vpack.c.bf16 %v5185_v60, %v5189_v62  ;;  %v6285_v43 = vpack.c.bf16 %v5187_v61, %v5191_v63  ;;  %v2681_v12 = vsel %vm2649_vm8, 65537, %v4439_v21  ;;  %v2526_v60 = vpack.c.bf16 %v5217_v36, %v5221_v38 }
 0x39a   : > { %vm5604_vm11 = vmand %vm2425_vm12, %vm2458_vm1  ;;  %v3499_v63 = vcombine.low %v2680_v45, %v2681_v12  ;;  %v2527_v30 = vpack.c.bf16 %v5219_v37, %v5223_v39  ;;  %vm2429_vm15 = vcmp.ge.s32.totalorder %v2396_v3, %v5401_v7  ;;  %vm2430_vm0 = vcmp.ge.s32.totalorder %v5580_v13, %v5401_v7  ;;  %v6331_v39 = vld [vmem:[#allocation48_spill] sm:$0xff] }
 0x39b   : > { %v2934_v25 = vsel %vm2756_vm5, %v6284_v49, %v4072_v15  ;;  %v2935_v32 = vsel %vm2756_vm5, %v6285_v43, %v4074_v44  ;;  %vm5614_vm13 = vmand %vm2426_vm14, %vm2459_vm6  ;;  %v2365_v31 = vadd.s32 112, %v5410_v1  ;;  %vm2462_vm4 = vcmp.lt.s32.totalorder %v2396_v3, %v5404_v58 }
 0x39c   : > { %v3548_v62 = vcombine.low %v2934_v25, %v2935_v32  ;;  %v3549_v61 = vcombine.high %v2934_v25, %v2935_v32  ;;  %vm2650_vm12 = vmpackc.low %vm5604_vm11, %vm5604_vm11  ;;  %vm2757_vm14 = vcmp.ne.s16.totalorder %v3499_v63, 0  ;;  %vm2463_vm6 = vcmp.lt.s32.totalorder %v5580_v13, %v5404_v58  ;;  %v4083_v63 = vld [vmem:[%s4924_s9 + $0x54] ss:$8 sps:$4 sm:$0xff]  }
 0x39d   : > { %vm2651_vm1 = vmpackc.low %vm5614_vm13, %vm5614_vm13  ;;  %v2682_v23 = vsel %vm2650_vm12, 65537, %v4439_v21  ;;  %v6290_v14 = vpack.c.bf16 %v5193_v6, %v5197_v8  ;;  %v6291_v52 = vpack.c.bf16 %v6267_v24, %v5199_v9  ;;  %v2398_v6 = vadd.s32 %v5398_v59, %v2365_v31 }
 0x39e   : > { %3126 = vst [vmem:[%s4924_s9 + $0x20] sm:$0xff] %v3548_v62  ;;  %3127 = vst [vmem:[%s4924_s9 + $0x28] sm:$0xff] %v3549_v61  ;;  %v2683_v41 = vsel %vm2651_vm1, 65537, %v4439_v21  ;;  %v2399_v24 = vadd.s32 %v5398_v59, %v2366_v2  ;;  %v2528_v35 = vpack.c.bf16 %v5225_v54, %v5229_v56  ;;  %v2529_v49 = vpack.c.bf16 %v5227_v55, %v5231_v57  ;;  %v4081_v61 = vld [vmem:[%s4924_s9 + $0x50] ss:$8 sps:$4 sm:$0xff]  }
 0x39f   : > { %v2936_v44 = vsel %vm2757_vm14, %v6290_v14, %v4075_v20  ;;  %v2937_v40 = vsel %vm2757_vm14, %v6291_v52, %v4077_v33  ;;  %vm5650_vm2 = vmand %vm2427_vm3, %vm2460_vm9  ;;  %v3500_v20 = vcombine.low %v2682_v23, %v2683_v41  ;;  %v2367_v48 = vadd.s32 128, %v5410_v1  ;;  %v4084_v52 = vld [vmem:[%s4924_s9 + $0x60] ss:$8 sps:$4 sm:$0xff]   ;;  %v4093_v41 = vld [vmem:[%s4924_s9 + $0x90] ss:$8 sps:$4 sm:$0xff]  }
 0x3a0   : > { %v3550_v8 = vcombine.low %v2936_v44, %v2937_v40  ;;  %v3551_v45 = vcombine.high %v2936_v44, %v2937_v40  ;;  %vm5661_vm5 = vmand %vm2428_vm7, %vm2461_vm10  ;;  %v2368_v25 = vadd.s32 136, %v5410_v1  ;;  %vm2431_vm9 = vcmp.ge.s32.totalorder %v2398_v6, %v5401_v7  ;;  %v4086_v40 = vld [vmem:[%s4924_s9 + $0x64] ss:$8 sps:$4 sm:$0xff]   ;;  %v6338_v57 = vld [vmem:[#allocation54_spill] sm:$0xff] }
 0x3a1   : > { %vm2652_vm3 = vmpackc.low %vm5650_vm2, %vm5650_vm2  ;;  %vm2758_vm7 = vcmp.ne.s16.totalorder %v3500_v20, 0  ;;  %vm2464_vm10 = vcmp.lt.s32.totalorder %v2398_v6, %v5404_v58  ;;  %v6296_v32 = vpack.c.bf16 %v5201_v16, %v5205_v18  ;;  %v6297_v33 = vpack.c.bf16 %v5203_v17, %v5207_v19  ;;  %v6317_v19 = vld [vmem:[#allocation44_spill] sm:$0xff] }
 0x3a2   : > { %3128 = vst [vmem:[%s4924_s9 + $0x30] sm:$0xff] %v3550_v8  ;;  %3129 = vst [vmem:[%s4924_s9 + $0x38] sm:$0xff] %v3551_v45  ;;  %v2684_v43 = vsel %vm2652_vm3, 65537, %v4439_v21  ;;  %v2400_v16 = vadd.s32 %v5398_v59, %v2367_v48  ;;  %vm2432_vm12 = vcmp.ge.s32.totalorder %v2399_v24, %v5401_v7  ;;  %vm2465_vm14 = vcmp.lt.s32.totalorder %v2399_v24, %v5404_v58  ;;  %v4087_v48 = vld [vmem:[%s4924_s9 + $0x70] ss:$8 sps:$4 sm:$0xff]  }
 0x3a3   : > { %vm2653_vm8 = vmpackc.low %vm5661_vm5, %vm5661_vm5  ;;  %v2938_v12 = vsel %vm2758_vm7, %v6296_v32, %v4078_v0  ;;  %v2939_v47 = vsel %vm2758_vm7, %v6297_v33, %v4080_v50  ;;  %v2401_v3 = vadd.s32 %v5398_v59, %v2368_v25  ;;  %v2530_v2 = vpack.c.bf16 %v5233_v4, %v5237_v10  ;;  %v4089_v25 = vld [vmem:[%s4924_s9 + $0x74] ss:$8 sps:$4 sm:$0xff]  }
 0x3a4   : > { %v2685_v62 = vsel %vm2653_vm8, 65537, %v4439_v21  ;;  %vm5696_vm11 = vmand %vm2429_vm15, %vm2462_vm4  ;;  %v3552_v18 = vcombine.low %v2938_v12, %v2939_v47  ;;  %v3553_v31 = vcombine.high %v2938_v12, %v2939_v47  ;;  %vm2433_vm1 = vcmp.ge.s32.totalorder %v2400_v16, %v5401_v7  ;;  %v6310_v12 = vld [vmem:[#allocation42_spill] sm:$0xff]  ;;  %v6311_v47 = vld [vmem:[#allocation43_spill] sm:$0xff] }
 0x3a5   : > { %v3501_v17 = vcombine.low %v2684_v43, %v2685_v62  ;;  %vm5707_vm13 = vmand %vm2430_vm0, %vm2463_vm6  ;;  %vm2466_vm4 = vcmp.lt.s32.totalorder %v2400_v16, %v5404_v58  ;;  %v2531_v23 = vpack.c.bf16 %v5235_v5, %v5239_v11  ;;  %v2369_v26 = vadd.s32 144, %v5410_v1  ;;  %v6312_v62 = vld [vmem:[#allocation41_spill] sm:$0xff] }
 0x3a6   : > { %vm2654_vm15 = vmpackc.low %vm5696_vm11, %vm5696_vm11  ;;  %3130 = vst [vmem:[%s4924_s9 + $0x40] sm:$0xff] %v3552_v18  ;;  %vm2434_vm7 = vcmp.ge.s32.totalorder %v2401_v3, %v5401_v7  ;;  %vm2467_vm8 = vcmp.lt.s32.totalorder %v2401_v3, %v5404_v58  ;;  %v2371_v51 = vadd.s32 160, %v5410_v1  ;;  %v2372_v45 = vadd.s32 168, %v5410_v1  ;;  %v4090_v18 = vld [vmem:[%s4924_s9 + $0x80] ss:$8 sps:$4 sm:$0xff]  }
 0x3a7   : > { %3131 = vst [vmem:[%s4924_s9 + $0x48] sm:$0xff] %v3553_v31  ;;  %vm2759_vm0 = vcmp.ne.s16.totalorder %v3501_v17, 0  ;;  %vm2655_vm6 = vmpackc.low %vm5707_vm13, %vm5707_vm13  ;;  %v2686_v13 = vsel %vm2654_vm15, 65537, %v4439_v21  ;;  %v2402_v50 = vadd.s32 %v5398_v59, %v2369_v26  ;;  %v2532_v33 = vpack.c.bf16 %v5241_v22, %v6310_v12  ;;  %v4092_v31 = vld [vmem:[%s4924_s9 + $0x84] ss:$8 sps:$4 sm:$0xff]  }
 0x3a8   : > { %v2940_v0 = vsel %vm2759_vm0, %v2524_v42, %v4081_v61  ;;  %v2941_v14 = vsel %vm2759_vm0, %v2525_v53, %v4083_v63  ;;  %v2687_v44 = vsel %vm2655_vm6, 65537, %v4439_v21  ;;  %vm5742_vm2 = vmand %vm2431_vm9, %vm2464_vm10  ;;  %v2370_v53 = vadd.s32 152, %v5410_v1  ;;  %v4095_v26 = vld [vmem:[%s4924_s9 + $0x94] ss:$8 sps:$4 sm:$0xff]   ;;  %v6328_v43 = vld [vmem:[#allocation49_spill] sm:$0xff] }
 0x3a9   : > { %v3554_v28 = vcombine.low %v2940_v0, %v2941_v14  ;;  %v3555_v42 = vcombine.high %v2940_v0, %v2941_v14  ;;  %v3502_v27 = vcombine.low %v2686_v13, %v2687_v44  ;;  %vm5751_vm5 = vmand %vm2432_vm12, %vm2465_vm14  ;;  %vm2435_vm13 = vcmp.ge.s32.totalorder %v2402_v50, %v5401_v7  ;;  %v6318_v13 = vld [vmem:[#allocation46_spill] sm:$0xff]  ;;  %v6319_v0 = vld [vmem:[#allocation45_spill] sm:$0xff] }
 0x3aa   : > { %vm2656_vm3 = vmpackc.low %vm5742_vm2, %vm5742_vm2  ;;  %v2403_v8 = vadd.s32 %v5398_v59, %v2370_v53  ;;  %v2533_v61 = vpack.c.bf16 %v6312_v62, %v6311_v47  ;;  %v2534_v3 = vpack.c.bf16 %v6317_v19, %v5253_v46  ;;  %v2535_v14 = vpack.c.bf16 %v6319_v0, %v6318_v13  ;;  %v4099_v47 = vld [vmem:[%s4924_s9 + $0xb0] ss:$8 sps:$4 sm:$0xff]   ;;  %v4101_v62 = vld [vmem:[%s4924_s9 + $0xb4] ss:$8 sps:$4 sm:$0xff]  }
 0x3ab   : > { %3132 = vst [vmem:[%s4924_s9 + $0x50] sm:$0xff] %v3554_v28  ;;  %3133 = vst [vmem:[%s4924_s9 + $0x58] sm:$0xff] %v3555_v42  ;;  %vm2760_vm9 = vcmp.ne.s16.totalorder %v3502_v27, 0  ;;  %v2688_v6 = vsel %vm2656_vm3, 65537, %v4439_v21  ;;  %v2375_v28 = vadd.s32 192, %v5410_v1  ;;  %v2376_v42 = vadd.s32 200, %v5410_v1 }
 0x3ac   : > { %vm2657_vm10 = vmpackc.low %vm5751_vm5, %vm5751_vm5  ;;  %v2942_v20 = vsel %vm2760_vm9, %v2526_v60, %v4084_v52  ;;  %v2943_v9 = vsel %vm2760_vm9, %v2527_v30, %v4086_v40  ;;  %vm2436_vm15 = vcmp.ge.s32.totalorder %v2403_v8, %v5401_v7  ;;  %v2404_v60 = vadd.s32 %v5398_v59, %v2371_v51  ;;  %v4096_v51 = vld [vmem:[%s4924_s9 + $0xa0] ss:$8 sps:$4 sm:$0xff]  }
 0x3ad   : > { %v2689_v24 = vsel %vm2657_vm10, 65537, %v4439_v21  ;;  %vm5784_vm11 = vmand %vm2433_vm1, %vm2466_vm4  ;;  %v3556_v36 = vcombine.low %v2942_v20, %v2943_v9  ;;  %v3557_v38 = vcombine.high %v2942_v20, %v2943_v9  ;;  %vm2468_vm1 = vcmp.lt.s32.totalorder %v2402_v50, %v5404_v58 }
 0x3ae   : > { %v3503_v37 = vcombine.low %v2688_v6, %v2689_v24  ;;  %vm5793_vm12 = vmand %vm2434_vm7, %vm2467_vm8  ;;  %vm2469_vm4 = vcmp.lt.s32.totalorder %v2403_v8, %v5404_v58  ;;  %v2405_v30 = vadd.s32 %v5398_v59, %v2372_v45  ;;  %vm2437_vm5 = vcmp.ge.s32.totalorder %v2404_v60, %v5401_v7  ;;  %v4098_v6 = vld [vmem:[%s4924_s9 + $0xa4] ss:$8 sps:$4 sm:$0xff]  }
 0x3af   : > { %vm2658_vm14 = vmpackc.low %vm5784_vm11, %vm5784_vm11  ;;  %3134 = vst [vmem:[%s4924_s9 + $0x60] sm:$0xff] %v3556_v36  ;;  %vm2470_vm9 = vcmp.lt.s32.totalorder %v2404_v60, %v5404_v58  ;;  %v2408_v45 = vadd.s32 %v5398_v59, %v2375_v28  ;;  %v6329_v36 = vld [vmem:[#allocation47_spill] sm:$0xff]  ;;  %v2378_v22 = vadd.s32 216, %v5410_v1  ;;  %v2379_v19 = vadd.s32 224, %v5410_v1 }
 0x3b0   : > { %3135 = vst [vmem:[%s4924_s9 + $0x68] sm:$0xff] %v3557_v38  ;;  %vm2761_vm0 = vcmp.ne.s16.totalorder %v3503_v37, 0  ;;  %vm2659_vm6 = vmpackc.low %vm5793_vm12, %vm5793_vm12  ;;  %v2690_v32 = vsel %vm2658_vm14, 65537, %v4439_v21  ;;  %vm2438_vm7 = vcmp.ge.s32.totalorder %v2405_v30, %v5401_v7  ;;  %vm2471_vm10 = vcmp.lt.s32.totalorder %v2405_v30, %v5404_v58  ;;  %v6330_v37 = vld [vmem:[#allocation50_spill] sm:$0xff] }
 0x3b1   : > { %v2944_v63 = vsel %vm2761_vm0, %v2528_v35, %v4087_v48  ;;  %v2945_v15 = vsel %vm2761_vm0, %v2529_v49, %v4089_v25  ;;  %v2691_v16 = vsel %vm2659_vm6, 65537, %v4439_v21  ;;  %vm5828_vm2 = vmand %vm2435_vm13, %vm2468_vm1  ;;  %v2373_v35 = vadd.s32 176, %v5410_v1  ;;  %v4105_v48 = vld [vmem:[%s4924_s9 + $0xd0] ss:$8 sps:$4 sm:$0xff]  }
 0x3b2   : > { %v3558_v54 = vcombine.low %v2944_v63, %v2945_v15  ;;  %v3559_v56 = vcombine.high %v2944_v63, %v2945_v15  ;;  %v3504_v55 = vcombine.low %v2690_v32, %v2691_v16  ;;  %vm5837_vm3 = vmand %vm2436_vm15, %vm2469_vm4  ;;  %v2374_v49 = vadd.s32 184, %v5410_v1 }
 0x3b3   : > { %vm2660_vm8 = vmpackc.low %vm5828_vm2, %vm5828_vm2  ;;  %v2406_v4 = vadd.s32 %v5398_v59, %v2373_v35  ;;  %v2409_v25 = vadd.s32 %v5398_v59, %v2376_v42  ;;  %v2536_v38 = vpack.c.bf16 %v6329_v36, %v6328_v43  ;;  %v2537_v60 = vpack.c.bf16 %v6331_v39, %v6330_v37  ;;  %v6339_v35 = vld [vmem:[#allocation52_spill] sm:$0xff]  ;;  %v6346_v36 = vld [vmem:[#allocation59_spill] sm:$0xff] }
 0x3b4   : > { %3136 = vst [vmem:[%s4924_s9 + $0x70] sm:$0xff] %v3558_v54  ;;  %3137 = vst [vmem:[%s4924_s9 + $0x78] sm:$0xff] %v3559_v56  ;;  %vm2762_vm11 = vcmp.ne.s16.totalorder %v3504_v55, 0  ;;  %v2692_v17 = vsel %vm2660_vm8, 65537, %v4439_v21  ;;  %v2377_v63 = vadd.s32 208, %v5410_v1  ;;  %v6336_v54 = vld [vmem:[#allocation53_spill] sm:$0xff]  ;;  %v2411_v13 = vadd.s32 %v5398_v59, %v2378_v22 }
 0x3b5   : > { %vm2661_vm13 = vmpackc.low %vm5837_vm3, %vm5837_vm3  ;;  %v2946_v44 = vsel %vm2762_vm11, %v2530_v2, %v4090_v18  ;;  %v2947_v52 = vsel %vm2762_vm11, %v2531_v23, %v4092_v31  ;;  %v2407_v23 = vadd.s32 %v5398_v59, %v2374_v49  ;;  %vm2439_vm1 = vcmp.ge.s32.totalorder %v2406_v4, %v5401_v7  ;;  %v6337_v56 = vld [vmem:[#allocation51_spill] sm:$0xff]  ;;  %v6351_v31 = vld [vmem:[#allocation65_spill] sm:$0xff] }
 0x3b6   : > { %v2693_v40 = vsel %vm2661_vm13, 65537, %v4439_v21  ;;  %vm5872_vm12 = vmand %vm2437_vm5, %vm2470_vm9  ;;  %v3560_v10 = vcombine.low %v2946_v44, %v2947_v52  ;;  %v3561_v2 = vcombine.high %v2946_v44, %v2947_v52  ;;  %vm2472_vm4 = vcmp.lt.s32.totalorder %v2406_v4, %v5404_v58  ;;  %v6352_v22 = vld [vmem:[#allocation63_spill] sm:$0xff] }
 0x3b7   : > { %v3505_v5 = vcombine.low %v2692_v17, %v2693_v40  ;;  %vm5881_vm15 = vmand %vm2438_vm7, %vm2471_vm10  ;;  %vm2440_vm2 = vcmp.ge.s32.totalorder %v2407_v23, %v5401_v7  ;;  %vm2473_vm5 = vcmp.lt.s32.totalorder %v2407_v23, %v5404_v58  ;;  %vm2441_vm9 = vcmp.ge.s32.totalorder %v2408_v45, %v5401_v7  ;;  %v4102_v40 = vld [vmem:[%s4924_s9 + $0xc0] ss:$8 sps:$4 sm:$0xff]  }
 0x3b8   : > { %vm2662_vm14 = vmpackc.low %vm5872_vm12, %vm5872_vm12  ;;  %3138 = vst [vmem:[%s4924_s9 + $0x80] sm:$0xff] %v3560_v10  ;;  %vm2474_vm10 = vcmp.lt.s32.totalorder %v2408_v45, %v5404_v58  ;;  %vm2442_vm12 = vcmp.ge.s32.totalorder %v2409_v25, %v5401_v7  ;;  %v2538_v55 = vpack.c.bf16 %v6337_v56, %v6336_v54  ;;  %v2539_v49 = vpack.c.bf16 %v6339_v35, %v6338_v57  ;;  %v6344_v45 = vld [vmem:[#allocation58_spill] sm:$0xff] }
 0x3b9   : > { %3139 = vst [vmem:[%s4924_s9 + $0x88] sm:$0xff] %v3561_v2  ;;  %vm2763_vm0 = vcmp.ne.s16.totalorder %v3505_v5, 0  ;;  %vm2663_vm6 = vmpackc.low %vm5881_vm15, %vm5881_vm15  ;;  %v2694_v27 = vsel %vm2662_vm14, 65537, %v4439_v21  ;;  %vm2475_vm15 = vcmp.lt.s32.totalorder %v2409_v25, %v5404_v58  ;;  %v2410_v17 = vadd.s32 %v5398_v59, %v2377_v63  ;;  %v4107_v25 = vld [vmem:[%s4924_s9 + $0xd4] ss:$8 sps:$4 sm:$0xff]  }
 0x3ba   : > { %v2948_v29 = vsel %vm2763_vm0, %v2532_v33, %v4093_v41  ;;  %v2949_v53 = vsel %vm2763_vm0, %v2533_v61, %v4095_v26  ;;  %v2695_v50 = vsel %vm2663_vm6, 65537, %v4439_v21  ;;  %vm5908_vm3 = vmand %vm2439_vm1, %vm2472_vm4  ;;  %v2380_v0 = vadd.s32 232, %v5410_v1  ;;  %v4104_v41 = vld [vmem:[%s4924_s9 + $0xc4] ss:$8 sps:$4 sm:$0xff]   ;;  %v6350_v63 = vld [vmem:[#allocation62_spill] sm:$0xff] }
 0x3bb   : > { %v3562_v20 = vcombine.low %v2948_v29, %v2949_v53  ;;  %v3563_v9 = vcombine.high %v2948_v29, %v2949_v53  ;;  %v3506_v24 = vcombine.low %v2694_v27, %v2695_v50  ;;  %vm5913_vm7 = vmand %vm2440_vm2, %vm2473_vm5  ;;  %vm2443_vm2 = vcmp.ge.s32.totalorder %v2410_v17, %v5401_v7  ;;  %v4113_v57 = vld [vmem:[%s4924_s9 + $0xf4] ss:$8 sps:$4 sm:$0xff]  }
 0x3bc   : > { %vm2664_vm8 = vmpackc.low %vm5908_vm3, %vm5908_vm3  ;;  %vm2444_vm5 = vcmp.ge.s32.totalorder %v2411_v13, %v5401_v7  ;;  %vm2476_vm3 = vcmp.lt.s32.totalorder %v2410_v17, %v5404_v58  ;;  %v2412_v10 = vadd.s32 %v5398_v59, %v2379_v19  ;;  %v2413_v2 = vadd.s32 %v5398_v59, %v2380_v0 }
 0x3bd   : > { %3140 = vst [vmem:[%s4924_s9 + $0x90] sm:$0xff] %v3562_v20  ;;  %3141 = vst [vmem:[%s4924_s9 + $0x98] sm:$0xff] %v3563_v9  ;;  %vm2764_vm11 = vcmp.ne.s16.totalorder %v3506_v24, 0  ;;  %v2696_v30 = vsel %vm2664_vm8, 65537, %v4439_v21  ;;  %v2381_v5 = vadd.s32 240, %v5410_v1  ;;  %v2382_v53 = vadd.s32 248, %v5410_v1 }
 0x3be   : > { %vm2665_vm13 = vmpackc.low %vm5913_vm7, %vm5913_vm7  ;;  %v2950_v32 = vsel %vm2764_vm11, %v2534_v3, %v4096_v51  ;;  %v2951_v12 = vsel %vm2764_vm11, %v2535_v14, %v4098_v6  ;;  %vm2477_vm7 = vcmp.lt.s32.totalorder %v2411_v13, %v5404_v58  ;;  %vm2445_vm11 = vcmp.ge.s32.totalorder %v2412_v10, %v5401_v7  ;;  %v6342_v51 = vld [vmem:[#allocation57_spill] sm:$0xff]  ;;  %v6343_v6 = vld [vmem:[#allocation55_spill] sm:$0xff] }
 0x3bf   : > { %v2697_v33 = vsel %vm2665_vm13, 65537, %v4439_v21  ;;  %vm5938_vm14 = vmand %vm2441_vm9, %vm2474_vm10  ;;  %v3564_v15 = vcombine.low %v2950_v32, %v2951_v12  ;;  %v3565_v16 = vcombine.high %v2950_v32, %v2951_v12  ;;  %vm2446_vm13 = vcmp.ge.s32.totalorder %v2413_v2, %v5401_v7  ;;  %v6345_v20 = vld [vmem:[#allocation56_spill] sm:$0xff] }
 0x3c0   : > { %v3507_v18 = vcombine.low %v2696_v30, %v2697_v33  ;;  %vm5943_vm1 = vmand %vm2442_vm12, %vm2475_vm15  ;;  %vm2478_vm15 = vcmp.lt.s32.totalorder %v2412_v10, %v5404_v58  ;;  %v2414_v50 = vadd.s32 %v5398_v59, %v2381_v5  ;;  %v2540_v8 = vpack.c.bf16 %v6343_v6, %v6342_v51  ;;  %v6348_v30 = vld [vmem:[#allocation60_spill] sm:$0xff] }
 0x3c1   : > { %vm2666_vm4 = vmpackc.low %vm5938_vm14, %vm5938_vm14  ;;  %3142 = vst [vmem:[%s4924_s9 + $0xa0] sm:$0xff] %v3564_v15  ;;  %vm2479_vm14 = vcmp.lt.s32.totalorder %v2413_v2, %v5404_v58  ;;  %v2541_v9 = vpack.c.bf16 %v6345_v20, %v6344_v45  ;;  %v2415_v1 = vadd.s32 %v5398_v59, %v2382_v53  ;;  %v4108_v33 = vld [vmem:[%s4924_s9 + $0xe0] ss:$8 sps:$4 sm:$0xff]   ;;  %v2545_v54 = vpack.c.bf16 %v6352_v22, %v6351_v31 }
 0x3c2   : > { %3143 = vst [vmem:[%s4924_s9 + $0xa8] sm:$0xff] %v3565_v16  ;;  %vm2765_vm0 = vcmp.ne.s16.totalorder %v3507_v18, 0  ;;  %vm2667_vm6 = vmpackc.low %vm5943_vm1, %vm5943_vm1  ;;  %v2698_v3 = vsel %vm2666_vm4, 65537, %v4439_v21 }
 0x3c3   : > { %v2952_v14 = vsel %vm2765_vm0, %v2536_v38, %v4099_v47  ;;  %v2953_v44 = vsel %vm2765_vm0, %v2537_v60, %v4101_v62  ;;  %v2699_v52 = vsel %vm2667_vm6, 65537, %v4439_v21  ;;  %vm2508_vm9 = vmand %vm2443_vm2, %vm2476_vm3  ;;  %vm2447_vm6 = vcmp.ge.s32.totalorder %v2414_v50, %v5401_v7  ;;  %v6347_v60 = vld [vmem:[#allocation61_spill] sm:$0xff] }
 0x3c4   : > { %v3566_v26 = vcombine.low %v2952_v14, %v2953_v44  ;;  %v3567_v46 = vcombine.high %v2952_v14, %v2953_v44  ;;  %v3508_v4 = vcombine.low %v2698_v3, %v2699_v52  ;;  %vm5977_vm10 = vmand %vm2444_vm5, %vm2477_vm7  ;;  %vm2480_vm2 = vcmp.lt.s32.totalorder %v2414_v50, %v5404_v58 }
 0x3c5   : > { %vm2668_vm12 = vmpackc.low %vm2508_vm9, %vm2508_vm9  ;;  %v2542_v38 = vpack.c.bf16 %v6346_v36, %v5285_v34  ;;  %vm2481_vm9 = vcmp.lt.s32.totalorder %v2415_v1, %v5404_v58  ;;  %v2543_v32 = vpack.c.bf16 %v6348_v30, %v6347_v60  ;;  %v4110_v34 = vld [vmem:[%s4924_s9 + $0xe4] ss:$8 sps:$4 sm:$0xff]  }
 0x3c6   : > { %3144 = vst [vmem:[%s4924_s9 + $0xb0] sm:$0xff] %v3566_v26  ;;  %3145 = vst [vmem:[%s4924_s9 + $0xb8] sm:$0xff] %v3567_v46  ;;  %vm2766_vm8 = vcmp.ne.s16.totalorder %v3508_v4, 0  ;;  %v2700_v29 = vsel %vm2668_vm12, 65537, %v4439_v21  ;;  %v6349_v58 = vld [vmem:[#allocation64_spill] sm:$0xff] }
 0x3c7   : > { %v2954_v11 = vsel %vm2766_vm8, %v2538_v55, %v4102_v40  ;;  %v2955_v23 = vsel %vm2766_vm8, %v2539_v49, %v4104_v41  ;;  %vm2669_vm1 = vmpackc.low %vm5977_vm10, %vm5977_vm10  ;;  %vm2448_vm8 = vcmp.ge.s32.totalorder %v2415_v1, %v5401_v7  ;;  %v2544_v15 = vpack.c.bf16 %v6350_v63, %v6349_v58  ;;  %v4111_v55 = vld [vmem:[%s4924_s9 + $0xf0] ss:$8 sps:$4 sm:$0xff]  }
 0x3c8   : > { %v3568_v42 = vcombine.low %v2954_v11, %v2955_v23  ;;  %v3569_v27 = vcombine.high %v2954_v11, %v2955_v23  ;;  %v2701_v24 = vsel %vm2669_vm1, 65537, %v4439_v21  ;;  %vm2510_vm4 = vmand %vm2445_vm11, %vm2478_vm15 }
 0x3c9   : > { %v3509_v43 = vcombine.low %v2700_v29, %v2701_v24  ;;  %vm2511_vm0 = vmand %vm2446_vm13, %vm2479_vm14 }
 0x3ca   : > { %3146 = vst [vmem:[%s4924_s9 + $0xc0] sm:$0xff] %v3568_v42  ;;  %3147 = vst [vmem:[%s4924_s9 + $0xc8] sm:$0xff] %v3569_v27 }
 0x3cb   : > { %vm2670_vm5 = vmpackc.low %vm2510_vm4, %vm2510_vm4  ;;  %vm2767_vm3 = vcmp.ne.s16.totalorder %v3509_v43, 0 }
 0x3cc   : > { %vm2671_vm7 = vmpackc.low %vm2511_vm0, %vm2511_vm0  ;;  %v2702_v37 = vsel %vm2670_vm5, 65537, %v4439_v21  ;;  %v2956_v39 = vsel %vm2767_vm3, %v2540_v8, %v4105_v48  ;;  %v2957_v59 = vsel %vm2767_vm3, %v2541_v9, %v4107_v25 }
 0x3cd   : > { %v2703_v12 = vsel %vm2671_vm7, 65537, %v4439_v21  ;;  %vm2512_vm10 = vmand %vm2447_vm6, %vm2480_vm2  ;;  %v3570_v47 = vcombine.low %v2956_v39, %v2957_v59  ;;  %v3571_v62 = vcombine.high %v2956_v39, %v2957_v59 }
 0x3ce   : > { %v3510_v61 = vcombine.low %v2702_v37, %v2703_v12  ;;  %vm2513_vm11 = vmand %vm2448_vm8, %vm2481_vm9 }
 0x3cf   : > { %vm2672_vm13 = vmpackc.low %vm2512_vm10, %vm2512_vm10  ;;  %3148 = vst [vmem:[%s4924_s9 + $0xd0] sm:$0xff] %v3570_v47 }
 0x3d0   : > { %3149 = vst [vmem:[%s4924_s9 + $0xd8] sm:$0xff] %v3571_v62  ;;  %vm2768_vm12 = vcmp.ne.s16.totalorder %v3510_v61, 0  ;;  %vm2673_vm15 = vmpackc.low %vm2513_vm11, %vm2513_vm11  ;;  %v2704_v16 = vsel %vm2672_vm13, 65537, %v4439_v21 }
 0x3d1   : > { %v2958_v7 = vsel %vm2768_vm12, %v2542_v38, %v4108_v33  ;;  %v2959_v18 = vsel %vm2768_vm12, %v2543_v32, %v4110_v34  ;;  %v2705_v56 = vsel %vm2673_vm15, 65537, %v4439_v21 }
 0x3d2   : > { %v3572_v35 = vcombine.low %v2958_v7, %v2959_v18  ;;  %v3573_v49 = vcombine.high %v2958_v7, %v2959_v18  ;;  %v3511_v17 = vcombine.low %v2704_v16, %v2705_v56 }
 0x3d4   : > { %3150 = vst [vmem:[%s4924_s9 + $0xe0] sm:$0xff] %v3572_v35  ;;  %3151 = vst [vmem:[%s4924_s9 + $0xe8] sm:$0xff] %v3573_v49  ;;  %vm2769_vm14 = vcmp.ne.s16.totalorder %v3511_v17, 0 }
 0x3d5   : > { %v2960_v19 = vsel %vm2769_vm14, %v2544_v15, %v4111_v55  ;;  %v2961_v3 = vsel %vm2769_vm14, %v2545_v54, %v4113_v57 }
 0x3d6   : > { %v3574_v13 = vcombine.low %v2960_v19, %v2961_v3  ;;  %v3575_v0 = vcombine.high %v2960_v19, %v2961_v3 }
 0x3d8   : > { %3152 = vst [vmem:[%s4924_s9 + $0xf0] sm:$0xff] %v3574_v13  ;;  %3153 = vst [vmem:[%s4924_s9 + $0xf8] sm:$0xff] %v3575_v0 }
 0x3d9 PF: > { %p6353_p7 = scmp.ne.s32.totalorder %s6194_s10, 0  ;;  %s6354_s20 = sld [smem:[#allocation31_spill]] }
 0x3da   : > { %s6355_s30 = sld [smem:[#allocation32_spill]]  ;;  %s3172_s12 = sshll.u32 %s4924_s9, 4  ;;  %s6040_s12 = int_to_ptr.vmem [resolvable:$true] %s3172_s12 }
 0x3db   : > { %s3696_s2 = scalar_select %p6353_p7, [#allocation5], [#allocation18] }
 0x3dc   : > { %s6356_s13 = sld [smem:[#allocation68_spill]]  ;;  %s6049_s22 = scalar_lea.sflag [#allocation10], %s347_s21 }
 0x3dd   : > { %s4244_s24 = scalar_lea.vmem %s6040_s12, 4096  ;;  %s4440_s9 = smov [#allocation14]  }
 0x3de   : > { %p4245_p5 = scmp.ne.s32.totalorder %s6040_s12, %s4244_s24  ;;  %s4248_s14 = sshll.u32 %s4440_s9, 4  ;;  %s4249_s14 = int_to_ptr.vmem [resolvable:$false] %s4248_s14 }
 0x3df   : > { %s6400_s20 = smov (!%p6353_p7, %s6354_s20), 0  ;;  %s4250_s11 = scalar_lea.vmem %s4249_s14, 8192 }
 0x3e0   : > { %s3162_s28 = sld [smem:[%s3696_s2 + %s6400_s20]]  ;;  %s3578_s7 = sshll.u32 %s6355_s30, 1 }
 0x3e1   : > { %p4246_p2 = pnand %p4245_p5, %p6353_p7  ;;  %p4251_p6 = scmp.lt.s32.totalorder %s6040_s12, %s4249_s14 }
 0x3e2   : > { %p4252_p8 = scmp.lt.s32.totalorder %s4250_s11, %s4244_s24 }
 0x3e3   : > { %p4247_p10 = pneg %p4246_p2 }
 0x3e4   : > { %p4253_p11 = por %p4252_p8, %p4251_p6 }
 0x3e6   : > { %s3619_s15 = sshll.u32 %s3162_s28, 7  ;;  %p4254_p4 = pnand %p4253_p11, %p4247_p10 }
 0x3e7   : > { %s3169_s5 = sadd.s32 %s3619_s15, %s3578_s7 }
 0x3e8   : > { %s3580_s25 = sshll.u32 %s3169_s5, 6 }
 0x3e9   : > { %s6045_s8 = scalar_lea.hbm %s6356_s13, %s3580_s25 }
 0x3ea   : > { %4257 = shalt.err (!%p4254_p4)
}
 0x3eb   : > { %s4258_s21 = scalar_lea.hbm %s6045_s8, 4096  ;;  %s4262_s30 = scalar_lea.hbm %s6356_s13, 8192 }
 0x3ec   : > { %p4259_p13 = scmp.ne.s32.totalorder %s6045_s8, %s4258_s21  ;;  %p4263_p12 = scmp.lt.u32.totalorder %s6045_s8, %s6356_s13 }
 0x3ed   : > { %p4264_p3 = scmp.lt.u32.totalorder %s4262_s30, %s4258_s21  ;;  %p4266_p5 = scmp.lt.u32.totalorder %s4258_s21, %s6045_s8 }
 0x3ee   : > { %p4260_p9 = pnand %p4259_p13, %p6353_p7 }
 0x3ef   : > { %p4265_p1 = por %p4264_p3, %p4263_p12 }
 0x3f0   : > { %p4261_p0 = pneg %p4260_p9 }
 0x3f1   : > { %p4267_p2 = por %p4266_p5, %p4265_p1 }
 0x3f3   : > { %p4268_p10 = pnand %p4267_p2, %p4261_p0 }
 0x3f5   : > { %4271 = shalt.err (!%p4268_p10)
}
 0x3f6   : > { %s4441_s7 = smov 128   ;;  %s4442_s15 = smov 256  }
 0x3f7   : > { %s4443_s5 = smov 8  }
 0x3f8   : > { %3698 = dma.vmem_to_hbm [thread:$0]  (%p6353_p7), %s6040_s12, 4096, %s6045_s8, %s6049_s22, %s4441_s7, %s4442_s15, %s4443_s5  }
 0x3f9 PF: > { %s6357_s25 = sld [smem:[#allocation27_spill]]  ;;  %p3721_p6 = scmp.ge.s32.totalorder %s4424_s29, 2 }
 0x3fa   : > { %p6358_p8 = scmp.ne.s32.totalorder %s6195_s0, 0 }
 0x3fc   : > { %p3717_p11 = pnand %p3721_p6, %p6358_p8 }
 0x3ff   : > { %s3187_s1 = sand.u32 1, %s6357_s25  }
 0x400   : > { %s3188_s26 = scalar_lea.sflag [#allocation10], %s3187_s1 }
 0x401   : > { %4355 = dma.done.wait (!%p3717_p11), %s3188_s26, 4096  }
 0x402   : > { %4357 = vsyncadd (!%p3717_p11), %s3188_s26, 4294963200  ;;  %s36_s29 = sadd.s32 1, %s4424_s29   ;;  %s6360_s10 = sld [smem:[#allocation38_spill]] }
 0x403   : > { %p6078_p4 = scmp.ge.s32.totalorder %s36_s29, 10   ;;  %s6361_s20 = sld [smem:[#allocation28_spill]] }
 0x404   : > { %s6362_s0 = sld [smem:[#allocation29_spill]]  ;;  %s6363_s21 = sld [smem:[#allocation37_spill]] }
 0x405   : > { %s6364_s12 = sld [smem:[#allocation30_spill]]  ;;  %s6365_s8 = sld [smem:[#allocation39_spill]] }
 0x406   : > { %s6366_s26 = sld [smem:[#allocation33_spill]]  ;;  %s6367_s9 = sld [smem:[#allocation34_spill]] }
 0x407   : > { %s6368_s28 = sld [smem:[#allocation35_spill]]  ;;  %s6369_s2 = smov %s4364_s16 }
 0x408   : > { %s6370_s16 = smov %s4368_s17  ;;  %s6372_s17 = smov %s6360_s10 }
 0x409   : > { %s6373_s18 = smov %s4376_s19  ;;  %s6374_s19 = smov %s4380_s3 }
 0x40a   : > { %s6375_s3 = smov %s4836_s4  ;;  %s6376_s22 = smov %s4400_s23 }
 0x40b   : > { %s6377_s23 = smov %s6364_s12  ;;  %s6378_s24 = smov %s6365_s8 }
 0x40c   : > { %s6379_s25 = smov %s4416_s27  ;;  %s6380_s27 = smov %s6367_s9 }
 0x40d   :  { %35 = sbr.rel (!%p6078_p4) target bundleno = 48 (0x30), region = 121 }
 0x414   :  { %3193 = vsyncpa [#allocation9], 1 }
 0x415   :  { %3195 = vsyncpa [#allocation9 + $0x1], 1 }
 0x416   :  { %3196 = vsyncpa [#allocation12], 1 }
 0x417   :  { %3198 = vsyncpa [#allocation12 + $0x1], 1 }
 0x418   :  { %3199 = vsyncpa [#allocation10], 1 }
 0x419   :  { %3201 = vsyncpa [#allocation10 + $0x1], 1 }

</bundles_post_ra>
